<compile_context>
chip_gen: v7x
topology: tpu7x:2x2x1
jax: 0.10.0
libtpu: 0.0.40
codegen_flags: <defaults>
</compile_context>

<pallas_src>
import functools

import numpy as np
import jax
import jax.numpy as jnp
from jax.experimental import pallas as pl
from jax.experimental.pallas import tpu as pltpu


# ----------------------------- Pallas kernel ---------------------------------

def _conv_band_kernel(*refs, taps, pad_top, pad_bot, pre_add, has_row_mat,
                      epilogue):
    """Generic banded conv kernel (one batch element per grid step).

    refs (in order): x_ref (1, R, CC) [, x2_ref (1, R, CC)] [, m_ref (MR, R... )]
                     w_ref (T, CW, NCOL), b_ref (1, NCOL)
                     [, add_ref (1, HO, NCOL)] , o_ref (1, HO, OUT_COLS)

    out[oh, :] = epilogue( sum_t x[ro_t + oh, co_t : co_t + CW] @ w[t] + b )
    """
    it = iter(refs)
    x_ref = next(it)
    x2_ref = next(it) if pre_add else None
    m_ref = next(it) if has_row_mat else None
    w_ref = next(it)
    b_ref = next(it)
    add_ref = next(it) if epilogue == "add_relu" else None
    o_ref = next(it)

    ho = o_ref.shape[1]
    cw = w_ref.shape[1]

    x = x_ref[0]
    if pre_add:                      # fused skip_sum (decoder / prediction)
        x = x + x2_ref[0]
    if has_row_mat:                  # fused bilinear x2 row-upsample (+ row pad)
        x = jnp.dot(m_ref[...], x, preferred_element_type=jnp.float32)
    if pad_top or pad_bot:           # zero 'same' padding in the row direction
        cols = x.shape[1]
        parts = []
        if pad_top:
            parts.append(jnp.zeros((pad_top, cols), x.dtype))
        parts.append(x)
        if pad_bot:
            parts.append(jnp.zeros((pad_bot, cols), x.dtype))
        x = jnp.concatenate(parts, axis=0)

    acc = None
    for t, (ro, co) in enumerate(taps):
        lhs = x[ro:ro + ho, co:co + cw]
        part = jnp.dot(lhs, w_ref[t], preferred_element_type=jnp.float32)
        acc = part if acc is None else acc + part
    acc = acc + b_ref[...]

    if epilogue == "relu":
        out = jnp.maximum(acc, 0.0)
    elif epilogue == "linear":
        out = acc
    elif epilogue == "add_relu":     # fused residual add + ReLU
        out = jnp.maximum(acc + add_ref[0], 0.0)
    else:                            # "lstm": zero-initial-state ConvLSTM gates
        gw = o_ref.shape[2]          # gate columns are gate-major, 128-aligned
        i_s = jax.nn.sigmoid(acc[:, 0:gw])
        o_s = jax.nn.sigmoid(acc[:, gw:2 * gw])
        c_s = jnp.tanh(acc[:, 2 * gw:3 * gw])
        out = o_s * jnp.tanh(i_s * c_s)          # cell = i*g since c0 == 0
    o_ref[0] = out.astype(o_ref.dtype)


def _conv_band_call(x, w_bands, b_row, *, taps, pad=(0, 0), pre_add=None,
                    row_mat=None, add=None, epilogue="relu", gate_w=0):
    """Launch the banded conv kernel over the batch grid."""
    N, R, CC = x.shape
    T, cw, ncol = w_bands.shape
    rows_after = row_mat.shape[0] if row_mat is not None else R + pad[0] + pad[1]
    ho = rows_after - max(ro for ro, _ in taps)
    if epilogue == "lstm":
        assert gate_w > 0 and ncol == 3 * gate_w
        out_cols = gate_w
    else:
        out_cols = ncol

    inputs = [x]
    in_specs = [pl.BlockSpec((1, R, CC), lambda n: (n, 0, 0))]
    if pre_add is not None:
        assert pre_add.shape == x.shape
        inputs.append(pre_add)
        in_specs.append(pl.BlockSpec((1, R, CC), lambda n: (n, 0, 0)))
    if row_mat is not None:
        inputs.append(row_mat)
        in_specs.append(pl.BlockSpec(row_mat.shape, lambda n: (0, 0)))
    inputs.append(w_bands)
    in_specs.append(pl.BlockSpec((T, cw, ncol), lambda n: (0, 0, 0)))
    inputs.append(b_row)
    in_specs.append(pl.BlockSpec((1, ncol), lambda n: (0, 0)))
    if epilogue == "add_relu":
        assert add is not None and add.shape == (N, ho, out_cols)
        inputs.append(add)
        in_specs.append(pl.BlockSpec((1, ho, out_cols), lambda n: (n, 0, 0)))

    kernel = functools.partial(
        _conv_band_kernel, taps=tuple(taps), pad_top=pad[0], pad_bot=pad[1],
        pre_add=pre_add is not None, has_row_mat=row_mat is not None,
        epilogue=epilogue)

    return pl.pallas_call(
        kernel,
        out_shape=jax.ShapeDtypeStruct((N, ho, out_cols), x.dtype),
        grid=(N,),
        in_specs=in_specs,
        out_specs=pl.BlockSpec((1, ho, out_cols), lambda n: (n, 0, 0)),
        compiler_params=pltpu.CompilerParams(
            dimension_semantics=("parallel",),
            vmem_limit_bytes=32 * 1024 * 1024),
    )(*inputs)


# --------------------- banded-weight preprocessing (host) --------------------

def _conv_bands_np(w, b, width, stride=1):
    """Band matrices for a KxK conv with 'same' zero padding (pad = K//2).

    w: (K, K, Cin, Cout) HWIO, b: (Cout,).  `width` is the UNPADDED input
    width; the zero padding (and the stride along width) are folded into the
    bands.  Returns bands (K, width*Cin, wo*Cout), bias (1, wo*Cout)."""
    w = np.asarray(w, np.float32)
    b = np.asarray(b, np.float32)
    K, _, Cin, Cout = w.shape
    P = K // 2
    wo = width if stride == 1 else width // stride
    bands = np.zeros((K, width * Cin, wo * Cout), np.float32)
    for kh in range(K):
        for ow in range(wo):
            for kw in range(K):
                pw = stride * ow + kw - P
                if 0 <= pw < width:
                    bands[kh, pw * Cin:(pw + 1) * Cin,
                          ow * Cout:(ow + 1) * Cout] = w[kh, kw]
    bias = np.tile(b, wo)[None, :]
    return bands, bias


def _upsample_matrix_np(n):
    """(n, 2n) matrix of F.interpolate(scale=2, bilinear, align_corners=False)."""
    U = np.zeros((n, 2 * n), np.float32)
    for u in range(2 * n):
        j = u // 2
        if u % 2 == 0:
            U[max(j - 1, 0), u] += 0.25
            U[j, u] += 0.75
        else:
            U[j, u] += 0.75
            U[min(j + 1, n - 1), u] += 0.25
    return U


def _prep_conv(w, b, width, stride=1):
    bands, bias = _conv_bands_np(w, b, width, stride)
    return {"w": jnp.asarray(bands), "b": jnp.asarray(bias)}


def _prep_gates(w_gates, b_gates, width, Hc):
    """ConvLSTM Gates conv with zero initial state, gate-major output columns."""
    w = np.asarray(w_gates, np.float32)
    b = np.asarray(b_gates, np.float32)
    w_x = w[:, :, :Hc, :]                       # h0 == 0 -> drop the h half
    idx = np.r_[0:Hc, 2 * Hc:3 * Hc, 3 * Hc:4 * Hc]   # keep (in, out, cell)
    w_sel = w_x[:, :, :, idx]
    b_sel = b[idx]
    bands, bias = _conv_bands_np(w_sel, b_sel, width)
    K, rows = bands.shape[0], bands.shape[1]
    wo = width
    # permute output columns from (pixel, gate, hc) to (gate, pixel, hc)
    bands = bands.reshape(K, rows, wo, 3, Hc).transpose(0, 1, 3, 2, 4) \
                 .reshape(K, rows, 3 * wo * Hc)
    bias = bias.reshape(wo, 3, Hc).transpose(1, 0, 2).reshape(1, 3 * wo * Hc)
    return {"w": jnp.asarray(bands), "b": jnp.asarray(bias)}, wo * Hc


def _prep_decoder(w, b, hs, ws):
    """Fused skip-sum + bilinear x2 upsample + 'same' KxK conv."""
    w = np.asarray(w, np.float32)
    K, _, Cin, _ = w.shape
    P = K // 2
    bands_u, bias = _conv_bands_np(w, b, 2 * ws)          # conv on upsampled width
    Ufull = np.kron(_upsample_matrix_np(ws), np.eye(Cin, dtype=np.float32))
    bands = np.einsum('ij,kjl->kil', Ufull, bands_u)      # fold column upsample
    Mp = np.zeros((2 * hs + 2 * P, hs), np.float32)       # row upsample + row pad
    Mp[P:P + 2 * hs, :] = _upsample_matrix_np(hs).T
    return {"w": jnp.asarray(bands), "b": jnp.asarray(bias),
            "m": jnp.asarray(Mp)}


def _stride2_taps(K, slot_cols):
    """Tap (row, col) offsets for a stride-2 conv on row-pair-merged input."""
    P = K // 2
    pair_offs = [(kh - P) // 2 for kh in range(K)]
    n_pre = max(0, -min(pair_offs))
    n_post = max(0, max(pair_offs))
    taps = tuple(((kh - P) // 2 + n_pre, ((kh - P) % 2) * slot_cols)
                 for kh in range(K))
    return taps, n_pre, n_post


# ----------------------------- parameters & model ----------------------------

def init_conv_params(key, k, cin, cout):
    kw, kb = jax.random.split(key)
    bound = 1.0 / np.sqrt(cin * k * k)
    w = jax.random.uniform(kw, (k, k, cin, cout), jnp.float32, -bound, bound)
    b = jax.random.uniform(kb, (cout,), jnp.float32, -bound, bound)
    return w, b


def init_uconvlstm_params(key, cfg):
    keys = iter(jax.random.split(key, 64))
    k = cfg["kernel"]
    enc_in = [cfg["base_num_channels"] * 2 ** i for i in range(cfg["num_encoders"])]
    enc_out = [cfg["base_num_channels"] * 2 ** (i + 1) for i in range(cfg["num_encoders"])]
    params = {}
    params["head"] = init_conv_params(next(keys), k, cfg["num_bins"], cfg["base_num_channels"])
    params["enc_conv"] = [init_conv_params(next(keys), k, ci, co)
                          for ci, co in zip(enc_in, enc_out)]
    # ConvLSTM_s Gates: kernel_size fixed to 3 in RecurrentConvLSTM, pad=1.
    params["enc_gates"] = [init_conv_params(next(keys), 3, 2 * co, 4 * co) for co in enc_out]
    mx = enc_out[-1]
    params["res"] = [(init_conv_params(next(keys), 3, mx, mx),
                      init_conv_params(next(keys), 3, mx, mx))
                     for _ in range(cfg["num_residual_blocks"])]
    params["dec"] = [init_conv_params(next(keys), k, ci, co)
                     for ci, co in zip(reversed(enc_out), reversed(enc_in))]
    params["pred"] = init_conv_params(next(keys), 1, cfg["base_num_channels"],
                                      cfg["num_output_channels"])
    return params


def prepare_uconvlstm(params, cfg, H, W):
    """One-time host-side conversion of HWIO weights into band matrices."""
    K = cfg["kernel"]
    assert K % 2 == 1
    ne = cfg["num_encoders"]
    base = cfg["base_num_channels"]
    enc_out = [base * 2 ** (i + 1) for i in range(ne)]

    plan = {"head": _prep_conv(*params["head"], width=W),
            "enc_conv": [], "enc_gates": [], "gate_w": [], "res": [], "dec": []}
    h, w_sp = H, W
    for i in range(ne):
        assert h % 2 == 0 and w_sp % 2 == 0
        plan["enc_conv"].append(_prep_conv(*params["enc_conv"][i],
                                           width=w_sp, stride=2))
        h, w_sp = h // 2, w_sp // 2
        g, gw = _prep_gates(*params["enc_gates"][i], width=w_sp, Hc=enc_out[i])
        plan["enc_gates"].append(g)
        plan["gate_w"].append(gw)
    for (p1, p2) in params["res"]:
        plan["res"].append((_prep_conv(*p1, width=w_sp),
                            _prep_conv(*p2, width=w_sp)))
    for i in range(ne):
        plan["dec"].append(_prep_decoder(*params["dec"][i], hs=h, ws=w_sp))
        h, w_sp = h * 2, w_sp * 2
    plan["pred"] = _prep_conv(*params["pred"], width=w_sp)
    return plan


def uconvlstm_forward(plan, x_nchw, cfg):
    K = cfg["kernel"]
    ne = cfg["num_encoders"]
    N, C, H, W = x_nchw.shape
    taps1 = lambda k: tuple((kh, 0) for kh in range(k))

    # NCHW -> lane-dense (N, H, W*C) (pixel-major, channel-minor)
    x = jnp.transpose(x_nchw, (0, 2, 3, 1)).reshape(N, H, W * C)

    # head: KxK 'same' conv + ReLU
    head = _conv_band_call(x, plan["head"]["w"], plan["head"]["b"],
                           taps=taps1(K), pad=(K // 2, K // 2), epilogue="relu")
    x = head
    h, w_sp, cin = H, W, cfg["base_num_channels"]

    blocks = []
    for i in range(ne):
        # stride-2 encoder conv + ReLU: stride folded into bands + row-pair trick
        slot_cols = w_sp * cin
        taps2, n_pre, n_post = _stride2_taps(K, slot_cols)
        xp = x.reshape(N, h // 2, 2 * slot_cols)          # free pair-merge reshape
        ec = plan["enc_conv"][i]
        x = _conv_band_call(xp, ec["w"], ec["b"], taps=taps2,
                            pad=(n_pre, n_post), epilogue="relu")
        h, w_sp, cin = h // 2, w_sp // 2, cin * 2
        # ConvLSTM (zero initial state) fused into the gates-conv epilogue
        eg = plan["enc_gates"][i]
        x = _conv_band_call(x, eg["w"], eg["b"], taps=taps1(3), pad=(1, 1),
                            epilogue="lstm", gate_w=plan["gate_w"][i])
        blocks.append(x)

    # residual blocks: second conv fuses the residual add + ReLU
    for (r1, r2) in plan["res"]:
        residual = x
        out = _conv_band_call(x, r1["w"], r1["b"], taps=taps1(3), pad=(1, 1),
                              epilogue="relu")
        x = _conv_band_call(out, r2["w"], r2["b"], taps=taps1(3), pad=(1, 1),
                            epilogue="add_relu", add=residual)

    # decoders: ONE kernel per level = skip-sum + bilinear x2 + conv + ReLU
    for i in range(ne):
        d = plan["dec"][i]
        skip = blocks[ne - 1 - i]
        x = _conv_band_call(x, d["w"], d["b"], taps=taps1(K), pad=(0, 0),
                            pre_add=skip, row_mat=d["m"], epilogue="relu")

    # prediction: 1x1 conv with the head skip-sum fused as a pre-add
    p = plan["pred"]
    img = _conv_band_call(x, p["w"], p["b"], taps=((0, 0),), pad=(0, 0),
                          pre_add=head, epilogue="linear")
    co = cfg["num_output_channels"]
    img = img.reshape(N, H, W, co)
    return jnp.transpose(img, (0, 3, 1, 2))               # NHWC -> NCHW


# ----------------------------- plain-JAX reference ---------------------------

def _ref_conv(x, w, b, stride=1, padding=0, relu=True):
    out = jax.lax.conv_general_dilated(
        x, w, window_strides=(stride, stride),
        padding=[(padding, padding), (padding, padding)],
        dimension_numbers=("NHWC", "HWIO", "NHWC"),
        precision=jax.lax.Precision.HIGHEST)
    out = out + b[None, None, None, :]
    return jnp.maximum(out, 0.0) if relu else out


def _ref_upsample2_axis(x, axis):
    n = x.shape[axis]
    idx_l = jnp.concatenate([jnp.array([0]), jnp.arange(n - 1)])
    idx_r = jnp.concatenate([jnp.arange(1, n), jnp.array([n - 1])])
    left = jnp.take(x, idx_l, axis=axis)
    right = jnp.take(x, idx_r, axis=axis)
    even = 0.25 * left + 0.75 * x
    odd = 0.75 * x + 0.25 * right
    out = jnp.stack([even, odd], axis=axis + 1)
    shape = list(x.shape)
    shape[axis] = 2 * n
    return out.reshape(shape)


def _ref_forward(params, x_nchw, cfg):
    K = cfg["kernel"]
    pad = K // 2
    x = jnp.transpose(x_nchw, (0, 2, 3, 1))
    wh, bh = params["head"]
    x = _ref_conv(x, wh, bh, 1, pad, True)
    head = x
    blocks = []
    for i in range(cfg["num_encoders"]):
        wc, bc = params["enc_conv"][i]
        x = _ref_conv(x, wc, bc, 2, pad, True)
        wg, bg = params["enc_gates"][i]
        hc = x.shape[-1]
        h0 = jnp.zeros_like(x)
        c0 = jnp.zeros_like(x)
        g = _ref_conv(jnp.concatenate([x, h0], -1), wg, bg, 1, 1, False)
        i_g = jax.nn.sigmoid(g[..., 0 * hc:1 * hc])
        r_g = jax.nn.sigmoid(g[..., 1 * hc:2 * hc])
        o_g = jax.nn.sigmoid(g[..., 2 * hc:3 * hc])
        c_g = jnp.tanh(g[..., 3 * hc:4 * hc])
        cell = r_g * c0 + i_g * c_g
        x = o_g * jnp.tanh(cell)
        blocks.append(x)
    for (w1, b1), (w2, b2) in params["res"]:
        res = x
        o = _ref_conv(x, w1, b1, 1, 1, True)
        o = _ref_conv(o, w2, b2, 1, 1, False)
        x = jnp.maximum(o + res, 0.0)
    for i in range(cfg["num_encoders"]):
        wd, bd = params["dec"][i]
        s = x + blocks[cfg["num_encoders"] - 1 - i]
        s = _ref_upsample2_axis(s, 1)
        s = _ref_upsample2_axis(s, 2)
        x = _ref_conv(s, wd, bd, 1, pad, True)
    wp, bp = params["pred"]
    img = _ref_conv(x + head, wp, bp, 1, 0, False)
    return jnp.transpose(img, (0, 3, 1, 2))


# ----------------------------- main -------------------------------------------

if __name__ == "__main__":
    cfg = dict(
        num_bins=4,             # input channels
        base_num_channels=8,
        kernel=3,
        num_residual_blocks=2,
        num_encoders=2,
        num_output_channels=1,
    )
    key = jax.random.PRNGKey(0)
    kx, kp = jax.random.split(key)
    x = jax.random.normal(kx, (2, cfg["num_bins"], 16, 16), jnp.float32)
    params = init_uconvlstm_params(kp, cfg)
    plan = prepare_uconvlstm(params, cfg, 16, 16)

    fwd = jax.jit(lambda inp: uconvlstm_forward(plan, inp, cfg))
    out = fwd(x)
    jax.block_until_ready(out)

    assert out.shape == (2, cfg["num_output_channels"], 16, 16), out.shape
    assert bool(jnp.all(jnp.isfinite(out)))

    # sanity check against a plain-JAX reference of the PyTorch module
    ref = _ref_forward(params, x, cfg)
    np.testing.assert_allclose(np.asarray(out), np.asarray(ref),
                               rtol=2e-2, atol=2e-2)
    print("KERNEL_OK")
</pallas_src>

<mosaic_0001>
module attributes {stable_mosaic.version = 11 : i64} {
  func.func @_conv_band_kernel(%arg0: i32, %arg1: memref<1x16x64xf32, #tpu.memory_space<vmem>>, %arg2: memref<3x64x128xf32, #tpu.memory_space<vmem>>, %arg3: memref<1x128xf32, #tpu.memory_space<vmem>>, %arg4: memref<1x16x128xf32, #tpu.memory_space<vmem>>) attributes {dimension_semantics = [#tpu.dimension_semantics<parallel>], iteration_bounds = array<i64: 2>, scalar_prefetch = 0 : i64, scratch_operands = 0 : i64, tpu.core_type = #tpu.core_type<tc>, window_params = [{transform_indices = @transform_0, window_bounds = array<i64: 1, 16, 64>}, {pipeline_mode = #tpu.pipeline_mode<synchronous>, transform_indices = @transform_1, window_bounds = array<i64: 3, 64, 128>}, {pipeline_mode = #tpu.pipeline_mode<synchronous>, transform_indices = @transform_2, window_bounds = array<i64: 1, 128>}, {transform_indices = @transform_3, window_bounds = array<i64: 1, 16, 128>}]} {
    %c0 = arith.constant 0 : index
    %c0_0 = arith.constant 0 : index
    %c0_1 = arith.constant 0 : index
    %0 = vector.load %arg1[%c0, %c0_0, %c0_1] : memref<1x16x64xf32, #tpu.memory_space<vmem>>, vector<1x16x64xf32>
    %1 = vector.shape_cast %0 : vector<1x16x64xf32> to vector<16x64xf32>
    %cst = arith.constant 0.000000e+00 : f32
    %2 = vector.broadcast %cst : f32 to vector<1x64xf32>
    %cst_2 = arith.constant 0.000000e+00 : f32
    %3 = vector.broadcast %cst_2 : f32 to vector<1x64xf32>
    %4 = tpu.concatenate %2, %1, %3 in 0 : vector<1x64xf32>, vector<16x64xf32>, vector<1x64xf32> -> vector<18x64xf32>
    %5 = vector.extract_strided_slice %4 {offsets = [0, 0], sizes = [16, 64], strides = [1, 1]} : vector<18x64xf32> to vector<16x64xf32>
    %c0_3 = arith.constant 0 : index
    %c0_4 = arith.constant 0 : index
    %c0_5 = arith.constant 0 : index
    %6 = vector.load %arg2[%c0_3, %c0_4, %c0_5] : memref<3x64x128xf32, #tpu.memory_space<vmem>>, vector<1x64x128xf32>
    %7 = vector.shape_cast %6 : vector<1x64x128xf32> to vector<64x128xf32>
    %cst_6 = arith.constant dense<0.000000e+00> : vector<16x128xf32>
    %8 = tpu.matmul %5, %7, %cst_6 {dimension_numbers = #tpu.dot_dimension_numbers<[1], [0], [0], [1], [0, 0, 1, 1], [], []>} : vector<16x64xf32>, vector<64x128xf32>, vector<16x128xf32> -> vector<16x128xf32>
    %9 = vector.extract_strided_slice %4 {offsets = [1, 0], sizes = [16, 64], strides = [1, 1]} : vector<18x64xf32> to vector<16x64xf32>
    %c1 = arith.constant 1 : index
    %c0_7 = arith.constant 0 : index
    %c0_8 = arith.constant 0 : index
    %10 = vector.load %arg2[%c1, %c0_7, %c0_8] : memref<3x64x128xf32, #tpu.memory_space<vmem>>, vector<1x64x128xf32>
    %11 = vector.shape_cast %10 : vector<1x64x128xf32> to vector<64x128xf32>
    %cst_9 = arith.constant dense<0.000000e+00> : vector<16x128xf32>
    %12 = tpu.matmul %9, %11, %cst_9 {dimension_numbers = #tpu.dot_dimension_numbers<[1], [0], [0], [1], [0, 0, 1, 1], [], []>} : vector<16x64xf32>, vector<64x128xf32>, vector<16x128xf32> -> vector<16x128xf32>
    %13 = arith.addf %8, %12 : vector<16x128xf32>
    %14 = vector.extract_strided_slice %4 {offsets = [2, 0], sizes = [16, 64], strides = [1, 1]} : vector<18x64xf32> to vector<16x64xf32>
    %c2 = arith.constant 2 : index
    %c0_10 = arith.constant 0 : index
    %c0_11 = arith.constant 0 : index
    %15 = vector.load %arg2[%c2, %c0_10, %c0_11] : memref<3x64x128xf32, #tpu.memory_space<vmem>>, vector<1x64x128xf32>
    %16 = vector.shape_cast %15 : vector<1x64x128xf32> to vector<64x128xf32>
    %cst_12 = arith.constant dense<0.000000e+00> : vector<16x128xf32>
    %17 = tpu.matmul %14, %16, %cst_12 {dimension_numbers = #tpu.dot_dimension_numbers<[1], [0], [0], [1], [0, 0, 1, 1], [], []>} : vector<16x64xf32>, vector<64x128xf32>, vector<16x128xf32> -> vector<16x128xf32>
    %18 = arith.addf %13, %17 : vector<16x128xf32>
    %c0_13 = arith.constant 0 : index
    %c0_14 = arith.constant 0 : index
    %19 = vector.load %arg3[%c0_13, %c0_14] : memref<1x128xf32, #tpu.memory_space<vmem>>, vector<1x128xf32>
    %20 = vector.broadcast %19 : vector<1x128xf32> to vector<16x128xf32>
    %21 = arith.addf %18, %20 : vector<16x128xf32>
    %cst_15 = arith.constant 0.000000e+00 : f32
    %22 = vector.broadcast %cst_15 : f32 to vector<16x128xf32>
    %23 = arith.maximumf %21, %22 : vector<16x128xf32>
    %c0_16 = arith.constant 0 : index
    %c0_17 = arith.constant 0 : index
    %c0_18 = arith.constant 0 : index
    %24 = vector.load %arg4[%c0_16, %c0_17, %c0_18] : memref<1x16x128xf32, #tpu.memory_space<vmem>>, vector<1x16x128xf32>
    %25 = vector.shape_cast %24 : vector<1x16x128xf32> to vector<16x128xf32>
    %26 = vector.shape_cast %23 : vector<16x128xf32> to vector<1x16x128xf32>
    tpu.vector_store %arg4[%c0_16, %c0_17, %c0_18], %26 {strides = array<i32>} : memref<1x16x128xf32, #tpu.memory_space<vmem>>, vector<1x16x128xf32>,
    return
  }
  func.func @transform_0(%arg0: i32) -> (i32, i32, i32) {
    %c0_i32 = arith.constant 0 : i32
    %c0_i32_0 = arith.constant 0 : i32
    %c0_i32_1 = arith.constant 0 : i32
    return %arg0, %c0_i32, %c0_i32_0 : i32, i32, i32
  }
  func.func @transform_1(%arg0: i32) -> (i32, i32, i32) {
    %c0_i32 = arith.constant 0 : i32
    %c0_i32_0 = arith.constant 0 : i32
    %c0_i32_1 = arith.constant 0 : i32
    %c0_i32_2 = arith.constant 0 : i32
    return %c0_i32, %c0_i32_0, %c0_i32_1 : i32, i32, i32
  }
  func.func @transform_2(%arg0: i32) -> (i32, i32) {
    %c0_i32 = arith.constant 0 : i32
    %c0_i32_0 = arith.constant 0 : i32
    %c0_i32_1 = arith.constant 0 : i32
    return %c0_i32, %c0_i32_0 : i32, i32
  }
  func.func @transform_3(%arg0: i32) -> (i32, i32, i32) {
    %c0_i32 = arith.constant 0 : i32
    %c0_i32_0 = arith.constant 0 : i32
    %c0_i32_1 = arith.constant 0 : i32
    return %arg0, %c0_i32, %c0_i32_0 : i32, i32, i32
  }
}

module attributes {stable_mosaic.version = 11 : i64} {
  func.func @_conv_band_kernel(%arg0: i32, %arg1: memref<1x8x256xf32, #tpu.memory_space<vmem>>, %arg2: memref<3x128x128xf32, #tpu.memory_space<vmem>>, %arg3: memref<1x128xf32, #tpu.memory_space<vmem>>, %arg4: memref<1x8x128xf32, #tpu.memory_space<vmem>>) attributes {dimension_semantics = [#tpu.dimension_semantics<parallel>], iteration_bounds = array<i64: 2>, scalar_prefetch = 0 : i64, scratch_operands = 0 : i64, tpu.core_type = #tpu.core_type<tc>, window_params = [{transform_indices = @transform_0, window_bounds = array<i64: 1, 8, 256>}, {pipeline_mode = #tpu.pipeline_mode<synchronous>, transform_indices = @transform_1, window_bounds = array<i64: 3, 128, 128>}, {pipeline_mode = #tpu.pipeline_mode<synchronous>, transform_indices = @transform_2, window_bounds = array<i64: 1, 128>}, {transform_indices = @transform_3, window_bounds = array<i64: 1, 8, 128>}]} {
    %c0 = arith.constant 0 : index
    %c0_0 = arith.constant 0 : index
    %c0_1 = arith.constant 0 : index
    %0 = vector.load %arg1[%c0, %c0_0, %c0_1] : memref<1x8x256xf32, #tpu.memory_space<vmem>>, vector<1x8x256xf32>
    %1 = vector.shape_cast %0 : vector<1x8x256xf32> to vector<8x256xf32>
    %cst = arith.constant 0.000000e+00 : f32
    %2 = vector.broadcast %cst : f32 to vector<1x256xf32>
    %3 = tpu.concatenate %2, %1 in 0 : vector<1x256xf32>, vector<8x256xf32> -> vector<9x256xf32>
    %4 = vector.extract_strided_slice %3 {offsets = [0, 128], sizes = [8, 128], strides = [1, 1]} : vector<9x256xf32> to vector<8x128xf32>
    %c0_2 = arith.constant 0 : index
    %c0_3 = arith.constant 0 : index
    %c0_4 = arith.constant 0 : index
    %5 = vector.load %arg2[%c0_2, %c0_3, %c0_4] : memref<3x128x128xf32, #tpu.memory_space<vmem>>, vector<1x128x128xf32>
    %6 = vector.shape_cast %5 : vector<1x128x128xf32> to vector<128x128xf32>
    %cst_5 = arith.constant dense<0.000000e+00> : vector<8x128xf32>
    %7 = tpu.matmul %4, %6, %cst_5 {dimension_numbers = #tpu.dot_dimension_numbers<[1], [0], [0], [1], [0, 0, 1, 1], [], []>} : vector<8x128xf32>, vector<128x128xf32>, vector<8x128xf32> -> vector<8x128xf32>
    %8 = vector.extract_strided_slice %3 {offsets = [1, 0], sizes = [8, 128], strides = [1, 1]} : vector<9x256xf32> to vector<8x128xf32>
    %c1 = arith.constant 1 : index
    %c0_6 = arith.constant 0 : index
    %c0_7 = arith.constant 0 : index
    %9 = vector.load %arg2[%c1, %c0_6, %c0_7] : memref<3x128x128xf32, #tpu.memory_space<vmem>>, vector<1x128x128xf32>
    %10 = vector.shape_cast %9 : vector<1x128x128xf32> to vector<128x128xf32>
    %cst_8 = arith.constant dense<0.000000e+00> : vector<8x128xf32>
    %11 = tpu.matmul %8, %10, %cst_8 {dimension_numbers = #tpu.dot_dimension_numbers<[1], [0], [0], [1], [0, 0, 1, 1], [], []>} : vector<8x128xf32>, vector<128x128xf32>, vector<8x128xf32> -> vector<8x128xf32>
    %12 = arith.addf %7, %11 : vector<8x128xf32>
    %13 = vector.extract_strided_slice %3 {offsets = [1, 128], sizes = [8, 128], strides = [1, 1]} : vector<9x256xf32> to vector<8x128xf32>
    %c2 = arith.constant 2 : index
    %c0_9 = arith.constant 0 : index
    %c0_10 = arith.constant 0 : index
    %14 = vector.load %arg2[%c2, %c0_9, %c0_10] : memref<3x128x128xf32, #tpu.memory_space<vmem>>, vector<1x128x128xf32>
    %15 = vector.shape_cast %14 : vector<1x128x128xf32> to vector<128x128xf32>
    %cst_11 = arith.constant dense<0.000000e+00> : vector<8x128xf32>
    %16 = tpu.matmul %13, %15, %cst_11 {dimension_numbers = #tpu.dot_dimension_numbers<[1], [0], [0], [1], [0, 0, 1, 1], [], []>} : vector<8x128xf32>, vector<128x128xf32>, vector<8x128xf32> -> vector<8x128xf32>
    %17 = arith.addf %12, %16 : vector<8x128xf32>
    %c0_12 = arith.constant 0 : index
    %c0_13 = arith.constant 0 : index
    %18 = vector.load %arg3[%c0_12, %c0_13] : memref<1x128xf32, #tpu.memory_space<vmem>>, vector<1x128xf32>
    %19 = vector.broadcast %18 : vector<1x128xf32> to vector<8x128xf32>
    %20 = arith.addf %17, %19 : vector<8x128xf32>
    %cst_14 = arith.constant 0.000000e+00 : f32
    %21 = vector.broadcast %cst_14 : f32 to vector<8x128xf32>
    %22 = arith.maximumf %20, %21 : vector<8x128xf32>
    %c0_15 = arith.constant 0 : index
    %c0_16 = arith.constant 0 : index
    %c0_17 = arith.constant 0 : index
    %23 = vector.load %arg4[%c0_15, %c0_16, %c0_17] : memref<1x8x128xf32, #tpu.memory_space<vmem>>, vector<1x8x128xf32>
    %24 = vector.shape_cast %23 : vector<1x8x128xf32> to vector<8x128xf32>
    %25 = vector.shape_cast %22 : vector<8x128xf32> to vector<1x8x128xf32>
    tpu.vector_store %arg4[%c0_15, %c0_16, %c0_17], %25 {strides = array<i32>} : memref<1x8x128xf32, #tpu.memory_space<vmem>>, vector<1x8x128xf32>,
    return
  }
  func.func @transform_0(%arg0: i32) -> (i32, i32, i32) {
    %c0_i32 = arith.constant 0 : i32
    %c0_i32_0 = arith.constant 0 : i32
    %c0_i32_1 = arith.constant 0 : i32
    return %arg0, %c0_i32, %c0_i32_0 : i32, i32, i32
  }
  func.func @transform_1(%arg0: i32) -> (i32, i32, i32) {
    %c0_i32 = arith.constant 0 : i32
    %c0_i32_0 = arith.constant 0 : i32
    %c0_i32_1 = arith.constant 0 : i32
    %c0_i32_2 = arith.constant 0 : i32
    return %c0_i32, %c0_i32_0, %c0_i32_1 : i32, i32, i32
  }
  func.func @transform_2(%arg0: i32) -> (i32, i32) {
    %c0_i32 = arith.constant 0 : i32
    %c0_i32_0 = arith.constant 0 : i32
    %c0_i32_1 = arith.constant 0 : i32
    return %c0_i32, %c0_i32_0 : i32, i32
  }
  func.func @transform_3(%arg0: i32) -> (i32, i32, i32) {
    %c0_i32 = arith.constant 0 : i32
    %c0_i32_0 = arith.constant 0 : i32
    %c0_i32_1 = arith.constant 0 : i32
    return %arg0, %c0_i32, %c0_i32_0 : i32, i32, i32
  }
}

module attributes {stable_mosaic.version = 11 : i64} {
  func.func @_conv_band_kernel(%arg0: i32, %arg1: memref<1x8x128xf32, #tpu.memory_space<vmem>>, %arg2: memref<3x128x384xf32, #tpu.memory_space<vmem>>, %arg3: memref<1x384xf32, #tpu.memory_space<vmem>>, %arg4: memref<1x8x128xf32, #tpu.memory_space<vmem>>) attributes {dimension_semantics = [#tpu.dimension_semantics<parallel>], iteration_bounds = array<i64: 2>, scalar_prefetch = 0 : i64, scratch_operands = 0 : i64, tpu.core_type = #tpu.core_type<tc>, window_params = [{transform_indices = @transform_0, window_bounds = array<i64: 1, 8, 128>}, {pipeline_mode = #tpu.pipeline_mode<synchronous>, transform_indices = @transform_1, window_bounds = array<i64: 3, 128, 384>}, {pipeline_mode = #tpu.pipeline_mode<synchronous>, transform_indices = @transform_2, window_bounds = array<i64: 1, 384>}, {transform_indices = @transform_3, window_bounds = array<i64: 1, 8, 128>}]} {
    %c0 = arith.constant 0 : index
    %c0_0 = arith.constant 0 : index
    %c0_1 = arith.constant 0 : index
    %0 = vector.load %arg1[%c0, %c0_0, %c0_1] : memref<1x8x128xf32, #tpu.memory_space<vmem>>, vector<1x8x128xf32>
    %1 = vector.shape_cast %0 : vector<1x8x128xf32> to vector<8x128xf32>
    %cst = arith.constant 0.000000e+00 : f32
    %2 = vector.broadcast %cst : f32 to vector<1x128xf32>
    %cst_2 = arith.constant 0.000000e+00 : f32
    %3 = vector.broadcast %cst_2 : f32 to vector<1x128xf32>
    %4 = tpu.concatenate %2, %1, %3 in 0 : vector<1x128xf32>, vector<8x128xf32>, vector<1x128xf32> -> vector<10x128xf32>
    %5 = vector.extract_strided_slice %4 {offsets = [0, 0], sizes = [8, 128], strides = [1, 1]} : vector<10x128xf32> to vector<8x128xf32>
    %c0_3 = arith.constant 0 : index
    %c0_4 = arith.constant 0 : index
    %c0_5 = arith.constant 0 : index
    %6 = vector.load %arg2[%c0_3, %c0_4, %c0_5] : memref<3x128x384xf32, #tpu.memory_space<vmem>>, vector<1x128x384xf32>
    %7 = vector.shape_cast %6 : vector<1x128x384xf32> to vector<128x384xf32>
    %cst_6 = arith.constant dense<0.000000e+00> : vector<8x384xf32>
    %8 = tpu.matmul %5, %7, %cst_6 {dimension_numbers = #tpu.dot_dimension_numbers<[1], [0], [0], [1], [0, 0, 1, 1], [], []>} : vector<8x128xf32>, vector<128x384xf32>, vector<8x384xf32> -> vector<8x384xf32>
    %9 = vector.extract_strided_slice %4 {offsets = [1, 0], sizes = [8, 128], strides = [1, 1]} : vector<10x128xf32> to vector<8x128xf32>
    %c1 = arith.constant 1 : index
    %c0_7 = arith.constant 0 : index
    %c0_8 = arith.constant 0 : index
    %10 = vector.load %arg2[%c1, %c0_7, %c0_8] : memref<3x128x384xf32, #tpu.memory_space<vmem>>, vector<1x128x384xf32>
    %11 = vector.shape_cast %10 : vector<1x128x384xf32> to vector<128x384xf32>
    %cst_9 = arith.constant dense<0.000000e+00> : vector<8x384xf32>
    %12 = tpu.matmul %9, %11, %cst_9 {dimension_numbers = #tpu.dot_dimension_numbers<[1], [0], [0], [1], [0, 0, 1, 1], [], []>} : vector<8x128xf32>, vector<128x384xf32>, vector<8x384xf32> -> vector<8x384xf32>
    %13 = arith.addf %8, %12 : vector<8x384xf32>
    %14 = vector.extract_strided_slice %4 {offsets = [2, 0], sizes = [8, 128], strides = [1, 1]} : vector<10x128xf32> to vector<8x128xf32>
    %c2 = arith.constant 2 : index
    %c0_10 = arith.constant 0 : index
    %c0_11 = arith.constant 0 : index
    %15 = vector.load %arg2[%c2, %c0_10, %c0_11] : memref<3x128x384xf32, #tpu.memory_space<vmem>>, vector<1x128x384xf32>
    %16 = vector.shape_cast %15 : vector<1x128x384xf32> to vector<128x384xf32>
    %cst_12 = arith.constant dense<0.000000e+00> : vector<8x384xf32>
    %17 = tpu.matmul %14, %16, %cst_12 {dimension_numbers = #tpu.dot_dimension_numbers<[1], [0], [0], [1], [0, 0, 1, 1], [], []>} : vector<8x128xf32>, vector<128x384xf32>, vector<8x384xf32> -> vector<8x384xf32>
    %18 = arith.addf %13, %17 : vector<8x384xf32>
    %c0_13 = arith.constant 0 : index
    %c0_14 = arith.constant 0 : index
    %19 = vector.load %arg3[%c0_13, %c0_14] : memref<1x384xf32, #tpu.memory_space<vmem>>, vector<1x384xf32>
    %20 = vector.broadcast %19 : vector<1x384xf32> to vector<8x384xf32>
    %21 = arith.addf %18, %20 : vector<8x384xf32>
    %22 = vector.extract_strided_slice %21 {offsets = [0, 0], sizes = [8, 128], strides = [1, 1]} : vector<8x384xf32> to vector<8x128xf32>
    %23 = arith.negf %22 : vector<8x128xf32>
    %24 = math.exp %23 : vector<8x128xf32>
    %cst_15 = arith.constant 1.000000e+00 : f32
    %25 = vector.broadcast %cst_15 : f32 to vector<8x128xf32>
    %26 = arith.addf %25, %24 : vector<8x128xf32>
    %27 = arith.divf %25, %26 : vector<8x128xf32>
    %28 = vector.extract_strided_slice %21 {offsets = [0, 128], sizes = [8, 128], strides = [1, 1]} : vector<8x384xf32> to vector<8x128xf32>
    %29 = arith.negf %28 : vector<8x128xf32>
    %30 = math.exp %29 : vector<8x128xf32>
    %cst_16 = arith.constant 1.000000e+00 : f32
    %31 = vector.broadcast %cst_16 : f32 to vector<8x128xf32>
    %32 = arith.addf %31, %30 : vector<8x128xf32>
    %33 = arith.divf %31, %32 : vector<8x128xf32>
    %34 = vector.extract_strided_slice %21 {offsets = [0, 256], sizes = [8, 128], strides = [1, 1]} : vector<8x384xf32> to vector<8x128xf32>
    %35 = math.tanh %34 : vector<8x128xf32>
    %36 = arith.mulf %27, %35 : vector<8x128xf32>
    %37 = math.tanh %36 : vector<8x128xf32>
    %38 = arith.mulf %33, %37 : vector<8x128xf32>
    %c0_17 = arith.constant 0 : index
    %c0_18 = arith.constant 0 : index
    %c0_19 = arith.constant 0 : index
    %39 = vector.load %arg4[%c0_17, %c0_18, %c0_19] : memref<1x8x128xf32, #tpu.memory_space<vmem>>, vector<1x8x128xf32>
    %40 = vector.shape_cast %39 : vector<1x8x128xf32> to vector<8x128xf32>
    %41 = vector.shape_cast %38 : vector<8x128xf32> to vector<1x8x128xf32>
    tpu.vector_store %arg4[%c0_17, %c0_18, %c0_19], %41 {strides = array<i32>} : memref<1x8x128xf32, #tpu.memory_space<vmem>>, vector<1x8x128xf32>,
    return
  }
  func.func @transform_0(%arg0: i32) -> (i32, i32, i32) {
    %c0_i32 = arith.constant 0 : i32
    %c0_i32_0 = arith.constant 0 : i32
    %c0_i32_1 = arith.constant 0 : i32
    return %arg0, %c0_i32, %c0_i32_0 : i32, i32, i32
  }
  func.func @transform_1(%arg0: i32) -> (i32, i32, i32) {
    %c0_i32 = arith.constant 0 : i32
    %c0_i32_0 = arith.constant 0 : i32
    %c0_i32_1 = arith.constant 0 : i32
    %c0_i32_2 = arith.constant 0 : i32
    return %c0_i32, %c0_i32_0, %c0_i32_1 : i32, i32, i32
  }
  func.func @transform_2(%arg0: i32) -> (i32, i32) {
    %c0_i32 = arith.constant 0 : i32
    %c0_i32_0 = arith.constant 0 : i32
    %c0_i32_1 = arith.constant 0 : i32
    return %c0_i32, %c0_i32_0 : i32, i32
  }
  func.func @transform_3(%arg0: i32) -> (i32, i32, i32) {
    %c0_i32 = arith.constant 0 : i32
    %c0_i32_0 = arith.constant 0 : i32
    %c0_i32_1 = arith.constant 0 : i32
    return %arg0, %c0_i32, %c0_i32_0 : i32, i32, i32
  }
}

module attributes {stable_mosaic.version = 11 : i64} {
  func.func @_conv_band_kernel(%arg0: i32, %arg1: memref<1x4x256xf32, #tpu.memory_space<vmem>>, %arg2: memref<3x128x128xf32, #tpu.memory_space<vmem>>, %arg3: memref<1x128xf32, #tpu.memory_space<vmem>>, %arg4: memref<1x4x128xf32, #tpu.memory_space<vmem>>) attributes {dimension_semantics = [#tpu.dimension_semantics<parallel>], iteration_bounds = array<i64: 2>, scalar_prefetch = 0 : i64, scratch_operands = 0 : i64, tpu.core_type = #tpu.core_type<tc>, window_params = [{transform_indices = @transform_0, window_bounds = array<i64: 1, 4, 256>}, {pipeline_mode = #tpu.pipeline_mode<synchronous>, transform_indices = @transform_1, window_bounds = array<i64: 3, 128, 128>}, {pipeline_mode = #tpu.pipeline_mode<synchronous>, transform_indices = @transform_2, window_bounds = array<i64: 1, 128>}, {transform_indices = @transform_3, window_bounds = array<i64: 1, 4, 128>}]} {
    %c0 = arith.constant 0 : index
    %c0_0 = arith.constant 0 : index
    %c0_1 = arith.constant 0 : index
    %0 = vector.load %arg1[%c0, %c0_0, %c0_1] : memref<1x4x256xf32, #tpu.memory_space<vmem>>, vector<1x4x256xf32>
    %1 = vector.shape_cast %0 : vector<1x4x256xf32> to vector<4x256xf32>
    %cst = arith.constant 0.000000e+00 : f32
    %2 = vector.broadcast %cst : f32 to vector<1x256xf32>
    %3 = tpu.concatenate %2, %1 in 0 : vector<1x256xf32>, vector<4x256xf32> -> vector<5x256xf32>
    %4 = vector.extract_strided_slice %3 {offsets = [0, 128], sizes = [4, 128], strides = [1, 1]} : vector<5x256xf32> to vector<4x128xf32>
    %c0_2 = arith.constant 0 : index
    %c0_3 = arith.constant 0 : index
    %c0_4 = arith.constant 0 : index
    %5 = vector.load %arg2[%c0_2, %c0_3, %c0_4] : memref<3x128x128xf32, #tpu.memory_space<vmem>>, vector<1x128x128xf32>
    %6 = vector.shape_cast %5 : vector<1x128x128xf32> to vector<128x128xf32>
    %cst_5 = arith.constant dense<0.000000e+00> : vector<4x128xf32>
    %7 = tpu.matmul %4, %6, %cst_5 {dimension_numbers = #tpu.dot_dimension_numbers<[1], [0], [0], [1], [0, 0, 1, 1], [], []>} : vector<4x128xf32>, vector<128x128xf32>, vector<4x128xf32> -> vector<4x128xf32>
    %8 = vector.extract_strided_slice %3 {offsets = [1, 0], sizes = [4, 128], strides = [1, 1]} : vector<5x256xf32> to vector<4x128xf32>
    %c1 = arith.constant 1 : index
    %c0_6 = arith.constant 0 : index
    %c0_7 = arith.constant 0 : index
    %9 = vector.load %arg2[%c1, %c0_6, %c0_7] : memref<3x128x128xf32, #tpu.memory_space<vmem>>, vector<1x128x128xf32>
    %10 = vector.shape_cast %9 : vector<1x128x128xf32> to vector<128x128xf32>
    %cst_8 = arith.constant dense<0.000000e+00> : vector<4x128xf32>
    %11 = tpu.matmul %8, %10, %cst_8 {dimension_numbers = #tpu.dot_dimension_numbers<[1], [0], [0], [1], [0, 0, 1, 1], [], []>} : vector<4x128xf32>, vector<128x128xf32>, vector<4x128xf32> -> vector<4x128xf32>
    %12 = arith.addf %7, %11 : vector<4x128xf32>
    %13 = vector.extract_strided_slice %3 {offsets = [1, 128], sizes = [4, 128], strides = [1, 1]} : vector<5x256xf32> to vector<4x128xf32>
    %c2 = arith.constant 2 : index
    %c0_9 = arith.constant 0 : index
    %c0_10 = arith.constant 0 : index
    %14 = vector.load %arg2[%c2, %c0_9, %c0_10] : memref<3x128x128xf32, #tpu.memory_space<vmem>>, vector<1x128x128xf32>
    %15 = vector.shape_cast %14 : vector<1x128x128xf32> to vector<128x128xf32>
    %cst_11 = arith.constant dense<0.000000e+00> : vector<4x128xf32>
    %16 = tpu.matmul %13, %15, %cst_11 {dimension_numbers = #tpu.dot_dimension_numbers<[1], [0], [0], [1], [0, 0, 1, 1], [], []>} : vector<4x128xf32>, vector<128x128xf32>, vector<4x128xf32> -> vector<4x128xf32>
    %17 = arith.addf %12, %16 : vector<4x128xf32>
    %c0_12 = arith.constant 0 : index
    %c0_13 = arith.constant 0 : index
    %18 = vector.load %arg3[%c0_12, %c0_13] : memref<1x128xf32, #tpu.memory_space<vmem>>, vector<1x128xf32>
    %19 = vector.broadcast %18 : vector<1x128xf32> to vector<4x128xf32>
    %20 = arith.addf %17, %19 : vector<4x128xf32>
    %cst_14 = arith.constant 0.000000e+00 : f32
    %21 = vector.broadcast %cst_14 : f32 to vector<4x128xf32>
    %22 = arith.maximumf %20, %21 : vector<4x128xf32>
    %c0_15 = arith.constant 0 : index
    %c0_16 = arith.constant 0 : index
    %c0_17 = arith.constant 0 : index
    %23 = vector.load %arg4[%c0_15, %c0_16, %c0_17] : memref<1x4x128xf32, #tpu.memory_space<vmem>>, vector<1x4x128xf32>
    %24 = vector.shape_cast %23 : vector<1x4x128xf32> to vector<4x128xf32>
    %25 = vector.shape_cast %22 : vector<4x128xf32> to vector<1x4x128xf32>
    tpu.vector_store %arg4[%c0_15, %c0_16, %c0_17], %25 {strides = array<i32>} : memref<1x4x128xf32, #tpu.memory_space<vmem>>, vector<1x4x128xf32>,
    return
  }
  func.func @transform_0(%arg0: i32) -> (i32, i32, i32) {
    %c0_i32 = arith.constant 0 : i32
    %c0_i32_0 = arith.constant 0 : i32
    %c0_i32_1 = arith.constant 0 : i32
    return %arg0, %c0_i32, %c0_i32_0 : i32, i32, i32
  }
  func.func @transform_1(%arg0: i32) -> (i32, i32, i32) {
    %c0_i32 = arith.constant 0 : i32
    %c0_i32_0 = arith.constant 0 : i32
    %c0_i32_1 = arith.constant 0 : i32
    %c0_i32_2 = arith.constant 0 : i32
    return %c0_i32, %c0_i32_0, %c0_i32_1 : i32, i32, i32
  }
  func.func @transform_2(%arg0: i32) -> (i32, i32) {
    %c0_i32 = arith.constant 0 : i32
    %c0_i32_0 = arith.constant 0 : i32
    %c0_i32_1 = arith.constant 0 : i32
    return %c0_i32, %c0_i32_0 : i32, i32
  }
  func.func @transform_3(%arg0: i32) -> (i32, i32, i32) {
    %c0_i32 = arith.constant 0 : i32
    %c0_i32_0 = arith.constant 0 : i32
    %c0_i32_1 = arith.constant 0 : i32
    return %arg0, %c0_i32, %c0_i32_0 : i32, i32, i32
  }
}

module attributes {stable_mosaic.version = 11 : i64} {
  func.func @_conv_band_kernel(%arg0: i32, %arg1: memref<1x4x128xf32, #tpu.memory_space<vmem>>, %arg2: memref<3x128x384xf32, #tpu.memory_space<vmem>>, %arg3: memref<1x384xf32, #tpu.memory_space<vmem>>, %arg4: memref<1x4x128xf32, #tpu.memory_space<vmem>>) attributes {dimension_semantics = [#tpu.dimension_semantics<parallel>], iteration_bounds = array<i64: 2>, scalar_prefetch = 0 : i64, scratch_operands = 0 : i64, tpu.core_type = #tpu.core_type<tc>, window_params = [{transform_indices = @transform_0, window_bounds = array<i64: 1, 4, 128>}, {pipeline_mode = #tpu.pipeline_mode<synchronous>, transform_indices = @transform_1, window_bounds = array<i64: 3, 128, 384>}, {pipeline_mode = #tpu.pipeline_mode<synchronous>, transform_indices = @transform_2, window_bounds = array<i64: 1, 384>}, {transform_indices = @transform_3, window_bounds = array<i64: 1, 4, 128>}]} {
    %c0 = arith.constant 0 : index
    %c0_0 = arith.constant 0 : index
    %c0_1 = arith.constant 0 : index
    %0 = vector.load %arg1[%c0, %c0_0, %c0_1] : memref<1x4x128xf32, #tpu.memory_space<vmem>>, vector<1x4x128xf32>
    %1 = vector.shape_cast %0 : vector<1x4x128xf32> to vector<4x128xf32>
    %cst = arith.constant 0.000000e+00 : f32
    %2 = vector.broadcast %cst : f32 to vector<1x128xf32>
    %cst_2 = arith.constant 0.000000e+00 : f32
    %3 = vector.broadcast %cst_2 : f32 to vector<1x128xf32>
    %4 = tpu.concatenate %2, %1, %3 in 0 : vector<1x128xf32>, vector<4x128xf32>, vector<1x128xf32> -> vector<6x128xf32>
    %5 = vector.extract_strided_slice %4 {offsets = [0, 0], sizes = [4, 128], strides = [1, 1]} : vector<6x128xf32> to vector<4x128xf32>
    %c0_3 = arith.constant 0 : index
    %c0_4 = arith.constant 0 : index
    %c0_5 = arith.constant 0 : index
    %6 = vector.load %arg2[%c0_3, %c0_4, %c0_5] : memref<3x128x384xf32, #tpu.memory_space<vmem>>, vector<1x128x384xf32>
    %7 = vector.shape_cast %6 : vector<1x128x384xf32> to vector<128x384xf32>
    %cst_6 = arith.constant dense<0.000000e+00> : vector<4x384xf32>
    %8 = tpu.matmul %5, %7, %cst_6 {dimension_numbers = #tpu.dot_dimension_numbers<[1], [0], [0], [1], [0, 0, 1, 1], [], []>} : vector<4x128xf32>, vector<128x384xf32>, vector<4x384xf32> -> vector<4x384xf32>
    %9 = vector.extract_strided_slice %4 {offsets = [1, 0], sizes = [4, 128], strides = [1, 1]} : vector<6x128xf32> to vector<4x128xf32>
    %c1 = arith.constant 1 : index
    %c0_7 = arith.constant 0 : index
    %c0_8 = arith.constant 0 : index
    %10 = vector.load %arg2[%c1, %c0_7, %c0_8] : memref<3x128x384xf32, #tpu.memory_space<vmem>>, vector<1x128x384xf32>
    %11 = vector.shape_cast %10 : vector<1x128x384xf32> to vector<128x384xf32>
    %cst_9 = arith.constant dense<0.000000e+00> : vector<4x384xf32>
    %12 = tpu.matmul %9, %11, %cst_9 {dimension_numbers = #tpu.dot_dimension_numbers<[1], [0], [0], [1], [0, 0, 1, 1], [], []>} : vector<4x128xf32>, vector<128x384xf32>, vector<4x384xf32> -> vector<4x384xf32>
    %13 = arith.addf %8, %12 : vector<4x384xf32>
    %14 = vector.extract_strided_slice %4 {offsets = [2, 0], sizes = [4, 128], strides = [1, 1]} : vector<6x128xf32> to vector<4x128xf32>
    %c2 = arith.constant 2 : index
    %c0_10 = arith.constant 0 : index
    %c0_11 = arith.constant 0 : index
    %15 = vector.load %arg2[%c2, %c0_10, %c0_11] : memref<3x128x384xf32, #tpu.memory_space<vmem>>, vector<1x128x384xf32>
    %16 = vector.shape_cast %15 : vector<1x128x384xf32> to vector<128x384xf32>
    %cst_12 = arith.constant dense<0.000000e+00> : vector<4x384xf32>
    %17 = tpu.matmul %14, %16, %cst_12 {dimension_numbers = #tpu.dot_dimension_numbers<[1], [0], [0], [1], [0, 0, 1, 1], [], []>} : vector<4x128xf32>, vector<128x384xf32>, vector<4x384xf32> -> vector<4x384xf32>
    %18 = arith.addf %13, %17 : vector<4x384xf32>
    %c0_13 = arith.constant 0 : index
    %c0_14 = arith.constant 0 : index
    %19 = vector.load %arg3[%c0_13, %c0_14] : memref<1x384xf32, #tpu.memory_space<vmem>>, vector<1x384xf32>
    %20 = vector.broadcast %19 : vector<1x384xf32> to vector<4x384xf32>
    %21 = arith.addf %18, %20 : vector<4x384xf32>
    %22 = vector.extract_strided_slice %21 {offsets = [0, 0], sizes = [4, 128], strides = [1, 1]} : vector<4x384xf32> to vector<4x128xf32>
    %23 = arith.negf %22 : vector<4x128xf32>
    %24 = math.exp %23 : vector<4x128xf32>
    %cst_15 = arith.constant 1.000000e+00 : f32
    %25 = vector.broadcast %cst_15 : f32 to vector<4x128xf32>
    %26 = arith.addf %25, %24 : vector<4x128xf32>
    %27 = arith.divf %25, %26 : vector<4x128xf32>
    %28 = vector.extract_strided_slice %21 {offsets = [0, 128], sizes = [4, 128], strides = [1, 1]} : vector<4x384xf32> to vector<4x128xf32>
    %29 = arith.negf %28 : vector<4x128xf32>
    %30 = math.exp %29 : vector<4x128xf32>
    %cst_16 = arith.constant 1.000000e+00 : f32
    %31 = vector.broadcast %cst_16 : f32 to vector<4x128xf32>
    %32 = arith.addf %31, %30 : vector<4x128xf32>
    %33 = arith.divf %31, %32 : vector<4x128xf32>
    %34 = vector.extract_strided_slice %21 {offsets = [0, 256], sizes = [4, 128], strides = [1, 1]} : vector<4x384xf32> to vector<4x128xf32>
    %35 = math.tanh %34 : vector<4x128xf32>
    %36 = arith.mulf %27, %35 : vector<4x128xf32>
    %37 = math.tanh %36 : vector<4x128xf32>
    %38 = arith.mulf %33, %37 : vector<4x128xf32>
    %c0_17 = arith.constant 0 : index
    %c0_18 = arith.constant 0 : index
    %c0_19 = arith.constant 0 : index
    %39 = vector.load %arg4[%c0_17, %c0_18, %c0_19] : memref<1x4x128xf32, #tpu.memory_space<vmem>>, vector<1x4x128xf32>
    %40 = vector.shape_cast %39 : vector<1x4x128xf32> to vector<4x128xf32>
    %41 = vector.shape_cast %38 : vector<4x128xf32> to vector<1x4x128xf32>
    tpu.vector_store %arg4[%c0_17, %c0_18, %c0_19], %41 {strides = array<i32>} : memref<1x4x128xf32, #tpu.memory_space<vmem>>, vector<1x4x128xf32>,
    return
  }
  func.func @transform_0(%arg0: i32) -> (i32, i32, i32) {
    %c0_i32 = arith.constant 0 : i32
    %c0_i32_0 = arith.constant 0 : i32
    %c0_i32_1 = arith.constant 0 : i32
    return %arg0, %c0_i32, %c0_i32_0 : i32, i32, i32
  }
  func.func @transform_1(%arg0: i32) -> (i32, i32, i32) {
    %c0_i32 = arith.constant 0 : i32
    %c0_i32_0 = arith.constant 0 : i32
    %c0_i32_1 = arith.constant 0 : i32
    %c0_i32_2 = arith.constant 0 : i32
    return %c0_i32, %c0_i32_0, %c0_i32_1 : i32, i32, i32
  }
  func.func @transform_2(%arg0: i32) -> (i32, i32) {
    %c0_i32 = arith.constant 0 : i32
    %c0_i32_0 = arith.constant 0 : i32
    %c0_i32_1 = arith.constant 0 : i32
    return %c0_i32, %c0_i32_0 : i32, i32
  }
  func.func @transform_3(%arg0: i32) -> (i32, i32, i32) {
    %c0_i32 = arith.constant 0 : i32
    %c0_i32_0 = arith.constant 0 : i32
    %c0_i32_1 = arith.constant 0 : i32
    return %arg0, %c0_i32, %c0_i32_0 : i32, i32, i32
  }
}

module attributes {stable_mosaic.version = 11 : i64} {
  func.func @_conv_band_kernel(%arg0: i32, %arg1: memref<1x4x128xf32, #tpu.memory_space<vmem>>, %arg2: memref<3x128x128xf32, #tpu.memory_space<vmem>>, %arg3: memref<1x128xf32, #tpu.memory_space<vmem>>, %arg4: memref<1x4x128xf32, #tpu.memory_space<vmem>>) attributes {dimension_semantics = [#tpu.dimension_semantics<parallel>], iteration_bounds = array<i64: 2>, scalar_prefetch = 0 : i64, scratch_operands = 0 : i64, tpu.core_type = #tpu.core_type<tc>, window_params = [{transform_indices = @transform_0, window_bounds = array<i64: 1, 4, 128>}, {pipeline_mode = #tpu.pipeline_mode<synchronous>, transform_indices = @transform_1, window_bounds = array<i64: 3, 128, 128>}, {pipeline_mode = #tpu.pipeline_mode<synchronous>, transform_indices = @transform_2, window_bounds = array<i64: 1, 128>}, {transform_indices = @transform_3, window_bounds = array<i64: 1, 4, 128>}]} {
    %c0 = arith.constant 0 : index
    %c0_0 = arith.constant 0 : index
    %c0_1 = arith.constant 0 : index
    %0 = vector.load %arg1[%c0, %c0_0, %c0_1] : memref<1x4x128xf32, #tpu.memory_space<vmem>>, vector<1x4x128xf32>
    %1 = vector.shape_cast %0 : vector<1x4x128xf32> to vector<4x128xf32>
    %cst = arith.constant 0.000000e+00 : f32
    %2 = vector.broadcast %cst : f32 to vector<1x128xf32>
    %cst_2 = arith.constant 0.000000e+00 : f32
    %3 = vector.broadcast %cst_2 : f32 to vector<1x128xf32>
    %4 = tpu.concatenate %2, %1, %3 in 0 : vector<1x128xf32>, vector<4x128xf32>, vector<1x128xf32> -> vector<6x128xf32>
    %5 = vector.extract_strided_slice %4 {offsets = [0, 0], sizes = [4, 128], strides = [1, 1]} : vector<6x128xf32> to vector<4x128xf32>
    %c0_3 = arith.constant 0 : index
    %c0_4 = arith.constant 0 : index
    %c0_5 = arith.constant 0 : index
    %6 = vector.load %arg2[%c0_3, %c0_4, %c0_5] : memref<3x128x128xf32, #tpu.memory_space<vmem>>, vector<1x128x128xf32>
    %7 = vector.shape_cast %6 : vector<1x128x128xf32> to vector<128x128xf32>
    %cst_6 = arith.constant dense<0.000000e+00> : vector<4x128xf32>
    %8 = tpu.matmul %5, %7, %cst_6 {dimension_numbers = #tpu.dot_dimension_numbers<[1], [0], [0], [1], [0, 0, 1, 1], [], []>} : vector<4x128xf32>, vector<128x128xf32>, vector<4x128xf32> -> vector<4x128xf32>
    %9 = vector.extract_strided_slice %4 {offsets = [1, 0], sizes = [4, 128], strides = [1, 1]} : vector<6x128xf32> to vector<4x128xf32>
    %c1 = arith.constant 1 : index
    %c0_7 = arith.constant 0 : index
    %c0_8 = arith.constant 0 : index
    %10 = vector.load %arg2[%c1, %c0_7, %c0_8] : memref<3x128x128xf32, #tpu.memory_space<vmem>>, vector<1x128x128xf32>
    %11 = vector.shape_cast %10 : vector<1x128x128xf32> to vector<128x128xf32>
    %cst_9 = arith.constant dense<0.000000e+00> : vector<4x128xf32>
    %12 = tpu.matmul %9, %11, %cst_9 {dimension_numbers = #tpu.dot_dimension_numbers<[1], [0], [0], [1], [0, 0, 1, 1], [], []>} : vector<4x128xf32>, vector<128x128xf32>, vector<4x128xf32> -> vector<4x128xf32>
    %13 = arith.addf %8, %12 : vector<4x128xf32>
    %14 = vector.extract_strided_slice %4 {offsets = [2, 0], sizes = [4, 128], strides = [1, 1]} : vector<6x128xf32> to vector<4x128xf32>
    %c2 = arith.constant 2 : index
    %c0_10 = arith.constant 0 : index
    %c0_11 = arith.constant 0 : index
    %15 = vector.load %arg2[%c2, %c0_10, %c0_11] : memref<3x128x128xf32, #tpu.memory_space<vmem>>, vector<1x128x128xf32>
    %16 = vector.shape_cast %15 : vector<1x128x128xf32> to vector<128x128xf32>
    %cst_12 = arith.constant dense<0.000000e+00> : vector<4x128xf32>
    %17 = tpu.matmul %14, %16, %cst_12 {dimension_numbers = #tpu.dot_dimension_numbers<[1], [0], [0], [1], [0, 0, 1, 1], [], []>} : vector<4x128xf32>, vector<128x128xf32>, vector<4x128xf32> -> vector<4x128xf32>
    %18 = arith.addf %13, %17 : vector<4x128xf32>
    %c0_13 = arith.constant 0 : index
    %c0_14 = arith.constant 0 : index
    %19 = vector.load %arg3[%c0_13, %c0_14] : memref<1x128xf32, #tpu.memory_space<vmem>>, vector<1x128xf32>
    %20 = vector.broadcast %19 : vector<1x128xf32> to vector<4x128xf32>
    %21 = arith.addf %18, %20 : vector<4x128xf32>
    %cst_15 = arith.constant 0.000000e+00 : f32
    %22 = vector.broadcast %cst_15 : f32 to vector<4x128xf32>
    %23 = arith.maximumf %21, %22 : vector<4x128xf32>
    %c0_16 = arith.constant 0 : index
    %c0_17 = arith.constant 0 : index
    %c0_18 = arith.constant 0 : index
    %24 = vector.load %arg4[%c0_16, %c0_17, %c0_18] : memref<1x4x128xf32, #tpu.memory_space<vmem>>, vector<1x4x128xf32>
    %25 = vector.shape_cast %24 : vector<1x4x128xf32> to vector<4x128xf32>
    %26 = vector.shape_cast %23 : vector<4x128xf32> to vector<1x4x128xf32>
    tpu.vector_store %arg4[%c0_16, %c0_17, %c0_18], %26 {strides = array<i32>} : memref<1x4x128xf32, #tpu.memory_space<vmem>>, vector<1x4x128xf32>,
    return
  }
  func.func @transform_0(%arg0: i32) -> (i32, i32, i32) {
    %c0_i32 = arith.constant 0 : i32
    %c0_i32_0 = arith.constant 0 : i32
    %c0_i32_1 = arith.constant 0 : i32
    return %arg0, %c0_i32, %c0_i32_0 : i32, i32, i32
  }
  func.func @transform_1(%arg0: i32) -> (i32, i32, i32) {
    %c0_i32 = arith.constant 0 : i32
    %c0_i32_0 = arith.constant 0 : i32
    %c0_i32_1 = arith.constant 0 : i32
    %c0_i32_2 = arith.constant 0 : i32
    return %c0_i32, %c0_i32_0, %c0_i32_1 : i32, i32, i32
  }
  func.func @transform_2(%arg0: i32) -> (i32, i32) {
    %c0_i32 = arith.constant 0 : i32
    %c0_i32_0 = arith.constant 0 : i32
    %c0_i32_1 = arith.constant 0 : i32
    return %c0_i32, %c0_i32_0 : i32, i32
  }
  func.func @transform_3(%arg0: i32) -> (i32, i32, i32) {
    %c0_i32 = arith.constant 0 : i32
    %c0_i32_0 = arith.constant 0 : i32
    %c0_i32_1 = arith.constant 0 : i32
    return %arg0, %c0_i32, %c0_i32_0 : i32, i32, i32
  }
}

module attributes {stable_mosaic.version = 11 : i64} {
  func.func @_conv_band_kernel(%arg0: i32, %arg1: memref<1x4x128xf32, #tpu.memory_space<vmem>>, %arg2: memref<3x128x128xf32, #tpu.memory_space<vmem>>, %arg3: memref<1x128xf32, #tpu.memory_space<vmem>>, %arg4: memref<1x4x128xf32, #tpu.memory_space<vmem>>, %arg5: memref<1x4x128xf32, #tpu.memory_space<vmem>>) attributes {dimension_semantics = [#tpu.dimension_semantics<parallel>], iteration_bounds = array<i64: 2>, scalar_prefetch = 0 : i64, scratch_operands = 0 : i64, tpu.core_type = #tpu.core_type<tc>, window_params = [{transform_indices = @transform_0, window_bounds = array<i64: 1, 4, 128>}, {pipeline_mode = #tpu.pipeline_mode<synchronous>, transform_indices = @transform_1, window_bounds = array<i64: 3, 128, 128>}, {pipeline_mode = #tpu.pipeline_mode<synchronous>, transform_indices = @transform_2, window_bounds = array<i64: 1, 128>}, {transform_indices = @transform_3, window_bounds = array<i64: 1, 4, 128>}, {transform_indices = @transform_4, window_bounds = array<i64: 1, 4, 128>}]} {
    %c0 = arith.constant 0 : index
    %c0_0 = arith.constant 0 : index
    %c0_1 = arith.constant 0 : index
    %0 = vector.load %arg1[%c0, %c0_0, %c0_1] : memref<1x4x128xf32, #tpu.memory_space<vmem>>, vector<1x4x128xf32>
    %1 = vector.shape_cast %0 : vector<1x4x128xf32> to vector<4x128xf32>
    %cst = arith.constant 0.000000e+00 : f32
    %2 = vector.broadcast %cst : f32 to vector<1x128xf32>
    %cst_2 = arith.constant 0.000000e+00 : f32
    %3 = vector.broadcast %cst_2 : f32 to vector<1x128xf32>
    %4 = tpu.concatenate %2, %1, %3 in 0 : vector<1x128xf32>, vector<4x128xf32>, vector<1x128xf32> -> vector<6x128xf32>
    %5 = vector.extract_strided_slice %4 {offsets = [0, 0], sizes = [4, 128], strides = [1, 1]} : vector<6x128xf32> to vector<4x128xf32>
    %c0_3 = arith.constant 0 : index
    %c0_4 = arith.constant 0 : index
    %c0_5 = arith.constant 0 : index
    %6 = vector.load %arg2[%c0_3, %c0_4, %c0_5] : memref<3x128x128xf32, #tpu.memory_space<vmem>>, vector<1x128x128xf32>
    %7 = vector.shape_cast %6 : vector<1x128x128xf32> to vector<128x128xf32>
    %cst_6 = arith.constant dense<0.000000e+00> : vector<4x128xf32>
    %8 = tpu.matmul %5, %7, %cst_6 {dimension_numbers = #tpu.dot_dimension_numbers<[1], [0], [0], [1], [0, 0, 1, 1], [], []>} : vector<4x128xf32>, vector<128x128xf32>, vector<4x128xf32> -> vector<4x128xf32>
    %9 = vector.extract_strided_slice %4 {offsets = [1, 0], sizes = [4, 128], strides = [1, 1]} : vector<6x128xf32> to vector<4x128xf32>
    %c1 = arith.constant 1 : index
    %c0_7 = arith.constant 0 : index
    %c0_8 = arith.constant 0 : index
    %10 = vector.load %arg2[%c1, %c0_7, %c0_8] : memref<3x128x128xf32, #tpu.memory_space<vmem>>, vector<1x128x128xf32>
    %11 = vector.shape_cast %10 : vector<1x128x128xf32> to vector<128x128xf32>
    %cst_9 = arith.constant dense<0.000000e+00> : vector<4x128xf32>
    %12 = tpu.matmul %9, %11, %cst_9 {dimension_numbers = #tpu.dot_dimension_numbers<[1], [0], [0], [1], [0, 0, 1, 1], [], []>} : vector<4x128xf32>, vector<128x128xf32>, vector<4x128xf32> -> vector<4x128xf32>
    %13 = arith.addf %8, %12 : vector<4x128xf32>
    %14 = vector.extract_strided_slice %4 {offsets = [2, 0], sizes = [4, 128], strides = [1, 1]} : vector<6x128xf32> to vector<4x128xf32>
    %c2 = arith.constant 2 : index
    %c0_10 = arith.constant 0 : index
    %c0_11 = arith.constant 0 : index
    %15 = vector.load %arg2[%c2, %c0_10, %c0_11] : memref<3x128x128xf32, #tpu.memory_space<vmem>>, vector<1x128x128xf32>
    %16 = vector.shape_cast %15 : vector<1x128x128xf32> to vector<128x128xf32>
    %cst_12 = arith.constant dense<0.000000e+00> : vector<4x128xf32>
    %17 = tpu.matmul %14, %16, %cst_12 {dimension_numbers = #tpu.dot_dimension_numbers<[1], [0], [0], [1], [0, 0, 1, 1], [], []>} : vector<4x128xf32>, vector<128x128xf32>, vector<4x128xf32> -> vector<4x128xf32>
    %18 = arith.addf %13, %17 : vector<4x128xf32>
    %c0_13 = arith.constant 0 : index
    %c0_14 = arith.constant 0 : index
    %19 = vector.load %arg3[%c0_13, %c0_14] : memref<1x128xf32, #tpu.memory_space<vmem>>, vector<1x128xf32>
    %20 = vector.broadcast %19 : vector<1x128xf32> to vector<4x128xf32>
    %21 = arith.addf %18, %20 : vector<4x128xf32>
    %c0_15 = arith.constant 0 : index
    %c0_16 = arith.constant 0 : index
    %c0_17 = arith.constant 0 : index
    %22 = vector.load %arg4[%c0_15, %c0_16, %c0_17] : memref<1x4x128xf32, #tpu.memory_space<vmem>>, vector<1x4x128xf32>
    %23 = vector.shape_cast %22 : vector<1x4x128xf32> to vector<4x128xf32>
    %24 = arith.addf %21, %23 : vector<4x128xf32>
    %cst_18 = arith.constant 0.000000e+00 : f32
    %25 = vector.broadcast %cst_18 : f32 to vector<4x128xf32>
    %26 = arith.maximumf %24, %25 : vector<4x128xf32>
    %c0_19 = arith.constant 0 : index
    %c0_20 = arith.constant 0 : index
    %c0_21 = arith.constant 0 : index
    %27 = vector.load %arg5[%c0_19, %c0_20, %c0_21] : memref<1x4x128xf32, #tpu.memory_space<vmem>>, vector<1x4x128xf32>
    %28 = vector.shape_cast %27 : vector<1x4x128xf32> to vector<4x128xf32>
    %29 = vector.shape_cast %26 : vector<4x128xf32> to vector<1x4x128xf32>
    tpu.vector_store %arg5[%c0_19, %c0_20, %c0_21], %29 {strides = array<i32>} : memref<1x4x128xf32, #tpu.memory_space<vmem>>, vector<1x4x128xf32>,
    return
  }
  func.func @transform_0(%arg0: i32) -> (i32, i32, i32) {
    %c0_i32 = arith.constant 0 : i32
    %c0_i32_0 = arith.constant 0 : i32
    %c0_i32_1 = arith.constant 0 : i32
    return %arg0, %c0_i32, %c0_i32_0 : i32, i32, i32
  }
  func.func @transform_1(%arg0: i32) -> (i32, i32, i32) {
    %c0_i32 = arith.constant 0 : i32
    %c0_i32_0 = arith.constant 0 : i32
    %c0_i32_1 = arith.constant 0 : i32
    %c0_i32_2 = arith.constant 0 : i32
    return %c0_i32, %c0_i32_0, %c0_i32_1 : i32, i32, i32
  }
  func.func @transform_2(%arg0: i32) -> (i32, i32) {
    %c0_i32 = arith.constant 0 : i32
    %c0_i32_0 = arith.constant 0 : i32
    %c0_i32_1 = arith.constant 0 : i32
    return %c0_i32, %c0_i32_0 : i32, i32
  }
  func.func @transform_3(%arg0: i32) -> (i32, i32, i32) {
    %c0_i32 = arith.constant 0 : i32
    %c0_i32_0 = arith.constant 0 : i32
    %c0_i32_1 = arith.constant 0 : i32
    return %arg0, %c0_i32, %c0_i32_0 : i32, i32, i32
  }
  func.func @transform_4(%arg0: i32) -> (i32, i32, i32) {
    %c0_i32 = arith.constant 0 : i32
    %c0_i32_0 = arith.constant 0 : i32
    %c0_i32_1 = arith.constant 0 : i32
    return %arg0, %c0_i32, %c0_i32_0 : i32, i32, i32
  }
}

module attributes {stable_mosaic.version = 11 : i64} {
  func.func @_conv_band_kernel(%arg0: i32, %arg1: memref<1x4x128xf32, #tpu.memory_space<vmem>>, %arg2: memref<1x4x128xf32, #tpu.memory_space<vmem>>, %arg3: memref<10x4xf32, #tpu.memory_space<vmem>>, %arg4: memref<3x128x128xf32, #tpu.memory_space<vmem>>, %arg5: memref<1x128xf32, #tpu.memory_space<vmem>>, %arg6: memref<1x8x128xf32, #tpu.memory_space<vmem>>) attributes {dimension_semantics = [#tpu.dimension_semantics<parallel>], iteration_bounds = array<i64: 2>, scalar_prefetch = 0 : i64, scratch_operands = 0 : i64, tpu.core_type = #tpu.core_type<tc>, window_params = [{transform_indices = @transform_0, window_bounds = array<i64: 1, 4, 128>}, {transform_indices = @transform_1, window_bounds = array<i64: 1, 4, 128>}, {pipeline_mode = #tpu.pipeline_mode<synchronous>, transform_indices = @transform_2, window_bounds = array<i64: 10, 4>}, {pipeline_mode = #tpu.pipeline_mode<synchronous>, transform_indices = @transform_3, window_bounds = array<i64: 3, 128, 128>}, {pipeline_mode = #tpu.pipeline_mode<synchronous>, transform_indices = @transform_4, window_bounds = array<i64: 1, 128>}, {transform_indices = @transform_5, window_bounds = array<i64: 1, 8, 128>}]} {
    %c0 = arith.constant 0 : index
    %c0_0 = arith.constant 0 : index
    %c0_1 = arith.constant 0 : index
    %0 = vector.load %arg1[%c0, %c0_0, %c0_1] : memref<1x4x128xf32, #tpu.memory_space<vmem>>, vector<1x4x128xf32>
    %1 = vector.shape_cast %0 : vector<1x4x128xf32> to vector<4x128xf32>
    %c0_2 = arith.constant 0 : index
    %c0_3 = arith.constant 0 : index
    %c0_4 = arith.constant 0 : index
    %2 = vector.load %arg2[%c0_2, %c0_3, %c0_4] : memref<1x4x128xf32, #tpu.memory_space<vmem>>, vector<1x4x128xf32>
    %3 = vector.shape_cast %2 : vector<1x4x128xf32> to vector<4x128xf32>
    %4 = arith.addf %1, %3 : vector<4x128xf32>
    %c0_5 = arith.constant 0 : index
    %c0_6 = arith.constant 0 : index
    %5 = vector.load %arg3[%c0_5, %c0_6] : memref<10x4xf32, #tpu.memory_space<vmem>>, vector<10x4xf32>
    %cst = arith.constant dense<0.000000e+00> : vector<10x128xf32>
    %6 = tpu.matmul %5, %4, %cst {dimension_numbers = #tpu.dot_dimension_numbers<[1], [0], [0], [1], [0, 0, 1, 1], [], []>} : vector<10x4xf32>, vector<4x128xf32>, vector<10x128xf32> -> vector<10x128xf32>
    %7 = vector.extract_strided_slice %6 {offsets = [0, 0], sizes = [8, 128], strides = [1, 1]} : vector<10x128xf32> to vector<8x128xf32>
    %c0_7 = arith.constant 0 : index
    %c0_8 = arith.constant 0 : index
    %c0_9 = arith.constant 0 : index
    %8 = vector.load %arg4[%c0_7, %c0_8, %c0_9] : memref<3x128x128xf32, #tpu.memory_space<vmem>>, vector<1x128x128xf32>
    %9 = vector.shape_cast %8 : vector<1x128x128xf32> to vector<128x128xf32>
    %cst_10 = arith.constant dense<0.000000e+00> : vector<8x128xf32>
    %10 = tpu.matmul %7, %9, %cst_10 {dimension_numbers = #tpu.dot_dimension_numbers<[1], [0], [0], [1], [0, 0, 1, 1], [], []>} : vector<8x128xf32>, vector<128x128xf32>, vector<8x128xf32> -> vector<8x128xf32>
    %11 = vector.extract_strided_slice %6 {offsets = [1, 0], sizes = [8, 128], strides = [1, 1]} : vector<10x128xf32> to vector<8x128xf32>
    %c1 = arith.constant 1 : index
    %c0_11 = arith.constant 0 : index
    %c0_12 = arith.constant 0 : index
    %12 = vector.load %arg4[%c1, %c0_11, %c0_12] : memref<3x128x128xf32, #tpu.memory_space<vmem>>, vector<1x128x128xf32>
    %13 = vector.shape_cast %12 : vector<1x128x128xf32> to vector<128x128xf32>
    %cst_13 = arith.constant dense<0.000000e+00> : vector<8x128xf32>
    %14 = tpu.matmul %11, %13, %cst_13 {dimension_numbers = #tpu.dot_dimension_numbers<[1], [0], [0], [1], [0, 0, 1, 1], [], []>} : vector<8x128xf32>, vector<128x128xf32>, vector<8x128xf32> -> vector<8x128xf32>
    %15 = arith.addf %10, %14 : vector<8x128xf32>
    %16 = vector.extract_strided_slice %6 {offsets = [2, 0], sizes = [8, 128], strides = [1, 1]} : vector<10x128xf32> to vector<8x128xf32>
    %c2 = arith.constant 2 : index
    %c0_14 = arith.constant 0 : index
    %c0_15 = arith.constant 0 : index
    %17 = vector.load %arg4[%c2, %c0_14, %c0_15] : memref<3x128x128xf32, #tpu.memory_space<vmem>>, vector<1x128x128xf32>
    %18 = vector.shape_cast %17 : vector<1x128x128xf32> to vector<128x128xf32>
    %cst_16 = arith.constant dense<0.000000e+00> : vector<8x128xf32>
    %19 = tpu.matmul %16, %18, %cst_16 {dimension_numbers = #tpu.dot_dimension_numbers<[1], [0], [0], [1], [0, 0, 1, 1], [], []>} : vector<8x128xf32>, vector<128x128xf32>, vector<8x128xf32> -> vector<8x128xf32>
    %20 = arith.addf %15, %19 : vector<8x128xf32>
    %c0_17 = arith.constant 0 : index
    %c0_18 = arith.constant 0 : index
    %21 = vector.load %arg5[%c0_17, %c0_18] : memref<1x128xf32, #tpu.memory_space<vmem>>, vector<1x128xf32>
    %22 = vector.broadcast %21 : vector<1x128xf32> to vector<8x128xf32>
    %23 = arith.addf %20, %22 : vector<8x128xf32>
    %cst_19 = arith.constant 0.000000e+00 : f32
    %24 = vector.broadcast %cst_19 : f32 to vector<8x128xf32>
    %25 = arith.maximumf %23, %24 : vector<8x128xf32>
    %c0_20 = arith.constant 0 : index
    %c0_21 = arith.constant 0 : index
    %c0_22 = arith.constant 0 : index
    %26 = vector.load %arg6[%c0_20, %c0_21, %c0_22] : memref<1x8x128xf32, #tpu.memory_space<vmem>>, vector<1x8x128xf32>
    %27 = vector.shape_cast %26 : vector<1x8x128xf32> to vector<8x128xf32>
    %28 = vector.shape_cast %25 : vector<8x128xf32> to vector<1x8x128xf32>
    tpu.vector_store %arg6[%c0_20, %c0_21, %c0_22], %28 {strides = array<i32>} : memref<1x8x128xf32, #tpu.memory_space<vmem>>, vector<1x8x128xf32>,
    return
  }
  func.func @transform_0(%arg0: i32) -> (i32, i32, i32) {
    %c0_i32 = arith.constant 0 : i32
    %c0_i32_0 = arith.constant 0 : i32
    %c0_i32_1 = arith.constant 0 : i32
    return %arg0, %c0_i32, %c0_i32_0 : i32, i32, i32
  }
  func.func @transform_1(%arg0: i32) -> (i32, i32, i32) {
    %c0_i32 = arith.constant 0 : i32
    %c0_i32_0 = arith.constant 0 : i32
    %c0_i32_1 = arith.constant 0 : i32
    return %arg0, %c0_i32, %c0_i32_0 : i32, i32, i32
  }
  func.func @transform_2(%arg0: i32) -> (i32, i32) {
    %c0_i32 = arith.constant 0 : i32
    %c0_i32_0 = arith.constant 0 : i32
    %c0_i32_1 = arith.constant 0 : i32
    return %c0_i32, %c0_i32_0 : i32, i32
  }
  func.func @transform_3(%arg0: i32) -> (i32, i32, i32) {
    %c0_i32 = arith.constant 0 : i32
    %c0_i32_0 = arith.constant 0 : i32
    %c0_i32_1 = arith.constant 0 : i32
    %c0_i32_2 = arith.constant 0 : i32
    return %c0_i32, %c0_i32_0, %c0_i32_1 : i32, i32, i32
  }
  func.func @transform_4(%arg0: i32) -> (i32, i32) {
    %c0_i32 = arith.constant 0 : i32
    %c0_i32_0 = arith.constant 0 : i32
    %c0_i32_1 = arith.constant 0 : i32
    return %c0_i32, %c0_i32_0 : i32, i32
  }
  func.func @transform_5(%arg0: i32) -> (i32, i32, i32) {
    %c0_i32 = arith.constant 0 : i32
    %c0_i32_0 = arith.constant 0 : i32
    %c0_i32_1 = arith.constant 0 : i32
    return %arg0, %c0_i32, %c0_i32_0 : i32, i32, i32
  }
}

module attributes {stable_mosaic.version = 11 : i64} {
  func.func @_conv_band_kernel(%arg0: i32, %arg1: memref<1x8x128xf32, #tpu.memory_space<vmem>>, %arg2: memref<1x8x128xf32, #tpu.memory_space<vmem>>, %arg3: memref<18x8xf32, #tpu.memory_space<vmem>>, %arg4: memref<3x128x128xf32, #tpu.memory_space<vmem>>, %arg5: memref<1x128xf32, #tpu.memory_space<vmem>>, %arg6: memref<1x16x128xf32, #tpu.memory_space<vmem>>) attributes {dimension_semantics = [#tpu.dimension_semantics<parallel>], iteration_bounds = array<i64: 2>, scalar_prefetch = 0 : i64, scratch_operands = 0 : i64, tpu.core_type = #tpu.core_type<tc>, window_params = [{transform_indices = @transform_0, window_bounds = array<i64: 1, 8, 128>}, {transform_indices = @transform_1, window_bounds = array<i64: 1, 8, 128>}, {pipeline_mode = #tpu.pipeline_mode<synchronous>, transform_indices = @transform_2, window_bounds = array<i64: 18, 8>}, {pipeline_mode = #tpu.pipeline_mode<synchronous>, transform_indices = @transform_3, window_bounds = array<i64: 3, 128, 128>}, {pipeline_mode = #tpu.pipeline_mode<synchronous>, transform_indices = @transform_4, window_bounds = array<i64: 1, 128>}, {transform_indices = @transform_5, window_bounds = array<i64: 1, 16, 128>}]} {
    %c0 = arith.constant 0 : index
    %c0_0 = arith.constant 0 : index
    %c0_1 = arith.constant 0 : index
    %0 = vector.load %arg1[%c0, %c0_0, %c0_1] : memref<1x8x128xf32, #tpu.memory_space<vmem>>, vector<1x8x128xf32>
    %1 = vector.shape_cast %0 : vector<1x8x128xf32> to vector<8x128xf32>
    %c0_2 = arith.constant 0 : index
    %c0_3 = arith.constant 0 : index
    %c0_4 = arith.constant 0 : index
    %2 = vector.load %arg2[%c0_2, %c0_3, %c0_4] : memref<1x8x128xf32, #tpu.memory_space<vmem>>, vector<1x8x128xf32>
    %3 = vector.shape_cast %2 : vector<1x8x128xf32> to vector<8x128xf32>
    %4 = arith.addf %1, %3 : vector<8x128xf32>
    %c0_5 = arith.constant 0 : index
    %c0_6 = arith.constant 0 : index
    %5 = vector.load %arg3[%c0_5, %c0_6] : memref<18x8xf32, #tpu.memory_space<vmem>>, vector<18x8xf32>
    %cst = arith.constant dense<0.000000e+00> : vector<18x128xf32>
    %6 = tpu.matmul %5, %4, %cst {dimension_numbers = #tpu.dot_dimension_numbers<[1], [0], [0], [1], [0, 0, 1, 1], [], []>} : vector<18x8xf32>, vector<8x128xf32>, vector<18x128xf32> -> vector<18x128xf32>
    %7 = vector.extract_strided_slice %6 {offsets = [0, 0], sizes = [16, 128], strides = [1, 1]} : vector<18x128xf32> to vector<16x128xf32>
    %c0_7 = arith.constant 0 : index
    %c0_8 = arith.constant 0 : index
    %c0_9 = arith.constant 0 : index
    %8 = vector.load %arg4[%c0_7, %c0_8, %c0_9] : memref<3x128x128xf32, #tpu.memory_space<vmem>>, vector<1x128x128xf32>
    %9 = vector.shape_cast %8 : vector<1x128x128xf32> to vector<128x128xf32>
    %cst_10 = arith.constant dense<0.000000e+00> : vector<16x128xf32>
    %10 = tpu.matmul %7, %9, %cst_10 {dimension_numbers = #tpu.dot_dimension_numbers<[1], [0], [0], [1], [0, 0, 1, 1], [], []>} : vector<16x128xf32>, vector<128x128xf32>, vector<16x128xf32> -> vector<16x128xf32>
    %11 = vector.extract_strided_slice %6 {offsets = [1, 0], sizes = [16, 128], strides = [1, 1]} : vector<18x128xf32> to vector<16x128xf32>
    %c1 = arith.constant 1 : index
    %c0_11 = arith.constant 0 : index
    %c0_12 = arith.constant 0 : index
    %12 = vector.load %arg4[%c1, %c0_11, %c0_12] : memref<3x128x128xf32, #tpu.memory_space<vmem>>, vector<1x128x128xf32>
    %13 = vector.shape_cast %12 : vector<1x128x128xf32> to vector<128x128xf32>
    %cst_13 = arith.constant dense<0.000000e+00> : vector<16x128xf32>
    %14 = tpu.matmul %11, %13, %cst_13 {dimension_numbers = #tpu.dot_dimension_numbers<[1], [0], [0], [1], [0, 0, 1, 1], [], []>} : vector<16x128xf32>, vector<128x128xf32>, vector<16x128xf32> -> vector<16x128xf32>
    %15 = arith.addf %10, %14 : vector<16x128xf32>
    %16 = vector.extract_strided_slice %6 {offsets = [2, 0], sizes = [16, 128], strides = [1, 1]} : vector<18x128xf32> to vector<16x128xf32>
    %c2 = arith.constant 2 : index
    %c0_14 = arith.constant 0 : index
    %c0_15 = arith.constant 0 : index
    %17 = vector.load %arg4[%c2, %c0_14, %c0_15] : memref<3x128x128xf32, #tpu.memory_space<vmem>>, vector<1x128x128xf32>
    %18 = vector.shape_cast %17 : vector<1x128x128xf32> to vector<128x128xf32>
    %cst_16 = arith.constant dense<0.000000e+00> : vector<16x128xf32>
    %19 = tpu.matmul %16, %18, %cst_16 {dimension_numbers = #tpu.dot_dimension_numbers<[1], [0], [0], [1], [0, 0, 1, 1], [], []>} : vector<16x128xf32>, vector<128x128xf32>, vector<16x128xf32> -> vector<16x128xf32>
    %20 = arith.addf %15, %19 : vector<16x128xf32>
    %c0_17 = arith.constant 0 : index
    %c0_18 = arith.constant 0 : index
    %21 = vector.load %arg5[%c0_17, %c0_18] : memref<1x128xf32, #tpu.memory_space<vmem>>, vector<1x128xf32>
    %22 = vector.broadcast %21 : vector<1x128xf32> to vector<16x128xf32>
    %23 = arith.addf %20, %22 : vector<16x128xf32>
    %cst_19 = arith.constant 0.000000e+00 : f32
    %24 = vector.broadcast %cst_19 : f32 to vector<16x128xf32>
    %25 = arith.maximumf %23, %24 : vector<16x128xf32>
    %c0_20 = arith.constant 0 : index
    %c0_21 = arith.constant 0 : index
    %c0_22 = arith.constant 0 : index
    %26 = vector.load %arg6[%c0_20, %c0_21, %c0_22] : memref<1x16x128xf32, #tpu.memory_space<vmem>>, vector<1x16x128xf32>
    %27 = vector.shape_cast %26 : vector<1x16x128xf32> to vector<16x128xf32>
    %28 = vector.shape_cast %25 : vector<16x128xf32> to vector<1x16x128xf32>
    tpu.vector_store %arg6[%c0_20, %c0_21, %c0_22], %28 {strides = array<i32>} : memref<1x16x128xf32, #tpu.memory_space<vmem>>, vector<1x16x128xf32>,
    return
  }
  func.func @transform_0(%arg0: i32) -> (i32, i32, i32) {
    %c0_i32 = arith.constant 0 : i32
    %c0_i32_0 = arith.constant 0 : i32
    %c0_i32_1 = arith.constant 0 : i32
    return %arg0, %c0_i32, %c0_i32_0 : i32, i32, i32
  }
  func.func @transform_1(%arg0: i32) -> (i32, i32, i32) {
    %c0_i32 = arith.constant 0 : i32
    %c0_i32_0 = arith.constant 0 : i32
    %c0_i32_1 = arith.constant 0 : i32
    return %arg0, %c0_i32, %c0_i32_0 : i32, i32, i32
  }
  func.func @transform_2(%arg0: i32) -> (i32, i32) {
    %c0_i32 = arith.constant 0 : i32
    %c0_i32_0 = arith.constant 0 : i32
    %c0_i32_1 = arith.constant 0 : i32
    return %c0_i32, %c0_i32_0 : i32, i32
  }
  func.func @transform_3(%arg0: i32) -> (i32, i32, i32) {
    %c0_i32 = arith.constant 0 : i32
    %c0_i32_0 = arith.constant 0 : i32
    %c0_i32_1 = arith.constant 0 : i32
    %c0_i32_2 = arith.constant 0 : i32
    return %c0_i32, %c0_i32_0, %c0_i32_1 : i32, i32, i32
  }
  func.func @transform_4(%arg0: i32) -> (i32, i32) {
    %c0_i32 = arith.constant 0 : i32
    %c0_i32_0 = arith.constant 0 : i32
    %c0_i32_1 = arith.constant 0 : i32
    return %c0_i32, %c0_i32_0 : i32, i32
  }
  func.func @transform_5(%arg0: i32) -> (i32, i32, i32) {
    %c0_i32 = arith.constant 0 : i32
    %c0_i32_0 = arith.constant 0 : i32
    %c0_i32_1 = arith.constant 0 : i32
    return %arg0, %c0_i32, %c0_i32_0 : i32, i32, i32
  }
}

module attributes {stable_mosaic.version = 11 : i64} {
  func.func @_conv_band_kernel(%arg0: i32, %arg1: memref<1x16x128xf32, #tpu.memory_space<vmem>>, %arg2: memref<1x16x128xf32, #tpu.memory_space<vmem>>, %arg3: memref<1x128x16xf32, #tpu.memory_space<vmem>>, %arg4: memref<1x16xf32, #tpu.memory_space<vmem>>, %arg5: memref<1x16x16xf32, #tpu.memory_space<vmem>>) attributes {dimension_semantics = [#tpu.dimension_semantics<parallel>], iteration_bounds = array<i64: 2>, scalar_prefetch = 0 : i64, scratch_operands = 0 : i64, tpu.core_type = #tpu.core_type<tc>, window_params = [{transform_indices = @transform_0, window_bounds = array<i64: 1, 16, 128>}, {transform_indices = @transform_1, window_bounds = array<i64: 1, 16, 128>}, {pipeline_mode = #tpu.pipeline_mode<synchronous>, transform_indices = @transform_2, window_bounds = array<i64: 1, 128, 16>}, {pipeline_mode = #tpu.pipeline_mode<synchronous>, transform_indices = @transform_3, window_bounds = array<i64: 1, 16>}, {transform_indices = @transform_4, window_bounds = array<i64: 1, 16, 16>}]} {
    %c0 = arith.constant 0 : index
    %c0_0 = arith.constant 0 : index
    %c0_1 = arith.constant 0 : index
    %0 = vector.load %arg1[%c0, %c0_0, %c0_1] : memref<1x16x128xf32, #tpu.memory_space<vmem>>, vector<1x16x128xf32>
    %1 = vector.shape_cast %0 : vector<1x16x128xf32> to vector<16x128xf32>
    %c0_2 = arith.constant 0 : index
    %c0_3 = arith.constant 0 : index
    %c0_4 = arith.constant 0 : index
    %2 = vector.load %arg2[%c0_2, %c0_3, %c0_4] : memref<1x16x128xf32, #tpu.memory_space<vmem>>, vector<1x16x128xf32>
    %3 = vector.shape_cast %2 : vector<1x16x128xf32> to vector<16x128xf32>
    %4 = arith.addf %1, %3 : vector<16x128xf32>
    %c0_5 = arith.constant 0 : index
    %c0_6 = arith.constant 0 : index
    %c0_7 = arith.constant 0 : index
    %5 = vector.load %arg3[%c0_5, %c0_6, %c0_7] : memref<1x128x16xf32, #tpu.memory_space<vmem>>, vector<1x128x16xf32>
    %6 = vector.shape_cast %5 : vector<1x128x16xf32> to vector<128x16xf32>
    %cst = arith.constant dense<0.000000e+00> : vector<16x16xf32>
    %7 = tpu.matmul %4, %6, %cst {dimension_numbers = #tpu.dot_dimension_numbers<[1], [0], [0], [1], [0, 0, 1, 1], [], []>} : vector<16x128xf32>, vector<128x16xf32>, vector<16x16xf32> -> vector<16x16xf32>
    %c0_8 = arith.constant 0 : index
    %c0_9 = arith.constant 0 : index
    %8 = vector.load %arg4[%c0_8, %c0_9] : memref<1x16xf32, #tpu.memory_space<vmem>>, vector<1x16xf32>
    %9 = vector.broadcast %8 : vector<1x16xf32> to vector<16x16xf32>
    %10 = arith.addf %7, %9 : vector<16x16xf32>
    %c0_10 = arith.constant 0 : index
    %c0_11 = arith.constant 0 : index
    %c0_12 = arith.constant 0 : index
    %11 = vector.load %arg5[%c0_10, %c0_11, %c0_12] : memref<1x16x16xf32, #tpu.memory_space<vmem>>, vector<1x16x16xf32>
    %12 = vector.shape_cast %11 : vector<1x16x16xf32> to vector<16x16xf32>
    %13 = vector.shape_cast %10 : vector<16x16xf32> to vector<1x16x16xf32>
    tpu.vector_store %arg5[%c0_10, %c0_11, %c0_12], %13 {strides = array<i32>} : memref<1x16x16xf32, #tpu.memory_space<vmem>>, vector<1x16x16xf32>,
    return
  }
  func.func @transform_0(%arg0: i32) -> (i32, i32, i32) {
    %c0_i32 = arith.constant 0 : i32
    %c0_i32_0 = arith.constant 0 : i32
    %c0_i32_1 = arith.constant 0 : i32
    return %arg0, %c0_i32, %c0_i32_0 : i32, i32, i32
  }
  func.func @transform_1(%arg0: i32) -> (i32, i32, i32) {
    %c0_i32 = arith.constant 0 : i32
    %c0_i32_0 = arith.constant 0 : i32
    %c0_i32_1 = arith.constant 0 : i32
    return %arg0, %c0_i32, %c0_i32_0 : i32, i32, i32
  }
  func.func @transform_2(%arg0: i32) -> (i32, i32, i32) {
    %c0_i32 = arith.constant 0 : i32
    %c0_i32_0 = arith.constant 0 : i32
    %c0_i32_1 = arith.constant 0 : i32
    %c0_i32_2 = arith.constant 0 : i32
    return %c0_i32, %c0_i32_0, %c0_i32_1 : i32, i32, i32
  }
  func.func @transform_3(%arg0: i32) -> (i32, i32) {
    %c0_i32 = arith.constant 0 : i32
    %c0_i32_0 = arith.constant 0 : i32
    %c0_i32_1 = arith.constant 0 : i32
    return %c0_i32, %c0_i32_0 : i32, i32
  }
  func.func @transform_4(%arg0: i32) -> (i32, i32, i32) {
    %c0_i32 = arith.constant 0 : i32
    %c0_i32_0 = arith.constant 0 : i32
    %c0_i32_1 = arith.constant 0 : i32
    return %arg0, %c0_i32, %c0_i32_0 : i32, i32, i32
  }
}

</mosaic_0001>

<bundles_post_ra>
// kernel: _lambda_.12
= control target key start
LH: loop header
LB: loop body
LE: loop exit
PB: predicated region body
PF: predicated region fallthrough
CT: control target
= control target key end

     0   :  { %8 = vsyncpa [#allocation3], 0  ;;  %s803_s12 = smov 0   ;;  %s882_s0 = inlined_call_operand.vmem [shape: f32[2,16,64], index: 0, kind: input, shape index: {}]   ;;  %s883_s1 = inlined_call_operand.hbm [shape: f32[3,64,128], index: 1, kind: input, shape index: {}]   ;;  %s884_s2 = inlined_call_operand.vmem [shape: f32[1,128], index: 2, kind: input, shape index: {}]   ;;  %s885_s3 = inlined_call_operand.vmem [shape: f32[2,16,128], index: 3, kind: output, shape index: {}]  }
   0x1 LB: > { %s809_s13 = sadd.s32 4294967295, %s778_s12   ;;  %p560_p0 = scmp.ge.s32.totalorder %s778_s12, 1  ;;  %s778_s12 = sphi %s803_s12, %s14_s12  }
   0x2   : > { %p113_p1 = scmp.lt.s32.totalorder %s778_s12, 3  ;;  %s780_s14 = smov [#allocation2]  }
   0x3   : > { %s125_s15 = sshll.u32 %s780_s14, 4  ;;  %p886_p3 = scmp.eq.s32.totalorder %s809_s13, 0  ;;  %s126_s15 = int_to_ptr.vmem [resolvable:$true] %s125_s15 }
   0x4   : > { %p813_p2 = pnand %p560_p0, %p113_p1  ;;  %s740_s20 = scalar_lea.hbm %s883_s1, 3072 }
   0x5   : > { %p741_p6 = scmp.ne.s32.totalorder %s883_s1, %s740_s20  ;;  %p747_p10 = scmp.lt.u32.totalorder %s740_s20, %s883_s1 }
   0x6   : > { %s888_s16 = scalar_select %p813_p2, 1, 0 }
   0x7   : > { %p723_p4 = pneg %p813_p2 }
   0x9   : > { %p822_p5 = pnand %p886_p3, %p723_p4 }
   0xb   : > { %p742_p7 = pneg %p822_p5 }
   0xd   : > { %p743_p8 = pnand %p742_p7, %p741_p6 }
   0xf   : > { %p744_p9 = pneg %p743_p8 }
  0x11   : > { %p749_p11 = pnand %p747_p10, %p744_p9 }
  0x13   : > { %752 = shalt.err (!%p749_p11)
}
  0x14   : > { %s753_s25 = scalar_lea.vmem %s126_s15, 3072  ;;  %p761_p1 = scmp.lt.s32.totalorder %s126_s15, %s126_s15 }
  0x15   : > { %p754_p12 = scmp.ne.s32.totalorder %s126_s15, %s753_s25  ;;  %p762_p4 = scmp.lt.s32.totalorder %s753_s25, %s753_s25 }
  0x17   : > { %p756_p13 = pnand %p754_p12, %p742_p7  ;;  %p763_p3 = por %p762_p4, %p761_p1 }
  0x19   : > { %p757_p0 = pneg %p756_p13 }
  0x1b   : > { %p764_p2 = pnand %p763_p3, %p757_p0 }
  0x1d   : > { %767 = shalt.err (!%p764_p2)
}
  0x1e   : > { %s781_s26 = smov 128   ;;  %s782_s27 = smov 8  }
  0x1f   : > { %726 = dma.hbm_to_vmem [thread:$0]  (!%p822_p5), %s883_s1, 3072, %s126_s15, [#allocation3], %s781_s26, %s781_s26, %s782_s27  }
  0x20   : > { %p890_p6 = scmp.ne.s32.totalorder %s888_s16, 0 }
  0x21   : > { %p891_p8 = scmp.eq.s32.totalorder (!%p890_p6), %s809_s13, 0 }
  0x22   : > { %152 = sbr.rel (%p890_p6) target bundleno = 297 (0x129), region = 32 }
  0x29   : > { %773 = dma.done.wait (%p891_p8), [#allocation3], 3072   ;;  %p892_p7 = pmov %p891_p8 }
  0x2a   : > { %p176_p2 = scmp.lt.s32.totalorder %s809_s13, 1  ;;  %v198_v0 = vld [vmem:[#allocation2] sm:$0xff]  ;;  %v199_v1 = vld [vmem:[#allocation2 + $0x8] sm:$0xff]  ;;  %v200_v2 = vld [vmem:[#allocation2 + $0x10] sm:$0xff]  ;;  %vm190_vm0 = vcmask 1040384   ;;  %vm223_vm1 = vcmask 523264  }
  0x2b   : > { %775 = vsyncadd (%p892_p7), [#allocation3], 4294964224  ;;  %v683_v3 = vpack.c.bf16 %v199_v1, %v198_v0  ;;  %v201_v4 = vld [vmem:[#allocation2 + $0x18] sm:$0xff]  ;;  %v202_v6 = vld [vmem:[#allocation2 + $0x20] sm:$0xff]  ;;  %vm217_vm2 = vcmask 1046528   ;;  %vm391_vm3 = vcmask 1045504  }
  0x2c   : > { %s894_s13 = smov (!%p176_p2, %s809_s13), 1  ;;  %v687_v5 = vpack.c.bf16 %v201_v4, %v200_v2  ;;  %v203_v7 = vld [vmem:[#allocation2 + $0x28] sm:$0xff]  ;;  %v207_v8 = vld [vmem:[#allocation2 + $0x40] sm:$0xff]  ;;  %v209_v15 = vld [vmem:[#allocation2 + $0x50] sm:$0xff] }
  0x2d   : > { %s578_s30 = sshll.u32 %s894_s13, 4  ;;  %684 = vmatprep.subr.bf16.mxu0 %v683_v3  ;;  %v208_v9 = vld [vmem:[#allocation2 + $0x48] sm:$0xff]  ;;  %v691_v16 = vpack.c.bf16 %v203_v7, %v202_v6  ;;  %v204_v17 = vld [vmem:[#allocation2 + $0x30] sm:$0xff]  ;;  %v210_v18 = vld [vmem:[#allocation2 + $0x58] sm:$0xff] }
  0x2e   : > { %s180_s6 = scalar_lea.vmem %s882_s0, %s578_s30  ;;  %686 = vmatpush3.bf16.msra.mxu0 %v683_v3  ;;  %v667_v12 = vpack.c.bf16 %v208_v9, %v207_v8  ;;  %v205_v19 = vld [vmem:[#allocation2 + $0x38] sm:$0xff]  ;;  %v671_v21 = vpack.c.bf16 %v210_v18, %v209_v15  ;;  %v211_v22 = vld [vmem:[#allocation2 + $0x60] sm:$0xff]  ;;  %v212_v23 = vld [vmem:[#allocation2 + $0x68] sm:$0xff]  ;;  %s185_s11 = scalar_lea.vmem %s885_s3, %s578_s30 }
  0x2f   : > { %v186_v10 = vld [vmem:[%s180_s6] sm:$0xff]  ;;  %v187_v11 = vld [vmem:[%s180_s6 + $0x8] sm:$0xff]  ;;  %688 = vmatprep.subr.bf16.mxu0 %v687_v5  ;;  %v675_v26 = vpack.c.bf16 %v212_v23, %v211_v22  ;;  %v695_v27 = vpack.c.bf16 %v205_v19, %v204_v17  ;;  %v213_v28 = vld [vmem:[#allocation2 + $0x70] sm:$0xff] }
  0x30   : > { %v191_v13 = vrot.slane %v186_v10, 7  ;;  %v192_v14 = vrot.slane %v187_v11, 7  ;;  %668 = vmatprep.subr.bf16.mxu1 %v667_v12  ;;  %v214_v29 = vld [vmem:[#allocation2 + $0x78] sm:$0xff]  ;;  %v383_v31 = vld [vmem:[#allocation2 + $0x80] sm:$0xff]  ;;  %v384_v32 = vld [vmem:[#allocation2 + $0x88] sm:$0xff] }
  0x31   : > { %670 = vmatpush3.bf16.msra.mxu1 %v667_v12  ;;  %v679_v35 = vpack.c.bf16 %v214_v29, %v213_v28  ;;  %v699_v37 = vpack.c.bf16 %v384_v32, %v383_v31  ;;  %v385_v39 = vld [vmem:[#allocation2 + $0x90] sm:$0xff]  ;;  %v386_v40 = vld [vmem:[#allocation2 + $0x98] sm:$0xff]  ;;  %v387_v44 = vld [vmem:[#allocation2 + $0xa0] sm:$0xff] }
  0x32   : > { %v196_v20 = vsel %vm190_vm0, 0.0, %v191_v13  ;;  %690 = vmatpush3.bf16.msra.mxu0 %v687_v5  ;;  %v193_v25 = vsel %vm190_vm0, %v191_v13, %v192_v14  ;;  %672 = vmatprep.subr.bf16.mxu1 %v671_v21  ;;  %v197_v34 = vsel %vm190_vm0, %v192_v14, 0.0  ;;  %v703_v42 = vpack.c.bf16 %v386_v40, %v385_v39  ;;  %v388_v45 = vld [vmem:[#allocation2 + $0xa8] sm:$0xff]  ;;  %v389_v48 = vld [vmem:[#allocation2 + $0xb0] sm:$0xff]  ;;  %v390_v49 = vld [vmem:[#allocation2 + $0xb8] sm:$0xff] }
  0x33   : > { %v218_v24 = vrot.slane %v196_v20, 1  ;;  %645 = vmatprep.mubr.msk.f32.mxu0 %vm223_vm1, %v196_v20  ;;  %692 = vmatprep.subr.bf16.mxu0 %v691_v16  ;;  %v219_v30 = vrot.slane %v193_v25, 1  ;;  %v392_v36 = vrot.slane %v196_v20, 2  ;;  %v393_v38 = vrot.slane %v193_v25, 2  ;;  %v575_v56 = vld [vmem:[%s884_s2] ss:$0 sm:$0xff] }
  0x34   : > { %v221_v41 = vrot.slane %v197_v34, 1  ;;  %v707_v47 = vpack.c.bf16 %v388_v45, %v387_v44  ;;  %v711_v50 = vpack.c.bf16 %v390_v49, %v389_v48  ;;  %v395_v51 = vrot.slane %v197_v34, 2 }
  0x35   : > { %674 = vmatpush3.bf16.msra.mxu1 %v671_v21  ;;  %v220_v33 = vsel %vm217_vm2, %v218_v24, %v219_v30  ;;  %v394_v43 = vsel %vm391_vm3, %v392_v36, %v393_v38 }
  0x36   : > { %694 = vmatpush3.bf16.msra.mxu0 %v691_v16  ;;  %676 = vmatprep.subr.bf16.mxu1 %v675_v26  ;;  %v222_v46 = vsel %vm217_vm2, %v219_v30, %v221_v41  ;;  %v396_v52 = vsel %vm391_vm3, %v393_v38, %v395_v51 }
  0x37   : > { %696 = vmatprep.subr.bf16.mxu0 %v695_v27  ;;  %626 = vmatprep.mubr.msk.f32.mxu1 %vm223_vm1, %v220_v33 }
  0x39   : > { %678 = vmatpush3.bf16.msra.mxu1 %v675_v26 }
  0x3a   : > { %698 = vmatpush3.bf16.msra.mxu0 %v695_v27  ;;  %680 = vmatprep.subr.bf16.mxu1 %v679_v35 }
  0x3b   : > { %700 = vmatprep.subr.bf16.mxu0 %v699_v37 }
  0x3d   : > { %646 = vmatmul.mubr.msk.f32.vlgmr.msra.gmra.mrb[0].mxu0 %vm223_vm1, %v193_v25  ;;  %682 = vmatpush3.bf16.msra.mxu1 %v679_v35 }
  0x3e   : > { %702 = vmatpush3.bf16.msra.mxu0 %v699_v37  ;;  %664 = vmatprep.mubr.msk.f32.mxu0 %vm223_vm1, %v394_v43 }
  0x3f   : > { %704 = vmatprep.subr.bf16.mxu0 %v703_v42 }
  0x40   : > { %627 = vmatmul.mubr.msk.f32.vlgmr.msra.gmra.mrb[0].mxu1 %vm223_vm1, %v222_v46 }
  0x42   : > { %706 = vmatpush3.bf16.msra.mxu0 %v703_v42 }
  0x43   : > { %708 = vmatprep.subr.bf16.mxu0 %v707_v47 }
  0x46   : > { %710 = vmatpush3.bf16.msra.mxu0 %v707_v47 }
  0x47   : > { %712 = vmatprep.subr.bf16.mxu0 %v711_v50 }
  0x4a   : > { %714 = vmatpush3.bf16.msra.mxu0 %v711_v50 }
  0x4d   : > { %665 = vmatmul.mubr.msk.f32.vlgmr.msra.gmra.mrb[0].mxu0 %vm223_vm1, %v396_v52 }
 0x113   : > { %v628_v53 = vpop.f32.mrb[0].mxu1 }
 0x114   : > { %v294_v54 = vpop.f32.mrb[1].mxu1 }
 0x120   : > { %v666_v55 = vpop.f32.mrb[0].mxu0 }
 0x121   : > { %v715_v57 = vadd.f32 %v666_v55, %v628_v53  ;;  %v467_v58 = vpop.f32.mrb[1].mxu0 }
 0x122   : > { %v716_v59 = vadd.f32 %v467_v58, %v294_v54 }
 0x123   : > { %v486_v60 = vadd.f32 %v715_v57, %v575_v56 }
 0x124   : > { %v485_v61 = vadd.f32 %v716_v59, %v575_v56 }
 0x125   : > { %v488_v62 = vmax.f32 %v486_v60, 0.0 }
 0x126   : > { %v487_v63 = vmax.f32 %v485_v61, 0.0 }
 0x127   : > { %490 = vst [vmem:[%s185_s11 + $0x8] sm:$0xff] %v488_v62 }
 0x128   : > { %489 = vst [vmem:[%s185_s11] sm:$0xff] %v487_v63 }
 0x129 PF: > { %s14_s12 = sadd.s32 1, %s778_s12  }
 0x12a   : > { %p11_p3 = scmp.ge.s32.totalorder %s14_s12, 4  }
 0x12c   :  { %13 = sbr.rel (!%p11_p3) target bundleno = 1 (0x1), region = 69 }
 0x133   :  { %512 = vsyncpa [#allocation3], 1 }
 0x134   :  { %514 = vsyncpa [#allocation3 + $0x1], 1 }

// kernel: _lambda_.13
= control target key start
LH: loop header
LB: loop body
LE: loop exit
PB: predicated region body
PF: predicated region fallthrough
CT: control target
= control target key end

     0   :  { %8 = vsyncpa [#allocation3], 0  ;;  %s876_s12 = smov 0   ;;  %s978_s0 = inlined_call_operand.vmem [shape: f32[2,8,256], index: 0, kind: input, shape index: {}]   ;;  %s979_s1 = inlined_call_operand.hbm [shape: f32[3,128,128], index: 1, kind: input, shape index: {}]   ;;  %s980_s2 = inlined_call_operand.vmem [shape: f32[1,128], index: 2, kind: input, shape index: {}]   ;;  %s981_s3 = inlined_call_operand.vmem [shape: f32[2,8,128], index: 3, kind: output, shape index: {}]  }
   0x1 LB: > { %s882_s13 = sadd.s32 4294967295, %s848_s12   ;;  %p544_p0 = scmp.ge.s32.totalorder %s848_s12, 1  ;;  %s848_s12 = sphi %s876_s12, %s14_s12  }
   0x2   : > { %p113_p1 = scmp.lt.s32.totalorder %s848_s12, 3  ;;  %s850_s14 = smov [#allocation2]  }
   0x3   : > { %s125_s15 = sshll.u32 %s850_s14, 4  ;;  %p982_p3 = scmp.eq.s32.totalorder %s882_s13, 0  ;;  %s126_s15 = int_to_ptr.vmem [resolvable:$true] %s125_s15 }
   0x4   : > { %p886_p2 = pnand %p544_p0, %p113_p1  ;;  %s810_s20 = scalar_lea.hbm %s979_s1, 6144 }
   0x5   : > { %p811_p6 = scmp.ne.s32.totalorder %s979_s1, %s810_s20  ;;  %p817_p10 = scmp.lt.u32.totalorder %s810_s20, %s979_s1 }
   0x6   : > { %s984_s16 = scalar_select %p886_p2, 1, 0 }
   0x7   : > { %p790_p4 = pneg %p886_p2 }
   0x9   : > { %p895_p5 = pnand %p982_p3, %p790_p4 }
   0xb   : > { %p812_p7 = pneg %p895_p5 }
   0xd   : > { %p813_p8 = pnand %p812_p7, %p811_p6 }
   0xf   : > { %p814_p9 = pneg %p813_p8 }
  0x11   : > { %p819_p11 = pnand %p817_p10, %p814_p9 }
  0x13   : > { %822 = shalt.err (!%p819_p11)
}
  0x14   : > { %s823_s25 = scalar_lea.vmem %s126_s15, 6144  ;;  %p831_p1 = scmp.lt.s32.totalorder %s126_s15, %s126_s15 }
  0x15   : > { %p824_p12 = scmp.ne.s32.totalorder %s126_s15, %s823_s25  ;;  %p832_p4 = scmp.lt.s32.totalorder %s823_s25, %s823_s25 }
  0x17   : > { %p826_p13 = pnand %p824_p12, %p812_p7  ;;  %p833_p3 = por %p832_p4, %p831_p1 }
  0x19   : > { %p827_p0 = pneg %p826_p13 }
  0x1b   : > { %p834_p2 = pnand %p833_p3, %p827_p0 }
  0x1d   : > { %837 = shalt.err (!%p834_p2)
}
  0x1e   : > { %s851_s26 = smov 128   ;;  %s852_s27 = smov 8  }
  0x1f   : > { %793 = dma.hbm_to_vmem [thread:$0]  (!%p895_p5), %s979_s1, 6144, %s126_s15, [#allocation3], %s851_s26, %s851_s26, %s852_s27  }
  0x20   : > { %p986_p6 = scmp.ne.s32.totalorder %s984_s16, 0 }
  0x21   : > { %p987_p8 = scmp.eq.s32.totalorder (!%p986_p6), %s882_s13, 0 }
  0x22   : > { %152 = sbr.rel (%p986_p6) target bundleno = 327 (0x147), region = 32 }
  0x29   : > { %843 = dma.done.wait (%p987_p8), [#allocation3], 6144   ;;  %p988_p7 = pmov %p987_p8 }
  0x2a   : > { %v853_v0 = vmov 0.0|0.0   ;;  %vm854_vm0 = vmmov 0   ;;  %v855_v1 = vmov 0.0   ;;  %v212_v2 = vld [vmem:[#allocation2 + $0x80] sm:$0xff]  ;;  %v213_v3 = vld [vmem:[#allocation2 + $0x88] sm:$0xff]  ;;  %v214_v7 = vld [vmem:[#allocation2 + $0x90] sm:$0xff] }
  0x2b   : > { %845 = vsyncadd (%p988_p7), [#allocation3], 4294961152  ;;  %714 = vmatprep.subr.bf16.mxu0 %v853_v0  ;;  %738 = vmatprep.subr.bf16.mxu1 %v853_v0  ;;  %v195_v4 = vld [vmem:[#allocation2] sm:$0xff]  ;;  %v715_v5 = vpack.c.bf16 %v213_v3, %v212_v2  ;;  %v196_v6 = vld [vmem:[#allocation2 + $0x8] sm:$0xff]  ;;  %p175_p2 = scmp.lt.s32.totalorder %s882_s13, 1  ;;  %vm192_vm1 = vcmask 1040384  }
  0x2c   : > { %641 = vmatprep.mubr.msk.f32.mxu0 %vm854_vm0, %v855_v1  ;;  %676 = vmatprep.mubr.msk.f32.mxu1 %vm854_vm0, %v855_v1  ;;  %v215_v8 = vld [vmem:[#allocation2 + $0x98] sm:$0xff]  ;;  %v739_v9 = vpack.c.bf16 %v196_v6, %v195_v4  ;;  %v197_v10 = vld [vmem:[#allocation2 + $0x10] sm:$0xff]  ;;  %v216_v14 = vld [vmem:[#allocation2 + $0xa0] sm:$0xff]  ;;  %vm229_vm2 = vcmask 1046528  }
  0x2d   : > { %v198_v11 = vld [vmem:[#allocation2 + $0x18] sm:$0xff]  ;;  %716 = vmatpush3.bf16.msra.mxu0 %v715_v5  ;;  %v718_v12 = vpack.c.bf16 %v215_v8, %v214_v7  ;;  %v217_v15 = vld [vmem:[#allocation2 + $0xa8] sm:$0xff]  ;;  %v199_v16 = vld [vmem:[#allocation2 + $0x20] sm:$0xff]  ;;  %s990_s13 = smov (!%p175_p2, %s882_s13), 1 }
  0x2e   : > { %740 = vmatpush3.bf16.msra.mxu1 %v739_v9  ;;  %717 = vmatprep.subr.bf16.mxu0 %v853_v0  ;;  %v742_v13 = vpack.c.bf16 %v198_v11, %v197_v10  ;;  %v200_v17 = vld [vmem:[#allocation2 + $0x28] sm:$0xff]  ;;  %v721_v18 = vpack.c.bf16 %v217_v15, %v216_v14  ;;  %v218_v20 = vld [vmem:[#allocation2 + $0xb0] sm:$0xff]  ;;  %v219_v21 = vld [vmem:[#allocation2 + $0xb8] sm:$0xff]  ;;  %s557_s30 = sshll.u32 %s990_s13, 4  ;;  %s551_s9 = sshll.u32 %s990_s13, 3 }
  0x2f   : > { %741 = vmatprep.subr.bf16.mxu1 %v853_v0  ;;  %v745_v19 = vpack.c.bf16 %v200_v17, %v199_v16  ;;  %v201_v22 = vld [vmem:[#allocation2 + $0x30] sm:$0xff]  ;;  %v202_v23 = vld [vmem:[#allocation2 + $0x38] sm:$0xff]  ;;  %v724_v24 = vpack.c.bf16 %v219_v21, %v218_v20  ;;  %v220_v26 = vld [vmem:[#allocation2 + $0xc0] sm:$0xff]  ;;  %s941_s6 = scalar_lea.vmem %s978_s0, %s557_s30  ;;  %s183_s14 = scalar_lea.vmem %s981_s3, %s551_s9 }
  0x30   : > { %v748_v25 = vpack.c.bf16 %v202_v23, %v201_v22  ;;  %v221_v27 = vld [vmem:[#allocation2 + $0xc8] sm:$0xff]  ;;  %v203_v28 = vld [vmem:[#allocation2 + $0x40] sm:$0xff]  ;;  %v222_v32 = vld [vmem:[#allocation2 + $0xd0] sm:$0xff] }
  0x31   : > { %719 = vmatpush3.bf16.msra.mxu0 %v718_v12  ;;  %v204_v29 = vld [vmem:[#allocation2 + $0x48] sm:$0xff]  ;;  %v727_v30 = vpack.c.bf16 %v221_v27, %v220_v26  ;;  %v223_v33 = vld [vmem:[#allocation2 + $0xd8] sm:$0xff]  ;;  %v205_v34 = vld [vmem:[#allocation2 + $0x50] sm:$0xff] }
  0x32   : > { %743 = vmatpush3.bf16.msra.mxu1 %v742_v13  ;;  %720 = vmatprep.subr.bf16.mxu0 %v853_v0  ;;  %v751_v31 = vpack.c.bf16 %v204_v29, %v203_v28  ;;  %v206_v35 = vld [vmem:[#allocation2 + $0x58] sm:$0xff]  ;;  %v184_v36 = vld [vmem:[%s941_s6] sm:$0xff]  ;;  %v730_v37 = vpack.c.bf16 %v223_v33, %v222_v32  ;;  %v225_v40 = vld [vmem:[#allocation2 + $0xe8] sm:$0xff] }
  0x33   : > { %744 = vmatprep.subr.bf16.mxu1 %v853_v0  ;;  %v754_v38 = vpack.c.bf16 %v206_v35, %v205_v34  ;;  %v224_v39 = vld [vmem:[#allocation2 + $0xe0] sm:$0xff]  ;;  %v188_v41 = vrot.slane %v184_v36, 7  ;;  %v208_v43 = vld [vmem:[#allocation2 + $0x68] sm:$0xff]  ;;  %v226_v46 = vld [vmem:[#allocation2 + $0xf0] sm:$0xff] }
  0x34   : > { %v207_v42 = vld [vmem:[#allocation2 + $0x60] sm:$0xff]  ;;  %v733_v44 = vpack.c.bf16 %v225_v40, %v224_v39  ;;  %v227_v47 = vld [vmem:[#allocation2 + $0xf8] sm:$0xff]  ;;  %v209_v49 = vld [vmem:[#allocation2 + $0x70] sm:$0xff] }
  0x35   : > { %722 = vmatpush3.bf16.msra.mxu0 %v721_v18  ;;  %v757_v45 = vpack.c.bf16 %v208_v43, %v207_v42  ;;  %v193_v48 = vsel %vm192_vm1, 0.0, %v188_v41  ;;  %v210_v50 = vld [vmem:[#allocation2 + $0x78] sm:$0xff]  ;;  %v736_v51 = vpack.c.bf16 %v227_v47, %v226_v46  ;;  %v231_v53 = vrot.slane %v188_v41, 1  ;;  %v185_v55 = vld [vmem:[%s941_s6 + $0x8] sm:$0xff]  ;;  %v375_v56 = vld [vmem:[#allocation2 + $0x100] sm:$0xff] }
  0x36   : > { %746 = vmatpush3.bf16.msra.mxu1 %v745_v19  ;;  %723 = vmatprep.subr.bf16.mxu0 %v853_v0  ;;  %v230_v52 = vrot.slane %v193_v48, 1  ;;  %v760_v54 = vpack.c.bf16 %v210_v50, %v209_v49  ;;  %v376_v57 = vld [vmem:[#allocation2 + $0x108] sm:$0xff]  ;;  %v189_v59 = vrot.slane %v185_v55, 7  ;;  %vm552_vm3 = vmneg %vm192_vm1  ;;  %v377_v61 = vld [vmem:[#allocation2 + $0x110] sm:$0xff] }
  0x37   : > { %747 = vmatprep.subr.bf16.mxu1 %v853_v0  ;;  %v763_v60 = vpack.c.bf16 %v376_v57, %v375_v56  ;;  %v378_v62 = vld [vmem:[#allocation2 + $0x118] sm:$0xff]  ;;  %v379_v2 = vld [vmem:[#allocation2 + $0x120] sm:$0xff]  ;;  %v380_v3 = vld [vmem:[#allocation2 + $0x128] sm:$0xff] }
  0x38   : > { %v232_v58 = vsel %vm229_vm2, %v230_v52, %v231_v53  ;;  %v766_v63 = vpack.c.bf16 %v378_v62, %v377_v61  ;;  %v769_v4 = vpack.c.bf16 %v380_v3, %v379_v2  ;;  %v381_v5 = vld [vmem:[#allocation2 + $0x130] sm:$0xff]  ;;  %v382_v6 = vld [vmem:[#allocation2 + $0x138] sm:$0xff]  ;;  %v383_v8 = vld [vmem:[#allocation2 + $0x140] sm:$0xff]  ;;  %v194_v18 = vsel %vm192_vm1, 0.0, %v189_v59 }
  0x39   : > { %725 = vmatpush3.bf16.msra.mxu0 %v724_v24  ;;  %v772_v7 = vpack.c.bf16 %v382_v6, %v381_v5  ;;  %v384_v9 = vld [vmem:[#allocation2 + $0x148] sm:$0xff]  ;;  %v385_v11 = vld [vmem:[#allocation2 + $0x150] sm:$0xff]  ;;  %v386_v12 = vld [vmem:[#allocation2 + $0x158] sm:$0xff]  ;;  %v392_v20 = vrot.slane %v194_v18, 1  ;;  %v393_v21 = vrot.slane %v189_v59, 1 }
  0x3a   : > { %749 = vmatpush3.bf16.msra.mxu1 %v748_v25  ;;  %726 = vmatprep.subr.bf16.mxu0 %v853_v0  ;;  %v775_v10 = vpack.c.bf16 %v384_v9, %v383_v8  ;;  %v387_v13 = vld [vmem:[#allocation2 + $0x160] sm:$0xff]  ;;  %v388_v14 = vld [vmem:[#allocation2 + $0x168] sm:$0xff]  ;;  %v389_v16 = vld [vmem:[#allocation2 + $0x170] sm:$0xff] }
  0x3b   : > { %750 = vmatprep.subr.bf16.mxu1 %v853_v0  ;;  %v781_v15 = vpack.c.bf16 %v388_v14, %v387_v13  ;;  %v390_v17 = vld [vmem:[#allocation2 + $0x178] sm:$0xff]  ;;  %v394_v22 = vsel %vm229_vm2, %v392_v20, %v393_v21  ;;  %v554_v29 = vld [vmem:[%s980_s2] ss:$0 sm:$0xff] }
  0x3c   : > { %v784_v19 = vpack.c.bf16 %v390_v17, %v389_v16 }
  0x3d   : > { %728 = vmatpush3.bf16.msra.mxu0 %v727_v30 }
  0x3e   : > { %752 = vmatpush3.bf16.msra.mxu1 %v751_v31  ;;  %729 = vmatprep.subr.bf16.mxu0 %v853_v0 }
  0x3f   : > { %753 = vmatprep.subr.bf16.mxu1 %v853_v0 }
  0x41   : > { %731 = vmatpush3.bf16.msra.mxu0 %v730_v37 }
  0x42   : > { %755 = vmatpush3.bf16.msra.mxu1 %v754_v38  ;;  %732 = vmatprep.subr.bf16.mxu0 %v853_v0 }
  0x43   : > { %756 = vmatprep.subr.bf16.mxu1 %v853_v0 }
  0x45   : > { %734 = vmatpush3.bf16.msra.mxu0 %v733_v44 }
  0x46   : > { %758 = vmatpush3.bf16.msra.mxu1 %v757_v45  ;;  %735 = vmatprep.subr.bf16.mxu0 %v853_v0 }
  0x47   : > { %759 = vmatprep.subr.bf16.mxu1 %v853_v0 }
  0x49   : > { %737 = vmatpush3.bf16.msra.mxu0 %v736_v51 }
  0x4a   : > { %761 = vmatpush3.bf16.msra.mxu1 %v760_v54  ;;  %762 = vmatprep.subr.bf16.mxu0 %v853_v0 }
  0x4c   : > { %642 = vmatmul.mubr.f32.vlgmr.msra.gmra.mrb[0].mxu0 %v232_v58 }
  0x4d   : > { %677 = vmatmul.mubr.msk.f32.vlgmr.msra.gmra.mrb[0].mxu1 %vm552_vm3, %v189_v59  ;;  %764 = vmatpush3.bf16.msra.mxu0 %v763_v60 }
  0x4e   : > { %765 = vmatprep.subr.bf16.mxu0 %v853_v0  ;;  %711 = vmatprep.mubr.msk.f32.mxu0 %vm854_vm0, %v855_v1  ;;  %v778_v1 = vpack.c.bf16 %v386_v12, %v385_v11 }
  0x51   : > { %767 = vmatpush3.bf16.msra.mxu0 %v766_v63 }
  0x52   : > { %768 = vmatprep.subr.bf16.mxu0 %v853_v0 }
  0x55   : > { %770 = vmatpush3.bf16.msra.mxu0 %v769_v4 }
  0x56   : > { %771 = vmatprep.subr.bf16.mxu0 %v853_v0 }
  0x59   : > { %773 = vmatpush3.bf16.msra.mxu0 %v772_v7 }
  0x5a   : > { %774 = vmatprep.subr.bf16.mxu0 %v853_v0 }
  0x5d   : > { %776 = vmatpush3.bf16.msra.mxu0 %v775_v10 }
  0x5e   : > { %777 = vmatprep.subr.bf16.mxu0 %v853_v0 }
  0x61   : > { %779 = vmatpush3.bf16.msra.mxu0 %v778_v1 }
  0x62   : > { %780 = vmatprep.subr.bf16.mxu0 %v853_v0 }
  0x65   : > { %782 = vmatpush3.bf16.msra.mxu0 %v781_v15 }
  0x66   : > { %783 = vmatprep.subr.bf16.mxu0 %v853_v0 }
  0x69   : > { %785 = vmatpush3.bf16.msra.mxu0 %v784_v19 }
  0x6c   : > { %712 = vmatmul.mubr.f32.vlgmr.msra.gmra.mrb[2].mxu0 %v394_v22 }
 0x11f   : > { %v300_v23 = vpop.f32.mrb[0].mxu0 }
 0x120   : > { %v643_v24 = vpop.f32.mrb[1].mxu0  ;;  %v370_v25 = vpop.f32.mrb[0].mxu1 }
 0x121   : > { %v371_v26 = vadd.f32 %v370_v25, %v300_v23  ;;  %v678_v27 = vpop.f32.mrb[1].mxu1 }
 0x13f   : > { %v462_v28 = vpop.f32.mrb[2].mxu0 }
 0x140   : > { %v466_v30 = vadd.f32 %v462_v28, %v371_v26  ;;  %v713_v31 = vpop.f32.mrb[3].mxu0 }
 0x142   : > { %v474_v32 = vadd.f32 %v554_v29, %v466_v30 }
 0x144   : > { %v475_v0 = vmax.f32 %v474_v32, 0.0 }
 0x146   : > { %476 = vst [vmem:[%s183_s14] sm:$0xff] %v475_v0 }
 0x147 PF: > { %s14_s12 = sadd.s32 1, %s848_s12  }
 0x148   : > { %p11_p3 = scmp.ge.s32.totalorder %s14_s12, 4  }
 0x14a   :  { %13 = sbr.rel (!%p11_p3) target bundleno = 1 (0x1), region = 69 }
 0x151   :  { %496 = vsyncpa [#allocation3], 1 }
 0x152   :  { %498 = vsyncpa [#allocation3 + $0x1], 1 }

// kernel: _lambda_.15
= control target key start
LH: loop header
LB: loop body
LE: loop exit
PB: predicated region body
PF: predicated region fallthrough
CT: control target
= control target key end

     0   :  { %s826_s12 = smov 0   ;;  %s1031_s0 = inlined_call_operand.vmem [shape: f32[2,4,256], index: 0, kind: input, shape index: {}]   ;;  %s1032_s1 = inlined_call_operand.vmem [shape: f32[3,128,128], index: 1, kind: input, shape index: {}]   ;;  %s1033_s2 = inlined_call_operand.vmem [shape: f32[1,128], index: 2, kind: input, shape index: {}]   ;;  %s1034_s3 = inlined_call_operand.vmem [shape: f32[2,4,128], index: 3, kind: output, shape index: {}]  }
   0x1 LB: > { %s509_s13 = sadd.s32 4294967295, %s801_s12   ;;  %p513_p0 = scmp.ge.s32.totalorder %s801_s12, 1  ;;  %s801_s12 = sphi %s826_s12, %s13_s12  }
   0x2   : > { %p137_p1 = scmp.lt.s32.totalorder %s801_s12, 3 }
   0x4   : > { %p138_p2 = pnand %p513_p0, %p137_p1 }
   0x5   : > { %v517_v0 = vld [vmem:[%s1032_s1 + $0x80] sm:$0xff] (!%p138_p2)  ;;  %v518_v1 = vld [vmem:[%s1032_s1 + $0x88] sm:$0xff] (!%p138_p2)  ;;  %v803_v3 = vmov (!%p138_p2), 0.0|0.0   ;;  %v519_v6 = vld [vmem:[%s1032_s1 + $0x90] sm:$0xff] (!%p138_p2)  ;;  %vm804_vm0 = vmmov (!%p138_p2), 0   ;;  %v805_v11 = vmov (!%p138_p2), 0.0  }
   0x6   : > { %141 = sbr.rel (%p138_p2) target bundleno = 290 (0x122), region = 32  ;;  %v179_v2 = vld [vmem:[%s1032_s1] sm:$0xff] (!%p138_p2)  ;;  %711 = vmatprep.subr.bf16.mxu0 (!%p138_p2), %v803_v3  ;;  %v712_v4 = vpack.c.bf16 (!%p138_p2), %v518_v1, %v517_v0  ;;  %735 = vmatprep.subr.bf16.mxu1 (!%p138_p2), %v803_v3  ;;  %v180_v5 = vld [vmem:[%s1032_s1 + $0x8] sm:$0xff] (!%p138_p2)  ;;  %v520_v7 = vld [vmem:[%s1032_s1 + $0x98] sm:$0xff] (!%p138_p2)  ;;  %p160_p3 = scmp.lt.s32.totalorder (!%p138_p2), %s509_s13, 1  ;;  %vm176_vm1 = vcmask (!%p138_p2), 1040384  }
   0x7   : > { %v736_v8 = vpack.c.bf16 (!%p138_p2), %v180_v5, %v179_v2  ;;  %v181_v9 = vld [vmem:[%s1032_s1 + $0x10] sm:$0xff] (!%p138_p2)  ;;  %v182_v10 = vld [vmem:[%s1032_s1 + $0x18] sm:$0xff] (!%p138_p2)  ;;  %638 = vmatprep.mubr.msk.f32.mxu0 (!%p138_p2), %vm804_vm0, %v805_v11  ;;  %673 = vmatprep.mubr.msk.f32.mxu1 (!%p138_p2), %vm804_vm0, %v805_v11  ;;  %v715_v12 = vpack.c.bf16 (!%p138_p2), %v520_v7, %v519_v6  ;;  %v521_v14 = vld [vmem:[%s1032_s1 + $0xa0] sm:$0xff] (!%p138_p2) }
   0x8   : > { %713 = vmatpush3.bf16.msra.mxu0 (!%p138_p2), %v712_v4  ;;  %v739_v13 = vpack.c.bf16 (!%p138_p2), %v182_v10, %v181_v9  ;;  %v522_v15 = vld [vmem:[%s1032_s1 + $0xa8] sm:$0xff] (!%p138_p2)  ;;  %v183_v16 = vld [vmem:[%s1032_s1 + $0x20] sm:$0xff] (!%p138_p2)  ;;  %v523_v20 = vld [vmem:[%s1032_s1 + $0xb0] sm:$0xff] (!%p138_p2) }
   0x9   : > { %737 = vmatpush3.bf16.msra.mxu1 (!%p138_p2), %v736_v8  ;;  %714 = vmatprep.subr.bf16.mxu0 (!%p138_p2), %v803_v3  ;;  %v184_v17 = vld [vmem:[%s1032_s1 + $0x28] sm:$0xff] (!%p138_p2)  ;;  %v718_v18 = vpack.c.bf16 (!%p138_p2), %v522_v15, %v521_v14  ;;  %v524_v21 = vld [vmem:[%s1032_s1 + $0xb8] sm:$0xff] (!%p138_p2)  ;;  %v185_v22 = vld [vmem:[%s1032_s1 + $0x30] sm:$0xff] (!%p138_p2) }
   0xa   : > { %738 = vmatprep.subr.bf16.mxu1 (!%p138_p2), %v803_v3  ;;  %v742_v19 = vpack.c.bf16 (!%p138_p2), %v184_v17, %v183_v16  ;;  %v186_v23 = vld [vmem:[%s1032_s1 + $0x38] sm:$0xff] (!%p138_p2)  ;;  %v721_v24 = vpack.c.bf16 (!%p138_p2), %v524_v21, %v523_v20  ;;  %v525_v26 = vld [vmem:[%s1032_s1 + $0xc0] sm:$0xff] (!%p138_p2)  ;;  %v526_v27 = vld [vmem:[%s1032_s1 + $0xc8] sm:$0xff] (!%p138_p2) }
   0xb   : > { %v745_v25 = vpack.c.bf16 (!%p138_p2), %v186_v23, %v185_v22  ;;  %v187_v28 = vld [vmem:[%s1032_s1 + $0x40] sm:$0xff] (!%p138_p2)  ;;  %v188_v29 = vld [vmem:[%s1032_s1 + $0x48] sm:$0xff] (!%p138_p2)  ;;  %v724_v30 = vpack.c.bf16 (!%p138_p2), %v526_v27, %v525_v26  ;;  %v527_v32 = vld [vmem:[%s1032_s1 + $0xd0] sm:$0xff] (!%p138_p2) }
   0xc   : > { %716 = vmatpush3.bf16.msra.mxu0 (!%p138_p2), %v715_v12  ;;  %v748_v31 = vpack.c.bf16 (!%p138_p2), %v188_v29, %v187_v28  ;;  %v528_v33 = vld [vmem:[%s1032_s1 + $0xd8] sm:$0xff] (!%p138_p2)  ;;  %v189_v34 = vld [vmem:[%s1032_s1 + $0x50] sm:$0xff] (!%p138_p2)  ;;  %v529_v38 = vld [vmem:[%s1032_s1 + $0xe0] sm:$0xff] (!%p138_p2) }
   0xd   : > { %740 = vmatpush3.bf16.msra.mxu1 %v739_v13  ;;  %717 = vmatprep.subr.bf16.mxu0 %v803_v3  ;;  %s1036_s13 = smov (!%p160_p3, %s509_s13), 1  ;;  %v190_v35 = vld [vmem:[%s1032_s1 + $0x58] sm:$0xff]  ;;  %v727_v36 = vpack.c.bf16 %v528_v33, %v527_v32  ;;  %v530_v39 = vld [vmem:[%s1032_s1 + $0xe8] sm:$0xff]  ;;  %v191_v41 = vld [vmem:[%s1032_s1 + $0x60] sm:$0xff] }
   0xe   : > { %741 = vmatprep.subr.bf16.mxu1 %v803_v3  ;;  %s554_s29 = sshll.u32 %s1036_s13, 3  ;;  %v751_v37 = vpack.c.bf16 %v190_v35, %v189_v34  ;;  %v192_v42 = vld [vmem:[%s1032_s1 + $0x68] sm:$0xff]  ;;  %v730_v43 = vpack.c.bf16 %v530_v39, %v529_v38  ;;  %v531_v46 = vld [vmem:[%s1032_s1 + $0xf0] sm:$0xff]  ;;  %v532_v47 = vld [vmem:[%s1032_s1 + $0xf8] sm:$0xff]  ;;  %s516_s16 = sshll.u32 %s1036_s13, 2 }
   0xf   : > { %s164_s15 = scalar_lea.vmem %s1031_s0, %s554_s29  ;;  %v754_v45 = vpack.c.bf16 %v192_v42, %v191_v41  ;;  %v193_v48 = vld [vmem:[%s1032_s1 + $0x70] sm:$0xff]  ;;  %v194_v49 = vld [vmem:[%s1032_s1 + $0x78] sm:$0xff]  ;;  %v733_v50 = vpack.c.bf16 %v532_v47, %v531_v46  ;;  %v535_v54 = vld [vmem:[%s1032_s1 + $0x100] sm:$0xff]  ;;  %s168_s19 = scalar_lea.vmem %s1034_s3, %s516_s16 }
  0x10   : > { %719 = vmatpush3.bf16.msra.mxu0 %v718_v18  ;;  %v169_v40 = vld [vmem:[%s164_s15] sm:$0xff]  ;;  %v757_v53 = vpack.c.bf16 %v194_v49, %v193_v48  ;;  %v536_v55 = vld [vmem:[%s1032_s1 + $0x108] sm:$0xff]  ;;  %vm533_vm2 = vmneg %vm176_vm1 }
  0x11   : > { %743 = vmatpush3.bf16.msra.mxu1 %v742_v19  ;;  %720 = vmatprep.subr.bf16.mxu0 %v803_v3  ;;  %v172_v44 = vrot.slane %v169_v40, 7  ;;  %v171_v52 = vcombine.high %v169_v40, %v169_v40  ;;  %v760_v58 = vpack.c.bf16 %v536_v55, %v535_v54  ;;  %v537_v59 = vld [vmem:[%s1032_s1 + $0x110] sm:$0xff]  ;;  %v538_v60 = vld [vmem:[%s1032_s1 + $0x118] sm:$0xff]  ;;  %v539_v62 = vld [vmem:[%s1032_s1 + $0x120] sm:$0xff] }
  0x12   : > { %744 = vmatprep.subr.bf16.mxu1 %v803_v3  ;;  %v763_v61 = vpack.c.bf16 %v538_v60, %v537_v59  ;;  %v540_v63 = vld [vmem:[%s1032_s1 + $0x128] sm:$0xff]  ;;  %v541_v1 = vld [vmem:[%s1032_s1 + $0x130] sm:$0xff]  ;;  %v542_v2 = vld [vmem:[%s1032_s1 + $0x138] sm:$0xff] }
  0x13   : > { %v177_v51 = vsel %vm176_vm1, 0.0, %v172_v44  ;;  %v173_v57 = vrot.slane %v171_v52, 7  ;;  %v766_v0 = vpack.c.bf16 %v540_v63, %v539_v62  ;;  %v769_v4 = vpack.c.bf16 %v542_v2, %v541_v1  ;;  %v543_v5 = vld [vmem:[%s1032_s1 + $0x140] sm:$0xff]  ;;  %v544_v6 = vld [vmem:[%s1032_s1 + $0x148] sm:$0xff]  ;;  %v545_v8 = vld [vmem:[%s1032_s1 + $0x150] sm:$0xff] }
  0x14   : > { %722 = vmatpush3.bf16.msra.mxu0 %v721_v24  ;;  %v213_v56 = vrot.slane %v177_v51, 1  ;;  %v772_v7 = vpack.c.bf16 %v544_v6, %v543_v5  ;;  %v546_v9 = vld [vmem:[%s1032_s1 + $0x158] sm:$0xff]  ;;  %v548_v12 = vld [vmem:[%s1032_s1 + $0x168] sm:$0xff]  ;;  %v549_v14 = vld [vmem:[%s1032_s1 + $0x170] sm:$0xff] }
  0x15   : > { %746 = vmatpush3.bf16.msra.mxu1 %v745_v25  ;;  %723 = vmatprep.subr.bf16.mxu0 %v803_v3  ;;  %v775_v10 = vpack.c.bf16 %v546_v9, %v545_v8  ;;  %v550_v15 = vld [vmem:[%s1032_s1 + $0x178] sm:$0xff]  ;;  %v178_v17 = vsel %vm176_vm1, 0.0, %v173_v57  ;;  %v551_v25 = vld [vmem:[%s1033_s2] ss:$0 sm:$0xff] }
  0x16   : > { %747 = vmatprep.subr.bf16.mxu1 %v803_v3  ;;  %v781_v16 = vpack.c.bf16 %v550_v15, %v549_v14  ;;  %v373_v18 = vrot.slane %v178_v17, 1 }
  0x18   : > { %725 = vmatpush3.bf16.msra.mxu0 %v724_v30 }
  0x19   : > { %749 = vmatpush3.bf16.msra.mxu1 %v748_v31  ;;  %726 = vmatprep.subr.bf16.mxu0 %v803_v3 }
  0x1a   : > { %750 = vmatprep.subr.bf16.mxu1 %v803_v3 }
  0x1c   : > { %728 = vmatpush3.bf16.msra.mxu0 %v727_v36 }
  0x1d   : > { %752 = vmatpush3.bf16.msra.mxu1 %v751_v37  ;;  %729 = vmatprep.subr.bf16.mxu0 %v803_v3 }
  0x1e   : > { %753 = vmatprep.subr.bf16.mxu1 %v803_v3 }
  0x20   : > { %731 = vmatpush3.bf16.msra.mxu0 %v730_v43 }
  0x21   : > { %755 = vmatpush3.bf16.msra.mxu1 %v754_v45  ;;  %732 = vmatprep.subr.bf16.mxu0 %v803_v3 }
  0x22   : > { %756 = vmatprep.subr.bf16.mxu1 %v803_v3 }
  0x24   : > { %734 = vmatpush3.bf16.msra.mxu0 %v733_v50 }
  0x25   : > { %758 = vmatpush3.bf16.msra.mxu1 %v757_v53  ;;  %759 = vmatprep.subr.bf16.mxu0 %v803_v3 }
  0x27   : > { %639 = vmatmul.mubr.f32.vlgmr.msra.gmra.mrb[0].mxu0 %v213_v56 }
  0x28   : > { %674 = vmatmul.mubr.msk.f32.vlgmr.msra.gmra.mrb[0].mxu1 %vm533_vm2, %v173_v57  ;;  %761 = vmatpush3.bf16.msra.mxu0 %v760_v58 }
  0x29   : > { %762 = vmatprep.subr.bf16.mxu0 %v803_v3  ;;  %708 = vmatprep.mubr.msk.f32.mxu0 %vm804_vm0, %v805_v11  ;;  %v547_v11 = vld [vmem:[%s1032_s1 + $0x160] sm:$0xff] }
  0x2a   : > { %v778_v13 = vpack.c.bf16 %v548_v12, %v547_v11 }
  0x2c   : > { %764 = vmatpush3.bf16.msra.mxu0 %v763_v61 }
  0x2d   : > { %765 = vmatprep.subr.bf16.mxu0 %v803_v3 }
  0x30   : > { %767 = vmatpush3.bf16.msra.mxu0 %v766_v0 }
  0x31   : > { %768 = vmatprep.subr.bf16.mxu0 %v803_v3 }
  0x34   : > { %770 = vmatpush3.bf16.msra.mxu0 %v769_v4 }
  0x35   : > { %771 = vmatprep.subr.bf16.mxu0 %v803_v3 }
  0x38   : > { %773 = vmatpush3.bf16.msra.mxu0 %v772_v7 }
  0x39   : > { %774 = vmatprep.subr.bf16.mxu0 %v803_v3 }
  0x3c   : > { %776 = vmatpush3.bf16.msra.mxu0 %v775_v10 }
  0x3d   : > { %777 = vmatprep.subr.bf16.mxu0 %v803_v3 }
  0x40   : > { %779 = vmatpush3.bf16.msra.mxu0 %v778_v13 }
  0x41   : > { %780 = vmatprep.subr.bf16.mxu0 %v803_v3 }
  0x44   : > { %782 = vmatpush3.bf16.msra.mxu0 %v781_v16 }
  0x47   : > { %709 = vmatmul.mubr.f32.vlgmr.msra.gmra.mrb[2].mxu0 %v373_v18 }
  0xfa   : > { %v281_v19 = vpop.f32.mrb[0].mxu0 }
  0xfb   : > { %v640_v20 = vpop.f32.mrb[1].mxu0  ;;  %v351_v21 = vpop.f32.mrb[0].mxu1 }
  0xfc   : > { %v352_v22 = vadd.f32 %v351_v21, %v281_v19  ;;  %v675_v23 = vpop.f32.mrb[1].mxu1 }
 0x11a   : > { %v441_v24 = vpop.f32.mrb[2].mxu0 }
 0x11b   : > { %v445_v26 = vadd.f32 %v441_v24, %v352_v22  ;;  %v710_v27 = vpop.f32.mrb[3].mxu0 }
 0x11d   : > { %v453_v28 = vadd.f32 %v551_v25, %v445_v26 }
 0x11f   : > { %v454_v3 = vmax.f32 %v453_v28, 0.0 }
 0x121   : > { %455 = vst [vmem:[%s168_s19] sm:$0xf] %v454_v3 }
 0x122 PF: > { %s13_s12 = sadd.s32 1, %s801_s12  }
 0x123   : > { %p10_p4 = scmp.ge.s32.totalorder %s13_s12, 4  }
 0x125   :  { %12 = sbr.rel (!%p10_p4) target bundleno = 1 (0x1), region = 64 }

// kernel: _lambda_.14
= control target key start
LH: loop header
LB: loop body
LE: loop exit
PB: predicated region body
PF: predicated region fallthrough
CT: control target
= control target key end

     0   :  { %s1340_s12 = smov 0   ;;  %s1856_s0 = inlined_call_operand.vmem [shape: f32[2,8,128], index: 0, kind: input, shape index: {}]   ;;  %s1857_s1 = inlined_call_operand.vmem [shape: f32[3,128,384], index: 1, kind: input, shape index: {}]   ;;  %s1858_s2 = inlined_call_operand.vmem [shape: f32[1,384], index: 2, kind: input, shape index: {}]   ;;  %s1859_s3 = inlined_call_operand.vmem [shape: f32[2,8,128], index: 3, kind: output, shape index: {}]  }
   0x1 LB: > { %s847_s13 = sadd.s32 4294967295, %s1315_s12   ;;  %p851_p0 = scmp.ge.s32.totalorder %s1315_s12, 1  ;;  %s1315_s12 = sphi %s1340_s12, %s13_s12  }
   0x2   : > { %p136_p1 = scmp.lt.s32.totalorder %s1315_s12, 3 }
   0x4   : > { %p137_p2 = pnand %p851_p0, %p136_p1 }
   0x5   : > { %v855_v0 = vld [vmem:[%s1857_s1 + $0x188] sm:$0xff] (!%p137_p2)  ;;  %v858_v1 = vld [vmem:[%s1857_s1 + $0x1a0] sm:$0xff] (!%p137_p2)  ;;  %v856_v2 = vld [vmem:[%s1857_s1 + $0x190] sm:$0xff] (!%p137_p2)  ;;  %v1317_v3 = vmov (!%p137_p2), 0.0|0.0   ;;  %vm1318_vm0 = vmmov (!%p137_p2), 0   ;;  %v1319_v8 = vmov (!%p137_p2), 0.0  }
   0x6   : > { %140 = sbr.rel (%p137_p2) target bundleno = 360 (0x168), region = 32  ;;  %1146 = vmatprep.subr.bf16.mxu1 (!%p137_p2), %v1317_v3  ;;  %v1114_v4 = vpack.c.bf16 (!%p137_p2), %v858_v1, %v855_v0  ;;  %v859_v5 = vld [vmem:[%s1857_s1 + $0x1a8] sm:$0xff] (!%p137_p2)  ;;  %v854_v6 = vld [vmem:[%s1857_s1 + $0x180] sm:$0xff] (!%p137_p2)  ;;  %v857_v7 = vld [vmem:[%s1857_s1 + $0x198] sm:$0xff] (!%p137_p2)  ;;  %1041 = vmatprep.mubr.msk.f32.mxu1 (!%p137_p2), %vm1318_vm0, %v1319_v8  ;;  %p1381_p3 = scmp.lt.s32.totalorder (!%p137_p2), %s847_s13, 1  ;;  %vm170_vm1 = vcmask (!%p137_p2), 1040384  }
   0x7   : > { %v1147_v9 = vpack.c.bf16 (!%p137_p2), %v859_v5, %v856_v2  ;;  %v1116_v10 = vpack.c.bf16 (!%p137_p2), %v857_v7, %v854_v6  ;;  %v861_v11 = vld [vmem:[%s1857_s1 + $0x1b8] sm:$0xff] (!%p137_p2)  ;;  %v864_v12 = vld [vmem:[%s1857_s1 + $0x1d0] sm:$0xff] (!%p137_p2)  ;;  %v862_v13 = vld [vmem:[%s1857_s1 + $0x1c0] sm:$0xff] (!%p137_p2)  ;;  %341 = vmatprep.mubr.f32.mxu0 (!%p137_p2), %v1319_v8  ;;  %vm608_vm2 = vcmask (!%p137_p2), 1045504   ;;  %vm272_vm3 = vcmask (!%p137_p2), 1046528  }
   0x8   : > { %1115 = vmatprep.subr.bf16.mxu0 (!%p137_p2), %v1114_v4  ;;  %v1118_v14 = vpack.c.bf16 (!%p137_p2), %v864_v12, %v861_v11  ;;  %v865_v15 = vld [vmem:[%s1857_s1 + $0x1d8] sm:$0xff] (!%p137_p2)  ;;  %v860_v16 = vld [vmem:[%s1857_s1 + $0x1b0] sm:$0xff] (!%p137_p2)  ;;  %v863_v17 = vld [vmem:[%s1857_s1 + $0x1c8] sm:$0xff] (!%p137_p2) }
   0x9   : > { %1148 = vmatpush3.bf16.msra.mxu1 (!%p137_p2), %v1147_v9  ;;  %1117 = vmatpush1.bf16.msra.mxu0 (!%p137_p2), %v1116_v10  ;;  %v1150_v18 = vpack.c.bf16 (!%p137_p2), %v865_v15, %v862_v13  ;;  %v1120_v19 = vpack.c.bf16 (!%p137_p2), %v863_v17, %v860_v16  ;;  %v867_v20 = vld [vmem:[%s1857_s1 + $0x1e8] sm:$0xff] (!%p137_p2)  ;;  %v870_v21 = vld [vmem:[%s1857_s1 + $0x200] sm:$0xff] (!%p137_p2)  ;;  %v868_v22 = vld [vmem:[%s1857_s1 + $0x1f0] sm:$0xff] (!%p137_p2) }
   0xa   : > { %1149 = vmatprep.subr.bf16.mxu1 (!%p137_p2), %v1317_v3  ;;  %1119 = vmatprep.subr.bf16.mxu0 (!%p137_p2), %v1118_v14  ;;  %v1122_v23 = vpack.c.bf16 (!%p137_p2), %v870_v21, %v867_v20  ;;  %v871_v24 = vld [vmem:[%s1857_s1 + $0x208] sm:$0xff] (!%p137_p2)  ;;  %v866_v25 = vld [vmem:[%s1857_s1 + $0x1e0] sm:$0xff] (!%p137_p2)  ;;  %v869_v26 = vld [vmem:[%s1857_s1 + $0x1f8] sm:$0xff] (!%p137_p2) }
   0xb   : > { %v873_v27 = vld [vmem:[%s1857_s1 + $0x218] sm:$0xff] (!%p137_p2)  ;;  %v876_v28 = vld [vmem:[%s1857_s1 + $0x230] sm:$0xff] (!%p137_p2)  ;;  %v1153_v29 = vpack.c.bf16 (!%p137_p2), %v871_v24, %v868_v22  ;;  %v1124_v30 = vpack.c.bf16 (!%p137_p2), %v869_v26, %v866_v25  ;;  %v874_v31 = vld [vmem:[%s1857_s1 + $0x220] sm:$0xff] (!%p137_p2) }
   0xc   : > { %v1126_v32 = vpack.c.bf16 (!%p137_p2), %v876_v28, %v873_v27  ;;  %v877_v33 = vld [vmem:[%s1857_s1 + $0x238] sm:$0xff] (!%p137_p2)  ;;  %v872_v34 = vld [vmem:[%s1857_s1 + $0x210] sm:$0xff] (!%p137_p2)  ;;  %v875_v35 = vld [vmem:[%s1857_s1 + $0x228] sm:$0xff] (!%p137_p2) }
   0xd   : > { %s1862_s13 = smov (!%p1381_p3, %s847_s13), 1  ;;  %1151 = vmatpush3.bf16.msra.mxu1 %v1150_v18  ;;  %1121 = vmatpush1.bf16.msra.mxu0 %v1120_v19  ;;  %v879_v36 = vld [vmem:[%s1857_s1 + $0x248] sm:$0xff]  ;;  %v882_v37 = vld [vmem:[%s1857_s1 + $0x260] sm:$0xff]  ;;  %v1156_v38 = vpack.c.bf16 %v877_v33, %v874_v31  ;;  %v1128_v39 = vpack.c.bf16 %v875_v35, %v872_v34  ;;  %v880_v40 = vld [vmem:[%s1857_s1 + $0x250] sm:$0xff] }
   0xe   : > { %1152 = vmatprep.subr.bf16.mxu1 %v1317_v3  ;;  %1123 = vmatprep.subr.bf16.mxu0 %v1122_v23  ;;  %s852_s17 = sshll.u32 %s1862_s13, 3  ;;  %v1130_v41 = vpack.c.bf16 %v882_v37, %v879_v36  ;;  %v883_v42 = vld [vmem:[%s1857_s1 + $0x268] sm:$0xff]  ;;  %v878_v43 = vld [vmem:[%s1857_s1 + $0x240] sm:$0xff]  ;;  %v881_v44 = vld [vmem:[%s1857_s1 + $0x258] sm:$0xff] }
   0xf   : > { %s161_s28 = scalar_lea.vmem %s1856_s0, %s852_s17  ;;  %v885_v45 = vld [vmem:[%s1857_s1 + $0x278] sm:$0xff]  ;;  %v888_v46 = vld [vmem:[%s1857_s1 + $0x290] sm:$0xff]  ;;  %v1159_v47 = vpack.c.bf16 %v883_v42, %v880_v40  ;;  %v1132_v48 = vpack.c.bf16 %v881_v44, %v878_v43  ;;  %v886_v49 = vld [vmem:[%s1857_s1 + $0x280] sm:$0xff]  ;;  %s165_s21 = scalar_lea.vmem %s1859_s3, %s852_s17 }
  0x10   : > { %v166_v50 = vld [vmem:[%s161_s28] sm:$0xff]  ;;  %v1134_v51 = vpack.c.bf16 %v888_v46, %v885_v45  ;;  %v889_v52 = vld [vmem:[%s1857_s1 + $0x298] sm:$0xff]  ;;  %v884_v53 = vld [vmem:[%s1857_s1 + $0x270] sm:$0xff] }
  0x11   : > { %1154 = vmatpush3.bf16.msra.mxu1 %v1153_v29  ;;  %1125 = vmatpush1.bf16.msra.mxu0 %v1124_v30  ;;  %v887_v54 = vld [vmem:[%s1857_s1 + $0x288] sm:$0xff]  ;;  %v1482_v55 = vrot.slane %v166_v50, 7  ;;  %v894_v57 = vld [vmem:[%s1857_s1 + $0x2c0] sm:$0xff]  ;;  %v1162_v59 = vpack.c.bf16 %v889_v52, %v886_v49  ;;  %v892_v61 = vld [vmem:[%s1857_s1 + $0x2b0] sm:$0xff] }
  0x12   : > { %1155 = vmatprep.subr.bf16.mxu1 %v1317_v3  ;;  %1127 = vmatprep.subr.bf16.mxu0 %v1126_v32  ;;  %v891_v56 = vld [vmem:[%s1857_s1 + $0x2a8] sm:$0xff]  ;;  %v1136_v60 = vpack.c.bf16 %v887_v54, %v884_v53  ;;  %v890_v2 = vld [vmem:[%s1857_s1 + $0x2a0] sm:$0xff]  ;;  %v893_v4 = vld [vmem:[%s1857_s1 + $0x2b8] sm:$0xff] }
  0x13   : > { %v171_v58 = vsel %vm170_vm1, 0.0, %v1482_v55  ;;  %v172_v62 = vsel %vm170_vm1, %v1482_v55, 0.0  ;;  %v1138_v0 = vpack.c.bf16 %v894_v57, %v891_v56  ;;  %v895_v1 = vld [vmem:[%s1857_s1 + $0x2c8] sm:$0xff]  ;;  %v897_v6 = vld [vmem:[%s1857_s1 + $0x2d8] sm:$0xff]  ;;  %v900_v7 = vld [vmem:[%s1857_s1 + $0x2f0] sm:$0xff]  ;;  %v1140_v11 = vpack.c.bf16 %v893_v4, %v890_v2 }
  0x14   : > { %v609_v63 = vrot.slane %v171_v58, 2  ;;  %v610_v5 = vrot.slane %v172_v62, 2  ;;  %v1165_v10 = vpack.c.bf16 %v895_v1, %v892_v61  ;;  %v898_v12 = vld [vmem:[%s1857_s1 + $0x2e0] sm:$0xff]  ;;  %v1142_v13 = vpack.c.bf16 %v900_v7, %v897_v6  ;;  %v901_v14 = vld [vmem:[%s1857_s1 + $0x2f8] sm:$0xff]  ;;  %v896_v15 = vld [vmem:[%s1857_s1 + $0x2d0] sm:$0xff] }
  0x15   : > { %1157 = vmatpush3.bf16.msra.mxu1 %v1156_v38  ;;  %1129 = vmatpush1.bf16.msra.mxu0 %v1128_v39  ;;  %v899_v16 = vld [vmem:[%s1857_s1 + $0x2e8] sm:$0xff]  ;;  %v177_v18 = vld [vmem:[%s1857_s1 + $0x20] sm:$0xff]  ;;  %v1168_v19 = vpack.c.bf16 %v901_v14, %v898_v12  ;;  %v273_v21 = vrot.slane %v171_v58, 1  ;;  %v274_v22 = vrot.slane %v172_v62, 1  ;;  %v175_v23 = vld [vmem:[%s1857_s1 + $0x10] sm:$0xff] }
  0x16   : > { %1158 = vmatprep.subr.bf16.mxu1 %v1317_v3  ;;  %1131 = vmatprep.subr.bf16.mxu0 %v1130_v41  ;;  %v1514_v9 = vsel %vm608_vm2, %v609_v63, %v610_v5  ;;  %v174_v17 = vld [vmem:[%s1857_s1 + $0x8] sm:$0xff]  ;;  %v1144_v20 = vpack.c.bf16 %v899_v16, %v896_v15  ;;  %v173_v26 = vld [vmem:[%s1857_s1] sm:$0xff]  ;;  %v176_v27 = vld [vmem:[%s1857_s1 + $0x18] sm:$0xff] }
  0x17   : > { %v1170_v24 = vpack.c.bf16 %v177_v18, %v174_v17  ;;  %v178_v25 = vld [vmem:[%s1857_s1 + $0x28] sm:$0xff]  ;;  %v180_v28 = vld [vmem:[%s1857_s1 + $0x38] sm:$0xff]  ;;  %v183_v29 = vld [vmem:[%s1857_s1 + $0x50] sm:$0xff]  ;;  %v275_v30 = vsel %vm272_vm3, %v273_v21, %v274_v22  ;;  %v1172_v32 = vpack.c.bf16 %v176_v27, %v173_v26 }
  0x18   : > { %v1203_v31 = vpack.c.bf16 %v178_v25, %v175_v23  ;;  %v181_v33 = vld [vmem:[%s1857_s1 + $0x40] sm:$0xff]  ;;  %v1174_v34 = vpack.c.bf16 %v183_v29, %v180_v28  ;;  %v184_v35 = vld [vmem:[%s1857_s1 + $0x58] sm:$0xff]  ;;  %v179_v36 = vld [vmem:[%s1857_s1 + $0x30] sm:$0xff] }
  0x19   : > { %1160 = vmatpush3.bf16.msra.mxu1 %v1159_v47  ;;  %1133 = vmatpush1.bf16.msra.mxu0 %v1132_v48  ;;  %v182_v37 = vld [vmem:[%s1857_s1 + $0x48] sm:$0xff]  ;;  %v189_v39 = vld [vmem:[%s1857_s1 + $0x80] sm:$0xff]  ;;  %v1206_v40 = vpack.c.bf16 %v184_v35, %v181_v33  ;;  %v187_v42 = vld [vmem:[%s1857_s1 + $0x70] sm:$0xff] }
  0x1a   : > { %1161 = vmatprep.subr.bf16.mxu1 %v1317_v3  ;;  %1135 = vmatprep.subr.bf16.mxu0 %v1134_v51  ;;  %v186_v38 = vld [vmem:[%s1857_s1 + $0x68] sm:$0xff]  ;;  %v1176_v41 = vpack.c.bf16 %v182_v37, %v179_v36  ;;  %v185_v45 = vld [vmem:[%s1857_s1 + $0x60] sm:$0xff]  ;;  %v188_v46 = vld [vmem:[%s1857_s1 + $0x78] sm:$0xff] }
  0x1b   : > { %v1178_v43 = vpack.c.bf16 %v189_v39, %v186_v38  ;;  %v190_v44 = vld [vmem:[%s1857_s1 + $0x88] sm:$0xff]  ;;  %v192_v47 = vld [vmem:[%s1857_s1 + $0x98] sm:$0xff]  ;;  %v195_v48 = vld [vmem:[%s1857_s1 + $0xb0] sm:$0xff]  ;;  %v1180_v50 = vpack.c.bf16 %v188_v46, %v185_v45 }
  0x1c   : > { %v1209_v49 = vpack.c.bf16 %v190_v44, %v187_v42  ;;  %v193_v51 = vld [vmem:[%s1857_s1 + $0xa0] sm:$0xff]  ;;  %v1182_v52 = vpack.c.bf16 %v195_v48, %v192_v47  ;;  %v196_v53 = vld [vmem:[%s1857_s1 + $0xb8] sm:$0xff]  ;;  %v191_v54 = vld [vmem:[%s1857_s1 + $0x90] sm:$0xff] }
  0x1d   : > { %1163 = vmatpush3.bf16.msra.mxu1 %v1162_v59  ;;  %1137 = vmatpush1.bf16.msra.mxu0 %v1136_v60  ;;  %v194_v56 = vld [vmem:[%s1857_s1 + $0xa8] sm:$0xff]  ;;  %v201_v58 = vld [vmem:[%s1857_s1 + $0xe0] sm:$0xff]  ;;  %v1212_v59 = vpack.c.bf16 %v196_v53, %v193_v51  ;;  %v199_v61 = vld [vmem:[%s1857_s1 + $0xd0] sm:$0xff] }
  0x1e   : > { %1164 = vmatprep.subr.bf16.mxu1 %v1317_v3  ;;  %1139 = vmatprep.subr.bf16.mxu0 %v1138_v0  ;;  %v198_v57 = vld [vmem:[%s1857_s1 + $0xc8] sm:$0xff]  ;;  %v1184_v60 = vpack.c.bf16 %v194_v56, %v191_v54  ;;  %v197_v0 = vld [vmem:[%s1857_s1 + $0xc0] sm:$0xff]  ;;  %v200_v1 = vld [vmem:[%s1857_s1 + $0xd8] sm:$0xff] }
  0x1f   : > { %v1186_v62 = vpack.c.bf16 %v201_v58, %v198_v57  ;;  %v202_v63 = vld [vmem:[%s1857_s1 + $0xe8] sm:$0xff]  ;;  %v204_v2 = vld [vmem:[%s1857_s1 + $0xf8] sm:$0xff]  ;;  %v207_v4 = vld [vmem:[%s1857_s1 + $0x110] sm:$0xff]  ;;  %v1188_v6 = vpack.c.bf16 %v200_v1, %v197_v0 }
  0x20   : > { %v1215_v5 = vpack.c.bf16 %v202_v63, %v199_v61  ;;  %v205_v7 = vld [vmem:[%s1857_s1 + $0x100] sm:$0xff]  ;;  %v203_v12 = vld [vmem:[%s1857_s1 + $0xf0] sm:$0xff]  ;;  %v210_v14 = vld [vmem:[%s1857_s1 + $0x128] sm:$0xff] }
  0x21   : > { %1166 = vmatpush3.bf16.msra.mxu1 %v1165_v10  ;;  %1141 = vmatpush1.bf16.msra.mxu0 %v1140_v11  ;;  %v1190_v10 = vpack.c.bf16 %v207_v4, %v204_v2  ;;  %v208_v11 = vld [vmem:[%s1857_s1 + $0x118] sm:$0xff]  ;;  %v213_v15 = vld [vmem:[%s1857_s1 + $0x140] sm:$0xff]  ;;  %v211_v18 = vld [vmem:[%s1857_s1 + $0x130] sm:$0xff] }
  0x22   : > { %1167 = vmatprep.subr.bf16.mxu1 %v1317_v3  ;;  %1143 = vmatprep.subr.bf16.mxu0 %v1142_v13  ;;  %v206_v13 = vld [vmem:[%s1857_s1 + $0x108] sm:$0xff]  ;;  %v1218_v16 = vpack.c.bf16 %v208_v11, %v205_v7  ;;  %v209_v21 = vld [vmem:[%s1857_s1 + $0x120] sm:$0xff]  ;;  %v212_v22 = vld [vmem:[%s1857_s1 + $0x138] sm:$0xff] }
  0x23   : > { %v1192_v17 = vpack.c.bf16 %v206_v13, %v203_v12  ;;  %v216_v23 = vld [vmem:[%s1857_s1 + $0x158] sm:$0xff]  ;;  %v1196_v26 = vpack.c.bf16 %v212_v22, %v209_v21  ;;  %v217_v27 = vld [vmem:[%s1857_s1 + $0x160] sm:$0xff]  ;;  %v908_v36 = vld [vmem:[%s1857_s1 + $0x310] sm:$0xff] }
  0x24   : > { %v220_v29 = vld [vmem:[%s1857_s1 + $0x178] sm:$0xff]  ;;  %v910_v33 = vld [vmem:[%s1857_s1 + $0x320] sm:$0xff]  ;;  %v911_v38 = vld [vmem:[%s1857_s1 + $0x328] sm:$0xff] }
  0x25   : > { %1169 = vmatpush3.bf16.msra.mxu1 %v1168_v19  ;;  %1145 = vmatpush1.bf16.msra.mxu0 %v1144_v20  ;;  %v1194_v19 = vpack.c.bf16 %v213_v15, %v210_v14  ;;  %v214_v20 = vld [vmem:[%s1857_s1 + $0x148] sm:$0xff]  ;;  %v906_v39 = vld [vmem:[%s1857_s1 + $0x300] sm:$0xff]  ;;  %v916_v42 = vld [vmem:[%s1857_s1 + $0x350] sm:$0xff] }
  0x26   : > { %1202 = vmatprep.subr.bf16.mxu1 %v1317_v3  ;;  %1171 = vmatprep.subr.bf16.mxu0 %v1170_v24  ;;  %v219_v24 = vld [vmem:[%s1857_s1 + $0x170] sm:$0xff]  ;;  %v1221_v25 = vpack.c.bf16 %v214_v20, %v211_v18  ;;  %vm902_vm4 = vmneg %vm170_vm1  ;;  %v914_v45 = vld [vmem:[%s1857_s1 + $0x340] sm:$0xff] }
  0x27   : > { %v1198_v28 = vpack.c.bf16 %v219_v24, %v216_v23  ;;  %v917_v47 = vld [vmem:[%s1857_s1 + $0x358] sm:$0xff]  ;;  %v912_v48 = vld [vmem:[%s1857_s1 + $0x330] sm:$0xff]  ;;  %v922_v51 = vld [vmem:[%s1857_s1 + $0x380] sm:$0xff] }
  0x28   : > { %1042 = vmatmul.mubr.f32.vlgmr.msra.gmra.mrb[0].mxu1 %v275_v30  ;;  %342 = vmatmul.mubr.f32.vlgmr.msra.gmra.mrb[0].mxu0 %v275_v30  ;;  %v215_v30 = vld [vmem:[%s1857_s1 + $0x150] sm:$0xff]  ;;  %v923_v57 = vld [vmem:[%s1857_s1 + $0x388] sm:$0xff]  ;;  %v921_v58 = vld [vmem:[%s1857_s1 + $0x378] sm:$0xff] }
  0x29   : > { %1204 = vmatpush3.bf16.msra.mxu1 %v1203_v31  ;;  %1173 = vmatpush1.bf16.msra.mxu0 %v1172_v32  ;;  %v218_v31 = vld [vmem:[%s1857_s1 + $0x168] sm:$0xff]  ;;  %v920_v54 = vld [vmem:[%s1857_s1 + $0x370] sm:$0xff]  ;;  %v926_v63 = vld [vmem:[%s1857_s1 + $0x3a0] sm:$0xff] }
  0x2a   : > { %1205 = vmatprep.subr.bf16.mxu1 %v1317_v3  ;;  %1175 = vmatprep.subr.bf16.mxu0 %v1174_v34  ;;  %v907_v32 = vld [vmem:[%s1857_s1 + $0x308] sm:$0xff]  ;;  %v1224_v34 = vpack.c.bf16 %v220_v29, %v217_v27  ;;  %v1200_v35 = vpack.c.bf16 %v218_v31, %v215_v30  ;;  %v1265_v61 = vpack.c.bf16 %v923_v57, %v920_v54  ;;  %v929_v1 = vld [vmem:[%s1857_s1 + $0x3b8] sm:$0xff]  ;;  %v930_v13 = vld [vmem:[%s1857_s1 + $0x3c0] sm:$0xff] }
  0x2b   : > { %1076 = vmatprep.mubr.msk.f32.mxu1 %vm1318_vm0, %v1319_v8  ;;  %482 = vmatprep.mubr.f32.mxu0 %v1319_v8  ;;  %v1226_v37 = vpack.c.bf16 %v910_v33, %v907_v32  ;;  %v927_v2 = vld [vmem:[%s1857_s1 + $0x3a8] sm:$0xff]  ;;  %v933_v14 = vld [vmem:[%s1857_s1 + $0x3d8] sm:$0xff]  ;;  %v936_v22 = vld [vmem:[%s1857_s1 + $0x3f0] sm:$0xff] }
  0x2c   : > { %v931_v4 = vld [vmem:[%s1857_s1 + $0x3c8] sm:$0xff]  ;;  %v937_v15 = vld [vmem:[%s1857_s1 + $0x3f8] sm:$0xff]  ;;  %v1244_v18 = vpack.c.bf16 %v933_v14, %v930_v13  ;;  %v942_v31 = vld [vmem:[%s1857_s1 + $0x420] sm:$0xff] }
  0x2d   : > { %1207 = vmatpush3.bf16.msra.mxu1 %v1206_v40  ;;  %1177 = vmatpush1.bf16.msra.mxu0 %v1176_v41  ;;  %v909_v40 = vld [vmem:[%s1857_s1 + $0x318] sm:$0xff]  ;;  %v935_v12 = vld [vmem:[%s1857_s1 + $0x3e8] sm:$0xff] }
  0x2e   : > { %1208 = vmatprep.subr.bf16.mxu1 %v1317_v3  ;;  %1179 = vmatprep.subr.bf16.mxu0 %v1178_v43  ;;  %v913_v41 = vld [vmem:[%s1857_s1 + $0x338] sm:$0xff]  ;;  %v1259_v43 = vpack.c.bf16 %v911_v38, %v908_v36  ;;  %v1228_v44 = vpack.c.bf16 %v909_v40, %v906_v39  ;;  %v939_v23 = vld [vmem:[%s1857_s1 + $0x408] sm:$0xff]  ;;  %v948_v40 = vld [vmem:[%s1857_s1 + $0x450] sm:$0xff] }
  0x2f   : > { %v1230_v46 = vpack.c.bf16 %v916_v42, %v913_v41  ;;  %v941_v21 = vld [vmem:[%s1857_s1 + $0x418] sm:$0xff]  ;;  %v943_v24 = vld [vmem:[%s1857_s1 + $0x428] sm:$0xff]  ;;  %v1248_v27 = vpack.c.bf16 %v939_v23, %v936_v22 }
  0x30   : > { %v947_v30 = vld [vmem:[%s1857_s1 + $0x448] sm:$0xff]  ;;  %v945_v32 = vld [vmem:[%s1857_s1 + $0x438] sm:$0xff] }
  0x31   : > { %1210 = vmatpush3.bf16.msra.mxu1 %v1209_v49  ;;  %1181 = vmatpush1.bf16.msra.mxu0 %v1180_v50  ;;  %v915_v49 = vld [vmem:[%s1857_s1 + $0x348] sm:$0xff]  ;;  %v949_v33 = vld [vmem:[%s1857_s1 + $0x458] sm:$0xff]  ;;  %v1252_v36 = vpack.c.bf16 %v945_v32, %v942_v31 }
  0x32   : > { %1211 = vmatprep.subr.bf16.mxu1 %v1317_v3  ;;  %1183 = vmatprep.subr.bf16.mxu0 %v1182_v52  ;;  %v919_v50 = vld [vmem:[%s1857_s1 + $0x368] sm:$0xff]  ;;  %v1262_v52 = vpack.c.bf16 %v917_v47, %v914_v45  ;;  %v1232_v53 = vpack.c.bf16 %v915_v49, %v912_v48  ;;  %v953_v39 = vld [vmem:[%s1857_s1 + $0x478] sm:$0xff]  ;;  %v759_v49 = vlaneseq }
  0x33   : > { %v1234_v56 = vpack.c.bf16 %v922_v51, %v919_v50  ;;  %v951_v41 = vld [vmem:[%s1857_s1 + $0x468] sm:$0xff] }
  0x34   : > { %v760_v50 = vshrl.u32 %v759_v49, 7 }
  0x35   : > { %1213 = vmatpush3.bf16.msra.mxu1 %v1212_v59  ;;  %1185 = vmatpush1.bf16.msra.mxu0 %v1184_v60  ;;  %v925_v59 = vld [vmem:[%s1857_s1 + $0x398] sm:$0xff]  ;;  %v928_v60 = vld [vmem:[%s1857_s1 + $0x3b0] sm:$0xff] }
  0x36   : > { %1214 = vmatprep.subr.bf16.mxu1 %v1317_v3  ;;  %1187 = vmatprep.subr.bf16.mxu0 %v1186_v62  ;;  %v1238_v0 = vpack.c.bf16 %v928_v60, %v925_v59  ;;  %v761_v51 = vsub.s32 0, %v760_v50 }
  0x39   : > { %1216 = vmatpush3.bf16.msra.mxu1 %v1215_v5  ;;  %1189 = vmatpush1.bf16.msra.mxu0 %v1188_v6  ;;  %v934_v5 = vld [vmem:[%s1857_s1 + $0x3e0] sm:$0xff]  ;;  %v1268_v6 = vpack.c.bf16 %v929_v1, %v926_v63 }
  0x3a   : > { %1217 = vmatprep.subr.bf16.mxu1 %v1317_v3  ;;  %1191 = vmatprep.subr.bf16.mxu0 %v1190_v10  ;;  %v932_v10 = vld [vmem:[%s1857_s1 + $0x3d0] sm:$0xff]  ;;  %v1242_v11 = vpack.c.bf16 %v934_v5, %v931_v4 }
  0x3d   : > { %1219 = vmatpush3.bf16.msra.mxu1 %v1218_v16  ;;  %1193 = vmatpush1.bf16.msra.mxu0 %v1192_v17  ;;  %v940_v16 = vld [vmem:[%s1857_s1 + $0x410] sm:$0xff]  ;;  %v1271_v17 = vpack.c.bf16 %v935_v12, %v932_v10 }
  0x3e   : > { %1220 = vmatprep.subr.bf16.mxu1 %v1317_v3  ;;  %1195 = vmatprep.subr.bf16.mxu0 %v1194_v19  ;;  %v938_v19 = vld [vmem:[%s1857_s1 + $0x400] sm:$0xff]  ;;  %v1246_v20 = vpack.c.bf16 %v940_v16, %v937_v15 }
  0x41   : > { %1222 = vmatpush3.bf16.msra.mxu1 %v1221_v25  ;;  %1197 = vmatpush1.bf16.msra.mxu0 %v1196_v26  ;;  %v946_v25 = vld [vmem:[%s1857_s1 + $0x440] sm:$0xff]  ;;  %v1274_v26 = vpack.c.bf16 %v941_v21, %v938_v19 }
  0x42   : > { %1223 = vmatprep.subr.bf16.mxu1 %v1317_v3  ;;  %1199 = vmatprep.subr.bf16.mxu0 %v1198_v28  ;;  %v944_v28 = vld [vmem:[%s1857_s1 + $0x430] sm:$0xff]  ;;  %v1250_v29 = vpack.c.bf16 %v946_v25, %v943_v24 }
  0x45   : > { %1225 = vmatpush3.bf16.msra.mxu1 %v1224_v34  ;;  %1201 = vmatpush1.bf16.msra.mxu0 %v1200_v35  ;;  %v952_v34 = vld [vmem:[%s1857_s1 + $0x470] sm:$0xff]  ;;  %v1277_v35 = vpack.c.bf16 %v947_v30, %v944_v28 }
  0x46   : > { %1258 = vmatprep.subr.bf16.mxu1 %v1317_v3  ;;  %1227 = vmatprep.subr.bf16.mxu0 %v1226_v37  ;;  %v950_v37 = vld [vmem:[%s1857_s1 + $0x460] sm:$0xff]  ;;  %v1254_v38 = vpack.c.bf16 %v952_v34, %v949_v33 }
  0x47   : > { %v1280_v42 = vpack.c.bf16 %v953_v39, %v950_v37 }
  0x48   : > { %1077 = vmatmul.mubr.msk.f32.vlgmr.msra.gmra.mrb[2].mxu1 %vm902_vm4, %v1482_v55  ;;  %903 = vmatmul.mubr.msk.f32.vlgmr.msra.gmra.mrb[0].mxu0 %vm902_vm4, %v1482_v55  ;;  %v918_v55 = vld [vmem:[%s1857_s1 + $0x360] sm:$0xff] }
  0x49   : > { %1260 = vmatpush3.bf16.msra.mxu1 %v1259_v43  ;;  %1229 = vmatpush1.bf16.msra.mxu0 %v1228_v44  ;;  %v1236_v62 = vpack.c.bf16 %v921_v58, %v918_v55  ;;  %v1256_v43 = vpack.c.bf16 %v951_v41, %v948_v40 }
  0x4a   : > { %1261 = vmatprep.subr.bf16.mxu1 %v1317_v3  ;;  %1231 = vmatprep.subr.bf16.mxu0 %v1230_v46 }
  0x4b   : > { %1111 = vmatprep.mubr.msk.f32.mxu1 %vm1318_vm0, %v1319_v8  ;;  %677 = vmatprep.mubr.f32.mxu0 %v1319_v8  ;;  %v924_v8 = vld [vmem:[%s1857_s1 + $0x390] sm:$0xff] }
  0x4c   : > { %v1240_v7 = vpack.c.bf16 %v927_v2, %v924_v8 }
  0x4d   : > { %1263 = vmatpush3.bf16.msra.mxu1 %v1262_v52  ;;  %1233 = vmatpush1.bf16.msra.mxu0 %v1232_v53  ;;  %v757_v52 = vld [vmem:[%s1858_s2] sm:$0x7]  ;;  %v765_v53 = vsub.s32 1, %v760_v50 }
  0x4e   : > { %1264 = vmatprep.subr.bf16.mxu1 %v1317_v3  ;;  %1235 = vmatprep.subr.bf16.mxu0 %v1234_v56 }
  0x4f   : > { %v766_v59 = vrot.slane %v757_v52, %v765_v53 }
  0x51   : > { %1266 = vmatpush3.bf16.msra.mxu1 %v1265_v61  ;;  %1237 = vmatpush1.bf16.msra.mxu0 %v1236_v62  ;;  %v769_v61 = vsub.s32 2, %v760_v50 }
  0x52   : > { %1267 = vmatprep.subr.bf16.mxu1 %v1317_v3  ;;  %1239 = vmatprep.subr.bf16.mxu0 %v1238_v0 }
  0x53   : > { %v770_v63 = vrot.slane %v757_v52, %v769_v61 }
  0x55   : > { %1269 = vmatpush3.bf16.msra.mxu1 %v1268_v6  ;;  %1241 = vmatpush1.bf16.msra.mxu0 %v1240_v7 }
  0x56   : > { %1270 = vmatprep.subr.bf16.mxu1 %v1317_v3  ;;  %1243 = vmatprep.subr.bf16.mxu0 %v1242_v11 }
  0x59   : > { %1272 = vmatpush3.bf16.msra.mxu1 %v1271_v17  ;;  %1245 = vmatpush1.bf16.msra.mxu0 %v1244_v18 }
  0x5a   : > { %1273 = vmatprep.subr.bf16.mxu1 %v1317_v3  ;;  %1247 = vmatprep.subr.bf16.mxu0 %v1246_v20 }
  0x5d   : > { %1275 = vmatpush3.bf16.msra.mxu1 %v1274_v26  ;;  %1249 = vmatpush1.bf16.msra.mxu0 %v1248_v27 }
  0x5e   : > { %1276 = vmatprep.subr.bf16.mxu1 %v1317_v3  ;;  %1251 = vmatprep.subr.bf16.mxu0 %v1250_v29 }
  0x61   : > { %1278 = vmatpush3.bf16.msra.mxu1 %v1277_v35  ;;  %1253 = vmatpush1.bf16.msra.mxu0 %v1252_v36 }
  0x62   : > { %1279 = vmatprep.subr.bf16.mxu1 %v1317_v3  ;;  %1255 = vmatprep.subr.bf16.mxu0 %v1254_v38  ;;  %v762_v3 = vrot.slane %v757_v52, %v761_v51 }
  0x65   : > { %1281 = vmatpush3.bf16.msra.mxu1 %v1280_v42  ;;  %1257 = vmatpush1.bf16.msra.mxu0 %v1256_v43 }
  0x68   : > { %1112 = vmatmul.mubr.f32.vlgmr.msra.gmra.mrb[4].mxu1 %v1514_v9  ;;  %678 = vmatmul.mubr.f32.vlgmr.msra.gmra.mrb[0].mxu0 %v1514_v9 }
  0xfb   : > { %v414_v44 = vpop.f32.mrb[0].mxu1 }
  0xfc   : > { %v1043_v45 = vpop.f32.mrb[1].mxu1 }
 0x11b   : > { %v555_v46 = vpop.f32.mrb[2].mxu1 }
 0x11c   : > { %v556_v47 = vadd.f32 %v555_v46, %v414_v44  ;;  %v1078_v48 = vpop.f32.mrb[3].mxu1 }
 0x13b   : > { %v750_v54 = vpop.f32.mrb[4].mxu1  ;;  %v679_v56 = vpop.f32.mrb[0].mxu0 }
 0x13c   : > { %v756_v57 = vadd.f32 %v750_v54, %v556_v47  ;;  %v774_v55 = vadd.f32 %v762_v3, %v679_v56  ;;  %v681_v58 = vpop.f32.mrb[1].mxu0  ;;  %v1113_v9 = vpop.f32.mrb[5].mxu1 }
 0x13d   : > { %v775_v62 = vadd.f32 %v766_v59, %v681_v58 }
 0x13e   : > { %v954_v60 = vmul.f32 -1.442695, %v774_v55  ;;  %v776_v1 = vadd.f32 %v770_v63, %v756_v57 }
 0x13f   : > { %v955_v0 = vmul.f32 -1.442695, %v775_v62 }
 0x140   : > { %1297 = vpow2.f32 %v954_v60 }
 0x141   : > { %1299 = vpow2.f32 %v955_v0 }
 0x142   : > { %1301 = vtanh.f32 %v776_v1 }
 0x14a   : > { %v1298_v8 = vpop.eup %1297 }
 0x14b   : > { %v780_v2 = vadd.f32 1.0, %v1298_v8  ;;  %v1300_v4 = vpop.eup %1299 }
 0x14c   : > { %v786_v5 = vadd.f32 1.0, %v1300_v4  ;;  %v1302_v6 = vpop.eup %1301 }
 0x14d   : > { %1303 = vrcp.f32 %v780_v2 }
 0x14e   : > { %1305 = vrcp.f32 %v786_v5 }
 0x157   : > { %v1304_v7 = vpop.eup %1303 }
 0x158   : > { %v790_v10 = vmul.f32 %v1304_v7, %v1302_v6  ;;  %v1306_v11 = vpop.eup %1305 }
 0x15a   : > { %1307 = vtanh.f32 %v790_v10 }
 0x164   : > { %v1308_v12 = vpop.eup %1307 }
 0x165   : > { %v792_v13 = vmul.f32 %v1308_v12, %v1306_v11 }
 0x167   : > { %793 = vst [vmem:[%s165_s21] sm:$0xff] %v792_v13 }
 0x168 PF: > { %s13_s12 = sadd.s32 1, %s1315_s12  }
 0x169   : > { %p10_p4 = scmp.ge.s32.totalorder %s13_s12, 4  }
 0x16b   :  { %12 = sbr.rel (!%p10_p4) target bundleno = 1 (0x1), region = 64 }

// kernel: _lambda_.17
= control target key start
LH: loop header
LB: loop body
LE: loop exit
PB: predicated region body
PF: predicated region fallthrough
CT: control target
= control target key end

     0   :  { %s816_s12 = smov 0   ;;  %s1023_s0 = inlined_call_operand.vmem [shape: f32[2,4,128], index: 0, kind: input, shape index: {}]   ;;  %s1024_s1 = inlined_call_operand.vmem [shape: f32[3,128,128], index: 1, kind: input, shape index: {}]   ;;  %s1025_s2 = inlined_call_operand.vmem [shape: f32[1,128], index: 2, kind: input, shape index: {}]   ;;  %s1026_s3 = inlined_call_operand.vmem [shape: f32[2,4,128], index: 3, kind: output, shape index: {}]  }
   0x1 LB: > { %s503_s13 = sadd.s32 4294967295, %s791_s12   ;;  %p507_p0 = scmp.ge.s32.totalorder %s791_s12, 1  ;;  %s791_s12 = sphi %s816_s12, %s13_s12  }
   0x2   : > { %p136_p1 = scmp.lt.s32.totalorder %s791_s12, 3 }
   0x4   : > { %p137_p2 = pnand %p507_p0, %p136_p1 }
   0x5   : > { %v510_v0 = vld [vmem:[%s1024_s1 + $0x80] sm:$0xff] (!%p137_p2)  ;;  %v511_v1 = vld [vmem:[%s1024_s1 + $0x88] sm:$0xff] (!%p137_p2)  ;;  %v793_v3 = vmov (!%p137_p2), 0.0|0.0   ;;  %v512_v6 = vld [vmem:[%s1024_s1 + $0x90] sm:$0xff] (!%p137_p2)  ;;  %vm794_vm0 = vmmov (!%p137_p2), 0   ;;  %v795_v11 = vmov (!%p137_p2), 0.0  }
   0x6   : > { %140 = sbr.rel (%p137_p2) target bundleno = 290 (0x122), region = 32  ;;  %v174_v2 = vld [vmem:[%s1024_s1] sm:$0xff] (!%p137_p2)  ;;  %702 = vmatprep.subr.bf16.mxu0 (!%p137_p2), %v793_v3  ;;  %v703_v4 = vpack.c.bf16 (!%p137_p2), %v511_v1, %v510_v0  ;;  %726 = vmatprep.subr.bf16.mxu1 (!%p137_p2), %v793_v3  ;;  %v175_v5 = vld [vmem:[%s1024_s1 + $0x8] sm:$0xff] (!%p137_p2)  ;;  %v513_v7 = vld [vmem:[%s1024_s1 + $0x98] sm:$0xff] (!%p137_p2)  ;;  %p158_p3 = scmp.lt.s32.totalorder (!%p137_p2), %s503_s13, 1  ;;  %vm170_vm1 = vcmask (!%p137_p2), 1040384  }
   0x7   : > { %v727_v8 = vpack.c.bf16 (!%p137_p2), %v175_v5, %v174_v2  ;;  %v176_v9 = vld [vmem:[%s1024_s1 + $0x10] sm:$0xff] (!%p137_p2)  ;;  %v177_v10 = vld [vmem:[%s1024_s1 + $0x18] sm:$0xff] (!%p137_p2)  ;;  %629 = vmatprep.mubr.msk.f32.mxu0 (!%p137_p2), %vm794_vm0, %v795_v11  ;;  %664 = vmatprep.mubr.msk.f32.mxu1 (!%p137_p2), %vm794_vm0, %v795_v11  ;;  %v706_v12 = vpack.c.bf16 (!%p137_p2), %v513_v7, %v512_v6  ;;  %v514_v14 = vld [vmem:[%s1024_s1 + $0xa0] sm:$0xff] (!%p137_p2)  ;;  %vm172_vm2 = vcmask (!%p137_p2), 1044480  }
   0x8   : > { %704 = vmatpush3.bf16.msra.mxu0 (!%p137_p2), %v703_v4  ;;  %v730_v13 = vpack.c.bf16 (!%p137_p2), %v177_v10, %v176_v9  ;;  %v515_v15 = vld [vmem:[%s1024_s1 + $0xa8] sm:$0xff] (!%p137_p2)  ;;  %v178_v16 = vld [vmem:[%s1024_s1 + $0x20] sm:$0xff] (!%p137_p2)  ;;  %v516_v20 = vld [vmem:[%s1024_s1 + $0xb0] sm:$0xff] (!%p137_p2) }
   0x9   : > { %728 = vmatpush3.bf16.msra.mxu1 (!%p137_p2), %v727_v8  ;;  %705 = vmatprep.subr.bf16.mxu0 (!%p137_p2), %v793_v3  ;;  %v179_v17 = vld [vmem:[%s1024_s1 + $0x28] sm:$0xff] (!%p137_p2)  ;;  %v709_v18 = vpack.c.bf16 (!%p137_p2), %v515_v15, %v514_v14  ;;  %v517_v21 = vld [vmem:[%s1024_s1 + $0xb8] sm:$0xff] (!%p137_p2)  ;;  %v180_v22 = vld [vmem:[%s1024_s1 + $0x30] sm:$0xff] (!%p137_p2) }
   0xa   : > { %729 = vmatprep.subr.bf16.mxu1 (!%p137_p2), %v793_v3  ;;  %v733_v19 = vpack.c.bf16 (!%p137_p2), %v179_v17, %v178_v16  ;;  %v181_v23 = vld [vmem:[%s1024_s1 + $0x38] sm:$0xff] (!%p137_p2)  ;;  %v712_v24 = vpack.c.bf16 (!%p137_p2), %v517_v21, %v516_v20  ;;  %v518_v26 = vld [vmem:[%s1024_s1 + $0xc0] sm:$0xff] (!%p137_p2)  ;;  %v519_v27 = vld [vmem:[%s1024_s1 + $0xc8] sm:$0xff] (!%p137_p2) }
   0xb   : > { %v736_v25 = vpack.c.bf16 (!%p137_p2), %v181_v23, %v180_v22  ;;  %v182_v28 = vld [vmem:[%s1024_s1 + $0x40] sm:$0xff] (!%p137_p2)  ;;  %v183_v29 = vld [vmem:[%s1024_s1 + $0x48] sm:$0xff] (!%p137_p2)  ;;  %v715_v30 = vpack.c.bf16 (!%p137_p2), %v519_v27, %v518_v26  ;;  %v520_v32 = vld [vmem:[%s1024_s1 + $0xd0] sm:$0xff] (!%p137_p2) }
   0xc   : > { %707 = vmatpush3.bf16.msra.mxu0 (!%p137_p2), %v706_v12  ;;  %v739_v31 = vpack.c.bf16 (!%p137_p2), %v183_v29, %v182_v28  ;;  %v521_v33 = vld [vmem:[%s1024_s1 + $0xd8] sm:$0xff] (!%p137_p2)  ;;  %v184_v34 = vld [vmem:[%s1024_s1 + $0x50] sm:$0xff] (!%p137_p2)  ;;  %v522_v39 = vld [vmem:[%s1024_s1 + $0xe0] sm:$0xff] (!%p137_p2) }
   0xd   : > { %s1028_s13 = smov (!%p158_p3, %s503_s13), 1  ;;  %731 = vmatpush3.bf16.msra.mxu1 %v730_v13  ;;  %708 = vmatprep.subr.bf16.mxu0 %v793_v3  ;;  %v185_v35 = vld [vmem:[%s1024_s1 + $0x58] sm:$0xff]  ;;  %v718_v37 = vpack.c.bf16 %v521_v33, %v520_v32  ;;  %v523_v40 = vld [vmem:[%s1024_s1 + $0xe8] sm:$0xff]  ;;  %v186_v42 = vld [vmem:[%s1024_s1 + $0x60] sm:$0xff] }
   0xe   : > { %732 = vmatprep.subr.bf16.mxu1 %v793_v3  ;;  %s508_s21 = sshll.u32 %s1028_s13, 2  ;;  %v742_v38 = vpack.c.bf16 %v185_v35, %v184_v34  ;;  %v187_v43 = vld [vmem:[%s1024_s1 + $0x68] sm:$0xff]  ;;  %v721_v44 = vpack.c.bf16 %v523_v40, %v522_v39  ;;  %v524_v46 = vld [vmem:[%s1024_s1 + $0xf0] sm:$0xff]  ;;  %v525_v47 = vld [vmem:[%s1024_s1 + $0xf8] sm:$0xff] }
   0xf   : > { %s161_s5 = scalar_lea.vmem %s1023_s0, %s508_s21  ;;  %v745_v45 = vpack.c.bf16 %v187_v43, %v186_v42  ;;  %v188_v49 = vld [vmem:[%s1024_s1 + $0x70] sm:$0xff]  ;;  %v189_v50 = vld [vmem:[%s1024_s1 + $0x78] sm:$0xff]  ;;  %v724_v51 = vpack.c.bf16 %v525_v47, %v524_v46  ;;  %v527_v54 = vld [vmem:[%s1024_s1 + $0x100] sm:$0xff]  ;;  %s165_s20 = scalar_lea.vmem %s1026_s3, %s508_s21 }
  0x10   : > { %710 = vmatpush3.bf16.msra.mxu0 %v709_v18  ;;  %v166_v36 = vld [vmem:[%s161_s5] sm:$0xf]  ;;  %v748_v53 = vpack.c.bf16 %v189_v50, %v188_v49  ;;  %v528_v55 = vld [vmem:[%s1024_s1 + $0x108] sm:$0xff]  ;;  %v529_v58 = vld [vmem:[%s1024_s1 + $0x110] sm:$0xff] }
  0x11   : > { %734 = vmatpush3.bf16.msra.mxu1 %v733_v19  ;;  %711 = vmatprep.subr.bf16.mxu0 %v793_v3  ;;  %v168_v41 = vrot.slane %v166_v36, 7  ;;  %v751_v57 = vpack.c.bf16 %v528_v55, %v527_v54  ;;  %v530_v59 = vld [vmem:[%s1024_s1 + $0x118] sm:$0xff]  ;;  %v531_v61 = vld [vmem:[%s1024_s1 + $0x120] sm:$0xff]  ;;  %v532_v62 = vld [vmem:[%s1024_s1 + $0x128] sm:$0xff] }
  0x12   : > { %735 = vmatprep.subr.bf16.mxu1 %v793_v3  ;;  %v754_v60 = vpack.c.bf16 %v530_v59, %v529_v58  ;;  %v757_v63 = vpack.c.bf16 %v532_v62, %v531_v61  ;;  %v533_v0 = vld [vmem:[%s1024_s1 + $0x130] sm:$0xff]  ;;  %v534_v1 = vld [vmem:[%s1024_s1 + $0x138] sm:$0xff]  ;;  %v535_v4 = vld [vmem:[%s1024_s1 + $0x140] sm:$0xff] }
  0x13   : > { %v171_v48 = vsel %vm170_vm1, 0.0, %v168_v41  ;;  %v760_v2 = vpack.c.bf16 %v534_v1, %v533_v0  ;;  %v536_v5 = vld [vmem:[%s1024_s1 + $0x148] sm:$0xff]  ;;  %v537_v7 = vld [vmem:[%s1024_s1 + $0x150] sm:$0xff]  ;;  %v538_v8 = vld [vmem:[%s1024_s1 + $0x158] sm:$0xff] }
  0x14   : > { %713 = vmatpush3.bf16.msra.mxu0 %v712_v24  ;;  %v173_v52 = vsel %vm172_vm2, %v171_v48, 0.0  ;;  %v763_v6 = vpack.c.bf16 %v536_v5, %v535_v4  ;;  %v766_v9 = vpack.c.bf16 %v538_v8, %v537_v7  ;;  %v539_v10 = vld [vmem:[%s1024_s1 + $0x160] sm:$0xff]  ;;  %v541_v13 = vld [vmem:[%s1024_s1 + $0x170] sm:$0xff]  ;;  %v542_v14 = vld [vmem:[%s1024_s1 + $0x178] sm:$0xff] }
  0x15   : > { %737 = vmatpush3.bf16.msra.mxu1 %v736_v25  ;;  %714 = vmatprep.subr.bf16.mxu0 %v793_v3  ;;  %v208_v56 = vrot.slane %v173_v52, 1  ;;  %v772_v15 = vpack.c.bf16 %v542_v14, %v541_v13  ;;  %v367_v16 = vrot.slane %v173_v52, 2  ;;  %v543_v23 = vld [vmem:[%s1025_s2] ss:$0 sm:$0xff] }
  0x16   : > { %738 = vmatprep.subr.bf16.mxu1 %v793_v3 }
  0x18   : > { %716 = vmatpush3.bf16.msra.mxu0 %v715_v30 }
  0x19   : > { %740 = vmatpush3.bf16.msra.mxu1 %v739_v31  ;;  %717 = vmatprep.subr.bf16.mxu0 %v793_v3 }
  0x1a   : > { %741 = vmatprep.subr.bf16.mxu1 %v793_v3 }
  0x1c   : > { %719 = vmatpush3.bf16.msra.mxu0 %v718_v37 }
  0x1d   : > { %743 = vmatpush3.bf16.msra.mxu1 %v742_v38  ;;  %720 = vmatprep.subr.bf16.mxu0 %v793_v3 }
  0x1e   : > { %744 = vmatprep.subr.bf16.mxu1 %v793_v3 }
  0x20   : > { %722 = vmatpush3.bf16.msra.mxu0 %v721_v44 }
  0x21   : > { %746 = vmatpush3.bf16.msra.mxu1 %v745_v45  ;;  %723 = vmatprep.subr.bf16.mxu0 %v793_v3 }
  0x22   : > { %747 = vmatprep.subr.bf16.mxu1 %v793_v3 }
  0x24   : > { %725 = vmatpush3.bf16.msra.mxu0 %v724_v51 }
  0x25   : > { %749 = vmatpush3.bf16.msra.mxu1 %v748_v53  ;;  %750 = vmatprep.subr.bf16.mxu0 %v793_v3 }
  0x27   : > { %630 = vmatmul.mubr.f32.vlgmr.msra.gmra.mrb[0].mxu0 %v208_v56 }
  0x28   : > { %665 = vmatmul.mubr.msk.f32.vlgmr.msra.gmra.mrb[0].mxu1 %vm172_vm2, %v171_v48  ;;  %752 = vmatpush3.bf16.msra.mxu0 %v751_v57 }
  0x29   : > { %753 = vmatprep.subr.bf16.mxu0 %v793_v3  ;;  %699 = vmatprep.mubr.msk.f32.mxu0 %vm794_vm0, %v795_v11  ;;  %v540_v11 = vld [vmem:[%s1024_s1 + $0x168] sm:$0xff] }
  0x2a   : > { %v769_v12 = vpack.c.bf16 %v540_v11, %v539_v10 }
  0x2c   : > { %755 = vmatpush3.bf16.msra.mxu0 %v754_v60 }
  0x2d   : > { %756 = vmatprep.subr.bf16.mxu0 %v793_v3 }
  0x30   : > { %758 = vmatpush3.bf16.msra.mxu0 %v757_v63 }
  0x31   : > { %759 = vmatprep.subr.bf16.mxu0 %v793_v3 }
  0x34   : > { %761 = vmatpush3.bf16.msra.mxu0 %v760_v2 }
  0x35   : > { %762 = vmatprep.subr.bf16.mxu0 %v793_v3 }
  0x38   : > { %764 = vmatpush3.bf16.msra.mxu0 %v763_v6 }
  0x39   : > { %765 = vmatprep.subr.bf16.mxu0 %v793_v3 }
  0x3c   : > { %767 = vmatpush3.bf16.msra.mxu0 %v766_v9 }
  0x3d   : > { %768 = vmatprep.subr.bf16.mxu0 %v793_v3 }
  0x40   : > { %770 = vmatpush3.bf16.msra.mxu0 %v769_v12 }
  0x41   : > { %771 = vmatprep.subr.bf16.mxu0 %v793_v3 }
  0x44   : > { %773 = vmatpush3.bf16.msra.mxu0 %v772_v15 }
  0x47   : > { %700 = vmatmul.mubr.f32.vlgmr.msra.gmra.mrb[2].mxu0 %v367_v16 }
  0xfa   : > { %v276_v17 = vpop.f32.mrb[0].mxu0 }
  0xfb   : > { %v631_v18 = vpop.f32.mrb[1].mxu0  ;;  %v346_v19 = vpop.f32.mrb[0].mxu1 }
  0xfc   : > { %v347_v20 = vadd.f32 %v346_v19, %v276_v17  ;;  %v666_v21 = vpop.f32.mrb[1].mxu1 }
 0x11a   : > { %v435_v22 = vpop.f32.mrb[2].mxu0 }
 0x11b   : > { %v439_v24 = vadd.f32 %v435_v22, %v347_v20  ;;  %v701_v25 = vpop.f32.mrb[3].mxu0 }
 0x11d   : > { %v447_v26 = vadd.f32 %v543_v23, %v439_v24 }
 0x11f   : > { %v448_v3 = vmax.f32 %v447_v26, 0.0 }
 0x121   : > { %449 = vst [vmem:[%s165_s20] sm:$0xf] %v448_v3 }
 0x122 PF: > { %s13_s12 = sadd.s32 1, %s791_s12  }
 0x123   : > { %p10_p4 = scmp.ge.s32.totalorder %s13_s12, 4  }
 0x125   :  { %12 = sbr.rel (!%p10_p4) target bundleno = 1 (0x1), region = 64 }

// kernel: _lambda_.16
= control target key start
LH: loop header
LB: loop body
LE: loop exit
PB: predicated region body
PF: predicated region fallthrough
CT: control target
= control target key end

     0   :  { %s1332_s12 = smov 0   ;;  %s1846_s0 = inlined_call_operand.vmem [shape: f32[2,4,128], index: 0, kind: input, shape index: {}]   ;;  %s1847_s1 = inlined_call_operand.vmem [shape: f32[3,128,384], index: 1, kind: input, shape index: {}]   ;;  %s1848_s2 = inlined_call_operand.vmem [shape: f32[1,384], index: 2, kind: input, shape index: {}]   ;;  %s1849_s3 = inlined_call_operand.vmem [shape: f32[2,4,128], index: 3, kind: output, shape index: {}]  }
   0x1 LB: > { %s841_s13 = sadd.s32 4294967295, %s1307_s12   ;;  %p845_p0 = scmp.ge.s32.totalorder %s1307_s12, 1  ;;  %s1307_s12 = sphi %s1332_s12, %s13_s12  }
   0x2   : > { %p136_p1 = scmp.lt.s32.totalorder %s1307_s12, 3 }
   0x4   : > { %p137_p2 = pnand %p845_p0, %p136_p1 }
   0x5   : > { %v849_v0 = vld [vmem:[%s1847_s1 + $0x188] sm:$0xff] (!%p137_p2)  ;;  %v852_v1 = vld [vmem:[%s1847_s1 + $0x1a0] sm:$0xff] (!%p137_p2)  ;;  %v850_v2 = vld [vmem:[%s1847_s1 + $0x190] sm:$0xff] (!%p137_p2)  ;;  %v1309_v3 = vmov (!%p137_p2), 0.0|0.0   ;;  %vm1310_vm0 = vmmov (!%p137_p2), 0   ;;  %v1311_v8 = vmov (!%p137_p2), 0.0  }
   0x6   : > { %140 = sbr.rel (%p137_p2) target bundleno = 360 (0x168), region = 32  ;;  %1138 = vmatprep.subr.bf16.mxu1 (!%p137_p2), %v1309_v3  ;;  %v1106_v4 = vpack.c.bf16 (!%p137_p2), %v852_v1, %v849_v0  ;;  %v853_v5 = vld [vmem:[%s1847_s1 + $0x1a8] sm:$0xff] (!%p137_p2)  ;;  %v848_v6 = vld [vmem:[%s1847_s1 + $0x180] sm:$0xff] (!%p137_p2)  ;;  %v851_v7 = vld [vmem:[%s1847_s1 + $0x198] sm:$0xff] (!%p137_p2)  ;;  %1033 = vmatprep.mubr.msk.f32.mxu1 (!%p137_p2), %vm1310_vm0, %v1311_v8  ;;  %p1391_p3 = scmp.lt.s32.totalorder (!%p137_p2), %s841_s13, 1  ;;  %vm170_vm1 = vcmask (!%p137_p2), 1040384  }
   0x7   : > { %v1139_v9 = vpack.c.bf16 (!%p137_p2), %v853_v5, %v850_v2  ;;  %v1108_v10 = vpack.c.bf16 (!%p137_p2), %v851_v7, %v848_v6  ;;  %v855_v11 = vld [vmem:[%s1847_s1 + $0x1b8] sm:$0xff] (!%p137_p2)  ;;  %v858_v12 = vld [vmem:[%s1847_s1 + $0x1d0] sm:$0xff] (!%p137_p2)  ;;  %v856_v13 = vld [vmem:[%s1847_s1 + $0x1c0] sm:$0xff] (!%p137_p2)  ;;  %338 = vmatprep.mubr.f32.mxu0 (!%p137_p2), %v1311_v8  ;;  %vm172_vm2 = vcmask (!%p137_p2), 1044480  }
   0x8   : > { %1107 = vmatprep.subr.bf16.mxu0 (!%p137_p2), %v1106_v4  ;;  %v1110_v14 = vpack.c.bf16 (!%p137_p2), %v858_v12, %v855_v11  ;;  %v859_v15 = vld [vmem:[%s1847_s1 + $0x1d8] sm:$0xff] (!%p137_p2)  ;;  %v854_v16 = vld [vmem:[%s1847_s1 + $0x1b0] sm:$0xff] (!%p137_p2)  ;;  %v857_v17 = vld [vmem:[%s1847_s1 + $0x1c8] sm:$0xff] (!%p137_p2) }
   0x9   : > { %1140 = vmatpush3.bf16.msra.mxu1 (!%p137_p2), %v1139_v9  ;;  %1109 = vmatpush1.bf16.msra.mxu0 (!%p137_p2), %v1108_v10  ;;  %v1142_v18 = vpack.c.bf16 (!%p137_p2), %v859_v15, %v856_v13  ;;  %v1112_v19 = vpack.c.bf16 (!%p137_p2), %v857_v17, %v854_v16  ;;  %v861_v20 = vld [vmem:[%s1847_s1 + $0x1e8] sm:$0xff] (!%p137_p2)  ;;  %v864_v21 = vld [vmem:[%s1847_s1 + $0x200] sm:$0xff] (!%p137_p2)  ;;  %v862_v22 = vld [vmem:[%s1847_s1 + $0x1f0] sm:$0xff] (!%p137_p2) }
   0xa   : > { %1141 = vmatprep.subr.bf16.mxu1 (!%p137_p2), %v1309_v3  ;;  %1111 = vmatprep.subr.bf16.mxu0 (!%p137_p2), %v1110_v14  ;;  %v1114_v23 = vpack.c.bf16 (!%p137_p2), %v864_v21, %v861_v20  ;;  %v865_v24 = vld [vmem:[%s1847_s1 + $0x208] sm:$0xff] (!%p137_p2)  ;;  %v860_v25 = vld [vmem:[%s1847_s1 + $0x1e0] sm:$0xff] (!%p137_p2)  ;;  %v863_v26 = vld [vmem:[%s1847_s1 + $0x1f8] sm:$0xff] (!%p137_p2) }
   0xb   : > { %v867_v27 = vld [vmem:[%s1847_s1 + $0x218] sm:$0xff] (!%p137_p2)  ;;  %v870_v28 = vld [vmem:[%s1847_s1 + $0x230] sm:$0xff] (!%p137_p2)  ;;  %v1145_v29 = vpack.c.bf16 (!%p137_p2), %v865_v24, %v862_v22  ;;  %v1116_v30 = vpack.c.bf16 (!%p137_p2), %v863_v26, %v860_v25  ;;  %v868_v31 = vld [vmem:[%s1847_s1 + $0x220] sm:$0xff] (!%p137_p2) }
   0xc   : > { %v1118_v32 = vpack.c.bf16 (!%p137_p2), %v870_v28, %v867_v27  ;;  %v871_v33 = vld [vmem:[%s1847_s1 + $0x238] sm:$0xff] (!%p137_p2)  ;;  %v866_v34 = vld [vmem:[%s1847_s1 + $0x210] sm:$0xff] (!%p137_p2)  ;;  %v869_v35 = vld [vmem:[%s1847_s1 + $0x228] sm:$0xff] (!%p137_p2) }
   0xd   : > { %1143 = vmatpush3.bf16.msra.mxu1 %v1142_v18  ;;  %1113 = vmatpush1.bf16.msra.mxu0 %v1112_v19  ;;  %s1852_s13 = smov (!%p1391_p3, %s841_s13), 1  ;;  %v873_v36 = vld [vmem:[%s1847_s1 + $0x248] sm:$0xff]  ;;  %v876_v37 = vld [vmem:[%s1847_s1 + $0x260] sm:$0xff]  ;;  %v1148_v38 = vpack.c.bf16 %v871_v33, %v868_v31  ;;  %v1120_v39 = vpack.c.bf16 %v869_v35, %v866_v34  ;;  %v874_v40 = vld [vmem:[%s1847_s1 + $0x250] sm:$0xff] }
   0xe   : > { %1144 = vmatprep.subr.bf16.mxu1 %v1309_v3  ;;  %1115 = vmatprep.subr.bf16.mxu0 %v1114_v23  ;;  %s846_s19 = sshll.u32 %s1852_s13, 2  ;;  %v1122_v41 = vpack.c.bf16 %v876_v37, %v873_v36  ;;  %v877_v42 = vld [vmem:[%s1847_s1 + $0x268] sm:$0xff]  ;;  %v872_v43 = vld [vmem:[%s1847_s1 + $0x240] sm:$0xff]  ;;  %v875_v44 = vld [vmem:[%s1847_s1 + $0x258] sm:$0xff] }
   0xf   : > { %v879_v45 = vld [vmem:[%s1847_s1 + $0x278] sm:$0xff]  ;;  %v882_v46 = vld [vmem:[%s1847_s1 + $0x290] sm:$0xff]  ;;  %s161_s5 = scalar_lea.vmem %s1846_s0, %s846_s19  ;;  %v1151_v47 = vpack.c.bf16 %v877_v42, %v874_v40  ;;  %v1124_v48 = vpack.c.bf16 %v875_v44, %v872_v43  ;;  %v880_v49 = vld [vmem:[%s1847_s1 + $0x280] sm:$0xff]  ;;  %s165_s21 = scalar_lea.vmem %s1849_s3, %s846_s19 }
  0x10   : > { %v1126_v50 = vpack.c.bf16 %v882_v46, %v879_v45  ;;  %v883_v51 = vld [vmem:[%s1847_s1 + $0x298] sm:$0xff]  ;;  %v878_v52 = vld [vmem:[%s1847_s1 + $0x270] sm:$0xff]  ;;  %v881_v53 = vld [vmem:[%s1847_s1 + $0x288] sm:$0xff] }
  0x11   : > { %1146 = vmatpush3.bf16.msra.mxu1 %v1145_v29  ;;  %1117 = vmatpush1.bf16.msra.mxu0 %v1116_v30  ;;  %v885_v54 = vld [vmem:[%s1847_s1 + $0x2a8] sm:$0xff]  ;;  %v888_v55 = vld [vmem:[%s1847_s1 + $0x2c0] sm:$0xff]  ;;  %v1154_v57 = vpack.c.bf16 %v883_v51, %v880_v49  ;;  %v1128_v58 = vpack.c.bf16 %v881_v53, %v878_v52  ;;  %v886_v59 = vld [vmem:[%s1847_s1 + $0x2b0] sm:$0xff] }
  0x12   : > { %1147 = vmatprep.subr.bf16.mxu1 %v1309_v3  ;;  %1119 = vmatprep.subr.bf16.mxu0 %v1118_v32  ;;  %v166_v56 = vld [vmem:[%s161_s5] sm:$0xf]  ;;  %v1130_v60 = vpack.c.bf16 %v888_v55, %v885_v54  ;;  %v889_v61 = vld [vmem:[%s1847_s1 + $0x2c8] sm:$0xff]  ;;  %v887_v63 = vld [vmem:[%s1847_s1 + $0x2b8] sm:$0xff] }
  0x13   : > { %v884_v62 = vld [vmem:[%s1847_s1 + $0x2a0] sm:$0xff]  ;;  %v168_v0 = vrot.slane %v166_v56, 7  ;;  %v891_v1 = vld [vmem:[%s1847_s1 + $0x2d8] sm:$0xff]  ;;  %v894_v2 = vld [vmem:[%s1847_s1 + $0x2f0] sm:$0xff]  ;;  %v1157_v4 = vpack.c.bf16 %v889_v61, %v886_v59 }
  0x14   : > { %v1132_v5 = vpack.c.bf16 %v887_v63, %v884_v62  ;;  %v892_v6 = vld [vmem:[%s1847_s1 + $0x2e0] sm:$0xff]  ;;  %v1134_v7 = vpack.c.bf16 %v894_v2, %v891_v1  ;;  %v895_v9 = vld [vmem:[%s1847_s1 + $0x2f8] sm:$0xff]  ;;  %v890_v10 = vld [vmem:[%s1847_s1 + $0x2d0] sm:$0xff] }
  0x15   : > { %1149 = vmatpush3.bf16.msra.mxu1 %v1148_v38  ;;  %1121 = vmatpush1.bf16.msra.mxu0 %v1120_v39  ;;  %v893_v11 = vld [vmem:[%s1847_s1 + $0x2e8] sm:$0xff]  ;;  %v1512_v12 = vsel %vm170_vm1, 0.0, %v168_v0  ;;  %v178_v14 = vld [vmem:[%s1847_s1 + $0x20] sm:$0xff]  ;;  %v1160_v15 = vpack.c.bf16 %v895_v9, %v892_v6  ;;  %v176_v18 = vld [vmem:[%s1847_s1 + $0x10] sm:$0xff] }
  0x16   : > { %1150 = vmatprep.subr.bf16.mxu1 %v1309_v3  ;;  %1123 = vmatprep.subr.bf16.mxu0 %v1122_v41  ;;  %v175_v13 = vld [vmem:[%s1847_s1 + $0x8] sm:$0xff]  ;;  %v1136_v16 = vpack.c.bf16 %v893_v11, %v890_v10  ;;  %v1522_v17 = vsel %vm172_vm2, %v1512_v12, 0.0  ;;  %v174_v21 = vld [vmem:[%s1847_s1] sm:$0xff]  ;;  %v177_v22 = vld [vmem:[%s1847_s1 + $0x18] sm:$0xff] }
  0x17   : > { %v1162_v19 = vpack.c.bf16 %v178_v14, %v175_v13  ;;  %v179_v20 = vld [vmem:[%s1847_s1 + $0x28] sm:$0xff]  ;;  %v181_v23 = vld [vmem:[%s1847_s1 + $0x38] sm:$0xff]  ;;  %v184_v24 = vld [vmem:[%s1847_s1 + $0x50] sm:$0xff]  ;;  %v272_v25 = vrot.slane %v1522_v17, 1  ;;  %v1164_v27 = vpack.c.bf16 %v177_v22, %v174_v21 }
  0x18   : > { %v1195_v26 = vpack.c.bf16 %v179_v20, %v176_v18  ;;  %v182_v28 = vld [vmem:[%s1847_s1 + $0x40] sm:$0xff]  ;;  %v1166_v29 = vpack.c.bf16 %v184_v24, %v181_v23  ;;  %v185_v30 = vld [vmem:[%s1847_s1 + $0x58] sm:$0xff]  ;;  %v180_v31 = vld [vmem:[%s1847_s1 + $0x30] sm:$0xff] }
  0x19   : > { %1152 = vmatpush3.bf16.msra.mxu1 %v1151_v47  ;;  %1125 = vmatpush1.bf16.msra.mxu0 %v1124_v48  ;;  %v183_v32 = vld [vmem:[%s1847_s1 + $0x48] sm:$0xff]  ;;  %v190_v34 = vld [vmem:[%s1847_s1 + $0x80] sm:$0xff]  ;;  %v1198_v35 = vpack.c.bf16 %v185_v30, %v182_v28  ;;  %v188_v37 = vld [vmem:[%s1847_s1 + $0x70] sm:$0xff] }
  0x1a   : > { %1153 = vmatprep.subr.bf16.mxu1 %v1309_v3  ;;  %1127 = vmatprep.subr.bf16.mxu0 %v1126_v50  ;;  %v187_v33 = vld [vmem:[%s1847_s1 + $0x68] sm:$0xff]  ;;  %v1168_v36 = vpack.c.bf16 %v183_v32, %v180_v31  ;;  %v186_v40 = vld [vmem:[%s1847_s1 + $0x60] sm:$0xff]  ;;  %v189_v41 = vld [vmem:[%s1847_s1 + $0x78] sm:$0xff] }
  0x1b   : > { %v1170_v38 = vpack.c.bf16 %v190_v34, %v187_v33  ;;  %v191_v39 = vld [vmem:[%s1847_s1 + $0x88] sm:$0xff]  ;;  %v193_v42 = vld [vmem:[%s1847_s1 + $0x98] sm:$0xff]  ;;  %v196_v43 = vld [vmem:[%s1847_s1 + $0xb0] sm:$0xff]  ;;  %v1172_v45 = vpack.c.bf16 %v189_v41, %v186_v40 }
  0x1c   : > { %v1201_v44 = vpack.c.bf16 %v191_v39, %v188_v37  ;;  %v194_v46 = vld [vmem:[%s1847_s1 + $0xa0] sm:$0xff]  ;;  %v1174_v47 = vpack.c.bf16 %v196_v43, %v193_v42  ;;  %v197_v48 = vld [vmem:[%s1847_s1 + $0xb8] sm:$0xff]  ;;  %v192_v49 = vld [vmem:[%s1847_s1 + $0x90] sm:$0xff] }
  0x1d   : > { %1155 = vmatpush3.bf16.msra.mxu1 %v1154_v57  ;;  %1129 = vmatpush1.bf16.msra.mxu0 %v1128_v58  ;;  %v195_v50 = vld [vmem:[%s1847_s1 + $0xa8] sm:$0xff]  ;;  %v202_v52 = vld [vmem:[%s1847_s1 + $0xe0] sm:$0xff]  ;;  %v1204_v53 = vpack.c.bf16 %v197_v48, %v194_v46  ;;  %v200_v55 = vld [vmem:[%s1847_s1 + $0xd0] sm:$0xff] }
  0x1e   : > { %1156 = vmatprep.subr.bf16.mxu1 %v1309_v3  ;;  %1131 = vmatprep.subr.bf16.mxu0 %v1130_v60  ;;  %v199_v51 = vld [vmem:[%s1847_s1 + $0xc8] sm:$0xff]  ;;  %v1176_v54 = vpack.c.bf16 %v195_v50, %v192_v49  ;;  %v198_v58 = vld [vmem:[%s1847_s1 + $0xc0] sm:$0xff]  ;;  %v201_v59 = vld [vmem:[%s1847_s1 + $0xd8] sm:$0xff] }
  0x1f   : > { %v1178_v56 = vpack.c.bf16 %v202_v52, %v199_v51  ;;  %v203_v57 = vld [vmem:[%s1847_s1 + $0xe8] sm:$0xff]  ;;  %v205_v60 = vld [vmem:[%s1847_s1 + $0xf8] sm:$0xff]  ;;  %v208_v61 = vld [vmem:[%s1847_s1 + $0x110] sm:$0xff]  ;;  %v1180_v63 = vpack.c.bf16 %v201_v59, %v198_v58 }
  0x20   : > { %v1207_v62 = vpack.c.bf16 %v203_v57, %v200_v55  ;;  %v206_v0 = vld [vmem:[%s1847_s1 + $0x100] sm:$0xff]  ;;  %v1182_v1 = vpack.c.bf16 %v208_v61, %v205_v60  ;;  %v209_v2 = vld [vmem:[%s1847_s1 + $0x118] sm:$0xff]  ;;  %v211_v6 = vld [vmem:[%s1847_s1 + $0x128] sm:$0xff] }
  0x21   : > { %1158 = vmatpush3.bf16.msra.mxu1 %v1157_v4  ;;  %1133 = vmatpush1.bf16.msra.mxu0 %v1132_v5  ;;  %v204_v4 = vld [vmem:[%s1847_s1 + $0xf0] sm:$0xff]  ;;  %v207_v5 = vld [vmem:[%s1847_s1 + $0x108] sm:$0xff]  ;;  %v1210_v9 = vpack.c.bf16 %v209_v2, %v206_v0  ;;  %v217_v18 = vld [vmem:[%s1847_s1 + $0x158] sm:$0xff] }
  0x22   : > { %1159 = vmatprep.subr.bf16.mxu1 %v1309_v3  ;;  %1135 = vmatprep.subr.bf16.mxu0 %v1134_v7  ;;  %v214_v7 = vld [vmem:[%s1847_s1 + $0x140] sm:$0xff]  ;;  %v1184_v10 = vpack.c.bf16 %v207_v5, %v204_v4  ;;  %v212_v11 = vld [vmem:[%s1847_s1 + $0x130] sm:$0xff]  ;;  %v215_v14 = vld [vmem:[%s1847_s1 + $0x148] sm:$0xff] }
  0x23   : > { %v1186_v13 = vpack.c.bf16 %v214_v7, %v211_v6  ;;  %v1213_v20 = vpack.c.bf16 %v215_v14, %v212_v11  ;;  %v218_v22 = vld [vmem:[%s1847_s1 + $0x160] sm:$0xff]  ;;  %v221_v24 = vld [vmem:[%s1847_s1 + $0x178] sm:$0xff]  ;;  %v900_v31 = vld [vmem:[%s1847_s1 + $0x310] sm:$0xff] }
  0x24   : > { %v902_v28 = vld [vmem:[%s1847_s1 + $0x320] sm:$0xff]  ;;  %v903_v33 = vld [vmem:[%s1847_s1 + $0x328] sm:$0xff]  ;;  %v908_v37 = vld [vmem:[%s1847_s1 + $0x350] sm:$0xff] }
  0x25   : > { %1161 = vmatpush3.bf16.msra.mxu1 %v1160_v15  ;;  %1137 = vmatpush1.bf16.msra.mxu0 %v1136_v16  ;;  %v210_v15 = vld [vmem:[%s1847_s1 + $0x120] sm:$0xff]  ;;  %v213_v16 = vld [vmem:[%s1847_s1 + $0x138] sm:$0xff]  ;;  %v904_v43 = vld [vmem:[%s1847_s1 + $0x330] sm:$0xff] }
  0x26   : > { %1194 = vmatprep.subr.bf16.mxu1 %v1309_v3  ;;  %1163 = vmatprep.subr.bf16.mxu0 %v1162_v19  ;;  %v220_v19 = vld [vmem:[%s1847_s1 + $0x170] sm:$0xff]  ;;  %v1188_v21 = vpack.c.bf16 %v213_v16, %v210_v15  ;;  %v898_v34 = vld [vmem:[%s1847_s1 + $0x300] sm:$0xff]  ;;  %v909_v42 = vld [vmem:[%s1847_s1 + $0x358] sm:$0xff] }
  0x27   : > { %v1190_v23 = vpack.c.bf16 %v220_v19, %v217_v18  ;;  %v906_v40 = vld [vmem:[%s1847_s1 + $0x340] sm:$0xff]  ;;  %v912_v49 = vld [vmem:[%s1847_s1 + $0x370] sm:$0xff]  ;;  %v915_v51 = vld [vmem:[%s1847_s1 + $0x388] sm:$0xff] }
  0x28   : > { %1034 = vmatmul.mubr.f32.vlgmr.msra.gmra.mrb[0].mxu1 %v272_v25  ;;  %339 = vmatmul.mubr.f32.vlgmr.msra.gmra.mrb[0].mxu0 %v272_v25  ;;  %v216_v25 = vld [vmem:[%s1847_s1 + $0x150] sm:$0xff]  ;;  %v914_v46 = vld [vmem:[%s1847_s1 + $0x380] sm:$0xff]  ;;  %v913_v52 = vld [vmem:[%s1847_s1 + $0x378] sm:$0xff]  ;;  %v1257_v55 = vpack.c.bf16 %v915_v51, %v912_v49 }
  0x29   : > { %1196 = vmatpush3.bf16.msra.mxu1 %v1195_v26  ;;  %1165 = vmatpush1.bf16.msra.mxu0 %v1164_v27  ;;  %v219_v26 = vld [vmem:[%s1847_s1 + $0x168] sm:$0xff]  ;;  %v918_v57 = vld [vmem:[%s1847_s1 + $0x3a0] sm:$0xff]  ;;  %v921_v59 = vld [vmem:[%s1847_s1 + $0x3b8] sm:$0xff] }
  0x2a   : > { %1197 = vmatprep.subr.bf16.mxu1 %v1309_v3  ;;  %1167 = vmatprep.subr.bf16.mxu0 %v1166_v29  ;;  %v899_v27 = vld [vmem:[%s1847_s1 + $0x308] sm:$0xff]  ;;  %v1216_v29 = vpack.c.bf16 %v221_v24, %v218_v22  ;;  %v1192_v30 = vpack.c.bf16 %v219_v26, %v216_v25  ;;  %v922_v5 = vld [vmem:[%s1847_s1 + $0x3c0] sm:$0xff]  ;;  %v925_v6 = vld [vmem:[%s1847_s1 + $0x3d8] sm:$0xff] }
  0x2b   : > { %1068 = vmatprep.mubr.msk.f32.mxu1 %vm1310_vm0, %v1311_v8  ;;  %479 = vmatprep.mubr.f32.mxu0 %v1311_v8  ;;  %v1218_v32 = vpack.c.bf16 %v902_v28, %v899_v27  ;;  %v919_v60 = vld [vmem:[%s1847_s1 + $0x3a8] sm:$0xff]  ;;  %v929_v7 = vld [vmem:[%s1847_s1 + $0x3f8] sm:$0xff]  ;;  %v1236_v11 = vpack.c.bf16 %v925_v6, %v922_v5  ;;  %v928_v16 = vld [vmem:[%s1847_s1 + $0x3f0] sm:$0xff] }
  0x2c   : > { %v923_v61 = vld [vmem:[%s1847_s1 + $0x3c8] sm:$0xff]  ;;  %v933_v15 = vld [vmem:[%s1847_s1 + $0x418] sm:$0xff]  ;;  %v934_v26 = vld [vmem:[%s1847_s1 + $0x420] sm:$0xff] }
  0x2d   : > { %1199 = vmatpush3.bf16.msra.mxu1 %v1198_v35  ;;  %1169 = vmatpush1.bf16.msra.mxu0 %v1168_v36  ;;  %v901_v35 = vld [vmem:[%s1847_s1 + $0x318] sm:$0xff]  ;;  %v927_v4 = vld [vmem:[%s1847_s1 + $0x3e8] sm:$0xff] }
  0x2e   : > { %1200 = vmatprep.subr.bf16.mxu1 %v1309_v3  ;;  %1171 = vmatprep.subr.bf16.mxu0 %v1170_v38  ;;  %v905_v36 = vld [vmem:[%s1847_s1 + $0x338] sm:$0xff]  ;;  %v1251_v38 = vpack.c.bf16 %v903_v33, %v900_v31  ;;  %v1220_v39 = vpack.c.bf16 %v901_v35, %v898_v34  ;;  %v931_v18 = vld [vmem:[%s1847_s1 + $0x408] sm:$0xff]  ;;  %v940_v35 = vld [vmem:[%s1847_s1 + $0x450] sm:$0xff] }
  0x2f   : > { %v1222_v41 = vpack.c.bf16 %v908_v37, %v905_v36  ;;  %v935_v19 = vld [vmem:[%s1847_s1 + $0x428] sm:$0xff]  ;;  %v1240_v22 = vpack.c.bf16 %v931_v18, %v928_v16  ;;  %v937_v27 = vld [vmem:[%s1847_s1 + $0x438] sm:$0xff] }
  0x30   : > { %v939_v25 = vld [vmem:[%s1847_s1 + $0x448] sm:$0xff]  ;;  %v941_v28 = vld [vmem:[%s1847_s1 + $0x458] sm:$0xff]  ;;  %v1244_v31 = vpack.c.bf16 %v937_v27, %v934_v26 }
  0x31   : > { %1202 = vmatpush3.bf16.msra.mxu1 %v1201_v44  ;;  %1173 = vmatpush1.bf16.msra.mxu0 %v1172_v45  ;;  %v907_v44 = vld [vmem:[%s1847_s1 + $0x348] sm:$0xff]  ;;  %v945_v34 = vld [vmem:[%s1847_s1 + $0x478] sm:$0xff] }
  0x32   : > { %1203 = vmatprep.subr.bf16.mxu1 %v1309_v3  ;;  %1175 = vmatprep.subr.bf16.mxu0 %v1174_v47  ;;  %v911_v45 = vld [vmem:[%s1847_s1 + $0x368] sm:$0xff]  ;;  %v1254_v47 = vpack.c.bf16 %v909_v42, %v906_v40  ;;  %v1224_v48 = vpack.c.bf16 %v907_v44, %v904_v43 }
  0x33   : > { %v1226_v50 = vpack.c.bf16 %v914_v46, %v911_v45  ;;  %v943_v36 = vld [vmem:[%s1847_s1 + $0x468] sm:$0xff]  ;;  %v753_v45 = vlaneseq }
  0x35   : > { %1205 = vmatpush3.bf16.msra.mxu1 %v1204_v53  ;;  %1177 = vmatpush1.bf16.msra.mxu0 %v1176_v54  ;;  %v917_v53 = vld [vmem:[%s1847_s1 + $0x398] sm:$0xff]  ;;  %v920_v54 = vld [vmem:[%s1847_s1 + $0x3b0] sm:$0xff]  ;;  %v754_v46 = vshrl.u32 %v753_v45, 7 }
  0x36   : > { %1206 = vmatprep.subr.bf16.mxu1 %v1309_v3  ;;  %1179 = vmatprep.subr.bf16.mxu0 %v1178_v56  ;;  %v1230_v58 = vpack.c.bf16 %v920_v54, %v917_v53 }
  0x37   : > { %v759_v49 = vsub.s32 1, %v754_v46 }
  0x39   : > { %1208 = vmatpush3.bf16.msra.mxu1 %v1207_v62  ;;  %1181 = vmatpush1.bf16.msra.mxu0 %v1180_v63  ;;  %v926_v62 = vld [vmem:[%s1847_s1 + $0x3e0] sm:$0xff]  ;;  %v1260_v63 = vpack.c.bf16 %v921_v59, %v918_v57 }
  0x3a   : > { %1209 = vmatprep.subr.bf16.mxu1 %v1309_v3  ;;  %1183 = vmatprep.subr.bf16.mxu0 %v1182_v1  ;;  %v924_v1 = vld [vmem:[%s1847_s1 + $0x3d0] sm:$0xff]  ;;  %v1234_v2 = vpack.c.bf16 %v926_v62, %v923_v61 }
  0x3d   : > { %1211 = vmatpush3.bf16.msra.mxu1 %v1210_v9  ;;  %1185 = vmatpush1.bf16.msra.mxu0 %v1184_v10  ;;  %v932_v9 = vld [vmem:[%s1847_s1 + $0x410] sm:$0xff]  ;;  %v1263_v10 = vpack.c.bf16 %v927_v4, %v924_v1 }
  0x3e   : > { %1212 = vmatprep.subr.bf16.mxu1 %v1309_v3  ;;  %1187 = vmatprep.subr.bf16.mxu0 %v1186_v13  ;;  %v930_v13 = vld [vmem:[%s1847_s1 + $0x400] sm:$0xff]  ;;  %v1238_v14 = vpack.c.bf16 %v932_v9, %v929_v7 }
  0x41   : > { %1214 = vmatpush3.bf16.msra.mxu1 %v1213_v20  ;;  %1189 = vmatpush1.bf16.msra.mxu0 %v1188_v21  ;;  %v938_v20 = vld [vmem:[%s1847_s1 + $0x440] sm:$0xff]  ;;  %v1266_v21 = vpack.c.bf16 %v933_v15, %v930_v13 }
  0x42   : > { %1215 = vmatprep.subr.bf16.mxu1 %v1309_v3  ;;  %1191 = vmatprep.subr.bf16.mxu0 %v1190_v23  ;;  %v936_v23 = vld [vmem:[%s1847_s1 + $0x430] sm:$0xff]  ;;  %v1242_v24 = vpack.c.bf16 %v938_v20, %v935_v19 }
  0x45   : > { %1217 = vmatpush3.bf16.msra.mxu1 %v1216_v29  ;;  %1193 = vmatpush1.bf16.msra.mxu0 %v1192_v30  ;;  %v944_v29 = vld [vmem:[%s1847_s1 + $0x470] sm:$0xff]  ;;  %v1269_v30 = vpack.c.bf16 %v939_v25, %v936_v23 }
  0x46   : > { %1250 = vmatprep.subr.bf16.mxu1 %v1309_v3  ;;  %1219 = vmatprep.subr.bf16.mxu0 %v1218_v32  ;;  %v942_v32 = vld [vmem:[%s1847_s1 + $0x460] sm:$0xff]  ;;  %v1246_v33 = vpack.c.bf16 %v944_v29, %v941_v28 }
  0x47   : > { %v1272_v37 = vpack.c.bf16 %v945_v34, %v942_v32 }
  0x48   : > { %1069 = vmatmul.mubr.msk.f32.vlgmr.msra.gmra.mrb[2].mxu1 %vm172_vm2, %v1512_v12  ;;  %896 = vmatmul.mubr.msk.f32.vlgmr.msra.gmra.mrb[0].mxu0 %vm172_vm2, %v1512_v12  ;;  %v910_v12 = vld [vmem:[%s1847_s1 + $0x360] sm:$0xff] }
  0x49   : > { %1252 = vmatpush3.bf16.msra.mxu1 %v1251_v38  ;;  %1221 = vmatpush1.bf16.msra.mxu0 %v1220_v39  ;;  %v1228_v56 = vpack.c.bf16 %v913_v52, %v910_v12  ;;  %v1248_v38 = vpack.c.bf16 %v943_v36, %v940_v35  ;;  %v605_v39 = vrot.slane %v1522_v17, 2 }
  0x4a   : > { %1253 = vmatprep.subr.bf16.mxu1 %v1309_v3  ;;  %1223 = vmatprep.subr.bf16.mxu0 %v1222_v41 }
  0x4b   : > { %1103 = vmatprep.mubr.msk.f32.mxu1 %vm1310_vm0, %v1311_v8  ;;  %671 = vmatprep.mubr.f32.mxu0 %v1311_v8  ;;  %v916_v8 = vld [vmem:[%s1847_s1 + $0x390] sm:$0xff] }
  0x4c   : > { %v1232_v0 = vpack.c.bf16 %v919_v60, %v916_v8 }
  0x4d   : > { %1255 = vmatpush3.bf16.msra.mxu1 %v1254_v47  ;;  %1225 = vmatpush1.bf16.msra.mxu0 %v1224_v48  ;;  %v755_v47 = vsub.s32 0, %v754_v46  ;;  %v751_v48 = vld [vmem:[%s1848_s2] sm:$0x7] }
  0x4e   : > { %1256 = vmatprep.subr.bf16.mxu1 %v1309_v3  ;;  %1227 = vmatprep.subr.bf16.mxu0 %v1226_v50  ;;  %v760_v54 = vrot.slane %v751_v48, %v759_v49 }
  0x51   : > { %1258 = vmatpush3.bf16.msra.mxu1 %v1257_v55  ;;  %1229 = vmatpush1.bf16.msra.mxu0 %v1228_v56  ;;  %v763_v56 = vsub.s32 2, %v754_v46 }
  0x52   : > { %1259 = vmatprep.subr.bf16.mxu1 %v1309_v3  ;;  %1231 = vmatprep.subr.bf16.mxu0 %v1230_v58 }
  0x53   : > { %v764_v58 = vrot.slane %v751_v48, %v763_v56 }
  0x55   : > { %1261 = vmatpush3.bf16.msra.mxu1 %v1260_v63  ;;  %1233 = vmatpush1.bf16.msra.mxu0 %v1232_v0 }
  0x56   : > { %1262 = vmatprep.subr.bf16.mxu1 %v1309_v3  ;;  %1235 = vmatprep.subr.bf16.mxu0 %v1234_v2 }
  0x59   : > { %1264 = vmatpush3.bf16.msra.mxu1 %v1263_v10  ;;  %1237 = vmatpush1.bf16.msra.mxu0 %v1236_v11 }
  0x5a   : > { %1265 = vmatprep.subr.bf16.mxu1 %v1309_v3  ;;  %1239 = vmatprep.subr.bf16.mxu0 %v1238_v14 }
  0x5d   : > { %1267 = vmatpush3.bf16.msra.mxu1 %v1266_v21  ;;  %1241 = vmatpush1.bf16.msra.mxu0 %v1240_v22 }
  0x5e   : > { %1268 = vmatprep.subr.bf16.mxu1 %v1309_v3  ;;  %1243 = vmatprep.subr.bf16.mxu0 %v1242_v24 }
  0x61   : > { %1270 = vmatpush3.bf16.msra.mxu1 %v1269_v30  ;;  %1245 = vmatpush1.bf16.msra.mxu0 %v1244_v31 }
  0x62   : > { %1271 = vmatprep.subr.bf16.mxu1 %v1309_v3  ;;  %1247 = vmatprep.subr.bf16.mxu0 %v1246_v33  ;;  %v756_v3 = vrot.slane %v751_v48, %v755_v47 }
  0x65   : > { %1273 = vmatpush3.bf16.msra.mxu1 %v1272_v37  ;;  %1249 = vmatpush1.bf16.msra.mxu0 %v1248_v38 }
  0x68   : > { %1104 = vmatmul.mubr.f32.vlgmr.msra.gmra.mrb[4].mxu1 %v605_v39  ;;  %672 = vmatmul.mubr.f32.vlgmr.msra.gmra.mrb[0].mxu0 %v605_v39 }
  0xfb   : > { %v411_v40 = vpop.f32.mrb[0].mxu1 }
  0xfc   : > { %v1035_v41 = vpop.f32.mrb[1].mxu1 }
 0x11b   : > { %v552_v42 = vpop.f32.mrb[2].mxu1 }
 0x11c   : > { %v553_v43 = vadd.f32 %v552_v42, %v411_v40  ;;  %v1070_v44 = vpop.f32.mrb[3].mxu1 }
 0x13b   : > { %v744_v50 = vpop.f32.mrb[4].mxu1  ;;  %v673_v17 = vpop.f32.mrb[0].mxu0 }
 0x13c   : > { %v750_v51 = vadd.f32 %v744_v50, %v553_v43  ;;  %v768_v12 = vadd.f32 %v756_v3, %v673_v17  ;;  %v675_v52 = vpop.f32.mrb[1].mxu0  ;;  %v1105_v53 = vpop.f32.mrb[5].mxu1 }
 0x13d   : > { %v769_v57 = vadd.f32 %v760_v54, %v675_v52 }
 0x13e   : > { %v946_v55 = vmul.f32 -1.442695, %v768_v12  ;;  %v770_v8 = vadd.f32 %v764_v58, %v750_v51 }
 0x13f   : > { %v947_v59 = vmul.f32 -1.442695, %v769_v57 }
 0x140   : > { %1289 = vpow2.f32 %v946_v55 }
 0x141   : > { %1291 = vpow2.f32 %v947_v59 }
 0x142   : > { %1293 = vtanh.f32 %v770_v8 }
 0x14a   : > { %v1290_v60 = vpop.eup %1289 }
 0x14b   : > { %v774_v61 = vadd.f32 1.0, %v1290_v60  ;;  %v1292_v62 = vpop.eup %1291 }
 0x14c   : > { %v780_v63 = vadd.f32 1.0, %v1292_v62  ;;  %v1294_v0 = vpop.eup %1293 }
 0x14d   : > { %1295 = vrcp.f32 %v774_v61 }
 0x14e   : > { %1297 = vrcp.f32 %v780_v63 }
 0x157   : > { %v1296_v1 = vpop.eup %1295 }
 0x158   : > { %v784_v2 = vmul.f32 %v1296_v1, %v1294_v0  ;;  %v1298_v4 = vpop.eup %1297 }
 0x15a   : > { %1299 = vtanh.f32 %v784_v2 }
 0x164   : > { %v1300_v5 = vpop.eup %1299 }
 0x165   : > { %v786_v6 = vmul.f32 %v1300_v5, %v1298_v4 }
 0x167   : > { %787 = vst [vmem:[%s165_s21] sm:$0xf] %v786_v6 }
 0x168 PF: > { %s13_s12 = sadd.s32 1, %s1307_s12  }
 0x169   : > { %p10_p4 = scmp.ge.s32.totalorder %s13_s12, 4  }
 0x16b   :  { %12 = sbr.rel (!%p10_p4) target bundleno = 1 (0x1), region = 64 }

// kernel: _lambda_.18
= control target key start
LH: loop header
LB: loop body
LE: loop exit
PB: predicated region body
PF: predicated region fallthrough
CT: control target
= control target key end

     0   :  { %s880_s15 = smov 0   ;;  %s1088_s0 = inlined_call_operand.vmem [shape: f32[2,4,128], index: 0, kind: input, shape index: {}]   ;;  %s1089_s1 = inlined_call_operand.vmem [shape: f32[3,128,128], index: 1, kind: input, shape index: {}]   ;;  %s1090_s2 = inlined_call_operand.vmem [shape: f32[1,128], index: 2, kind: input, shape index: {}]   ;;  %s1091_s3 = inlined_call_operand.vmem [shape: f32[2,4,128], index: 3, kind: input, shape index: {}]   ;;  %s1092_s4 = inlined_call_operand.vmem [shape: f32[2,4,128], index: 4, kind: output, shape index: {}]  }
   0x1 LB: > { %s561_s16 = sadd.s32 4294967295, %s850_s15   ;;  %p565_p0 = scmp.ge.s32.totalorder %s850_s15, 1  ;;  %s850_s15 = sphi %s880_s15, %s14_s15  }
   0x2   : > { %p170_p1 = scmp.lt.s32.totalorder %s850_s15, 3 }
   0x4   : > { %p171_p2 = pnand %p565_p0, %p170_p1 }
   0x5   : > { %v569_v0 = vld [vmem:[%s1089_s1 + $0x80] sm:$0xff] (!%p171_p2)  ;;  %v570_v1 = vld [vmem:[%s1089_s1 + $0x88] sm:$0xff] (!%p171_p2)  ;;  %v852_v3 = vmov (!%p171_p2), 0.0|0.0   ;;  %v571_v6 = vld [vmem:[%s1089_s1 + $0x90] sm:$0xff] (!%p171_p2)  ;;  %vm853_vm0 = vmmov (!%p171_p2), 0   ;;  %v854_v11 = vmov (!%p171_p2), 0.0  }
   0x6   : > { %174 = sbr.rel (%p171_p2) target bundleno = 292 (0x124), region = 36  ;;  %v218_v2 = vld [vmem:[%s1089_s1] sm:$0xff] (!%p171_p2)  ;;  %761 = vmatprep.subr.bf16.mxu0 (!%p171_p2), %v852_v3  ;;  %v762_v4 = vpack.c.bf16 (!%p171_p2), %v570_v1, %v569_v0  ;;  %785 = vmatprep.subr.bf16.mxu1 (!%p171_p2), %v852_v3  ;;  %v219_v5 = vld [vmem:[%s1089_s1 + $0x8] sm:$0xff] (!%p171_p2)  ;;  %v572_v7 = vld [vmem:[%s1089_s1 + $0x98] sm:$0xff] (!%p171_p2)  ;;  %p198_p3 = scmp.lt.s32.totalorder (!%p171_p2), %s561_s16, 1  ;;  %vm214_vm1 = vcmask (!%p171_p2), 1040384  }
   0x7   : > { %v786_v8 = vpack.c.bf16 (!%p171_p2), %v219_v5, %v218_v2  ;;  %v220_v9 = vld [vmem:[%s1089_s1 + $0x10] sm:$0xff] (!%p171_p2)  ;;  %v221_v10 = vld [vmem:[%s1089_s1 + $0x18] sm:$0xff] (!%p171_p2)  ;;  %688 = vmatprep.mubr.msk.f32.mxu0 (!%p171_p2), %vm853_vm0, %v854_v11  ;;  %723 = vmatprep.mubr.msk.f32.mxu1 (!%p171_p2), %vm853_vm0, %v854_v11  ;;  %v765_v12 = vpack.c.bf16 (!%p171_p2), %v572_v7, %v571_v6  ;;  %v573_v14 = vld [vmem:[%s1089_s1 + $0xa0] sm:$0xff] (!%p171_p2)  ;;  %vm216_vm2 = vcmask (!%p171_p2), 1044480  }
   0x8   : > { %763 = vmatpush3.bf16.msra.mxu0 (!%p171_p2), %v762_v4  ;;  %v789_v13 = vpack.c.bf16 (!%p171_p2), %v221_v10, %v220_v9  ;;  %v574_v15 = vld [vmem:[%s1089_s1 + $0xa8] sm:$0xff] (!%p171_p2)  ;;  %v222_v16 = vld [vmem:[%s1089_s1 + $0x20] sm:$0xff] (!%p171_p2)  ;;  %v575_v20 = vld [vmem:[%s1089_s1 + $0xb0] sm:$0xff] (!%p171_p2) }
   0x9   : > { %787 = vmatpush3.bf16.msra.mxu1 (!%p171_p2), %v786_v8  ;;  %764 = vmatprep.subr.bf16.mxu0 (!%p171_p2), %v852_v3  ;;  %v223_v17 = vld [vmem:[%s1089_s1 + $0x28] sm:$0xff] (!%p171_p2)  ;;  %v768_v18 = vpack.c.bf16 (!%p171_p2), %v574_v15, %v573_v14  ;;  %v576_v21 = vld [vmem:[%s1089_s1 + $0xb8] sm:$0xff] (!%p171_p2)  ;;  %v224_v22 = vld [vmem:[%s1089_s1 + $0x30] sm:$0xff] (!%p171_p2) }
   0xa   : > { %788 = vmatprep.subr.bf16.mxu1 (!%p171_p2), %v852_v3  ;;  %v792_v19 = vpack.c.bf16 (!%p171_p2), %v223_v17, %v222_v16  ;;  %v225_v23 = vld [vmem:[%s1089_s1 + $0x38] sm:$0xff] (!%p171_p2)  ;;  %v771_v24 = vpack.c.bf16 (!%p171_p2), %v576_v21, %v575_v20  ;;  %v577_v26 = vld [vmem:[%s1089_s1 + $0xc0] sm:$0xff] (!%p171_p2)  ;;  %v578_v27 = vld [vmem:[%s1089_s1 + $0xc8] sm:$0xff] (!%p171_p2) }
   0xb   : > { %v795_v25 = vpack.c.bf16 (!%p171_p2), %v225_v23, %v224_v22  ;;  %v226_v28 = vld [vmem:[%s1089_s1 + $0x40] sm:$0xff] (!%p171_p2)  ;;  %v227_v29 = vld [vmem:[%s1089_s1 + $0x48] sm:$0xff] (!%p171_p2)  ;;  %v774_v30 = vpack.c.bf16 (!%p171_p2), %v578_v27, %v577_v26  ;;  %v579_v32 = vld [vmem:[%s1089_s1 + $0xd0] sm:$0xff] (!%p171_p2) }
   0xc   : > { %766 = vmatpush3.bf16.msra.mxu0 (!%p171_p2), %v765_v12  ;;  %v798_v31 = vpack.c.bf16 (!%p171_p2), %v227_v29, %v226_v28  ;;  %v580_v33 = vld [vmem:[%s1089_s1 + $0xd8] sm:$0xff] (!%p171_p2)  ;;  %v228_v34 = vld [vmem:[%s1089_s1 + $0x50] sm:$0xff] (!%p171_p2)  ;;  %v581_v39 = vld [vmem:[%s1089_s1 + $0xe0] sm:$0xff] (!%p171_p2) }
   0xd   : > { %s1094_s16 = smov (!%p198_p3, %s561_s16), 1  ;;  %790 = vmatpush3.bf16.msra.mxu1 %v789_v13  ;;  %767 = vmatprep.subr.bf16.mxu0 %v852_v3  ;;  %v229_v35 = vld [vmem:[%s1089_s1 + $0x58] sm:$0xff]  ;;  %v777_v37 = vpack.c.bf16 %v580_v33, %v579_v32  ;;  %v582_v40 = vld [vmem:[%s1089_s1 + $0xe8] sm:$0xff]  ;;  %v230_v42 = vld [vmem:[%s1089_s1 + $0x60] sm:$0xff] }
   0xe   : > { %791 = vmatprep.subr.bf16.mxu1 %v852_v3  ;;  %s950_s25 = sshll.u32 %s1094_s16, 2  ;;  %v801_v38 = vpack.c.bf16 %v229_v35, %v228_v34  ;;  %v231_v43 = vld [vmem:[%s1089_s1 + $0x68] sm:$0xff]  ;;  %v780_v44 = vpack.c.bf16 %v582_v40, %v581_v39  ;;  %v583_v46 = vld [vmem:[%s1089_s1 + $0xf0] sm:$0xff]  ;;  %v584_v47 = vld [vmem:[%s1089_s1 + $0xf8] sm:$0xff] }
   0xf   : > { %s201_s9 = scalar_lea.vmem %s1088_s0, %s950_s25  ;;  %v804_v45 = vpack.c.bf16 %v231_v43, %v230_v42  ;;  %v232_v49 = vld [vmem:[%s1089_s1 + $0x70] sm:$0xff]  ;;  %v233_v50 = vld [vmem:[%s1089_s1 + $0x78] sm:$0xff]  ;;  %v783_v51 = vpack.c.bf16 %v584_v47, %v583_v46  ;;  %v586_v54 = vld [vmem:[%s1089_s1 + $0x100] sm:$0xff]  ;;  %s205_s22 = scalar_lea.vmem %s1091_s3, %s950_s25 }
  0x10   : > { %769 = vmatpush3.bf16.msra.mxu0 %v768_v18  ;;  %v210_v36 = vld [vmem:[%s201_s9] sm:$0xf]  ;;  %v807_v53 = vpack.c.bf16 %v233_v50, %v232_v49  ;;  %v587_v55 = vld [vmem:[%s1089_s1 + $0x108] sm:$0xff]  ;;  %v588_v58 = vld [vmem:[%s1089_s1 + $0x110] sm:$0xff]  ;;  %s209_s28 = scalar_lea.vmem %s1092_s4, %s950_s25 }
  0x11   : > { %793 = vmatpush3.bf16.msra.mxu1 %v792_v19  ;;  %770 = vmatprep.subr.bf16.mxu0 %v852_v3  ;;  %v212_v41 = vrot.slane %v210_v36, 7  ;;  %v810_v57 = vpack.c.bf16 %v587_v55, %v586_v54  ;;  %v589_v59 = vld [vmem:[%s1089_s1 + $0x118] sm:$0xff]  ;;  %v590_v61 = vld [vmem:[%s1089_s1 + $0x120] sm:$0xff]  ;;  %v591_v62 = vld [vmem:[%s1089_s1 + $0x128] sm:$0xff] }
  0x12   : > { %794 = vmatprep.subr.bf16.mxu1 %v852_v3  ;;  %v813_v60 = vpack.c.bf16 %v589_v59, %v588_v58  ;;  %v816_v63 = vpack.c.bf16 %v591_v62, %v590_v61  ;;  %v592_v0 = vld [vmem:[%s1089_s1 + $0x130] sm:$0xff]  ;;  %v593_v1 = vld [vmem:[%s1089_s1 + $0x138] sm:$0xff]  ;;  %v594_v4 = vld [vmem:[%s1089_s1 + $0x140] sm:$0xff] }
  0x13   : > { %v215_v48 = vsel %vm214_vm1, 0.0, %v212_v41  ;;  %v819_v2 = vpack.c.bf16 %v593_v1, %v592_v0  ;;  %v595_v5 = vld [vmem:[%s1089_s1 + $0x148] sm:$0xff]  ;;  %v596_v7 = vld [vmem:[%s1089_s1 + $0x150] sm:$0xff]  ;;  %v597_v8 = vld [vmem:[%s1089_s1 + $0x158] sm:$0xff] }
  0x14   : > { %772 = vmatpush3.bf16.msra.mxu0 %v771_v24  ;;  %v217_v52 = vsel %vm216_vm2, %v215_v48, 0.0  ;;  %v822_v6 = vpack.c.bf16 %v595_v5, %v594_v4  ;;  %v825_v9 = vpack.c.bf16 %v597_v8, %v596_v7  ;;  %v598_v10 = vld [vmem:[%s1089_s1 + $0x160] sm:$0xff]  ;;  %v600_v13 = vld [vmem:[%s1089_s1 + $0x170] sm:$0xff]  ;;  %v601_v14 = vld [vmem:[%s1089_s1 + $0x178] sm:$0xff] }
  0x15   : > { %796 = vmatpush3.bf16.msra.mxu1 %v795_v25  ;;  %773 = vmatprep.subr.bf16.mxu0 %v852_v3  ;;  %v252_v56 = vrot.slane %v217_v52, 1  ;;  %v831_v15 = vpack.c.bf16 %v601_v14, %v600_v13  ;;  %v411_v16 = vrot.slane %v217_v52, 2  ;;  %v602_v23 = vld [vmem:[%s1090_s2] ss:$0 sm:$0xff] }
  0x16   : > { %797 = vmatprep.subr.bf16.mxu1 %v852_v3  ;;  %v492_v25 = vld [vmem:[%s205_s22] sm:$0xf] }
  0x18   : > { %775 = vmatpush3.bf16.msra.mxu0 %v774_v30 }
  0x19   : > { %799 = vmatpush3.bf16.msra.mxu1 %v798_v31  ;;  %776 = vmatprep.subr.bf16.mxu0 %v852_v3 }
  0x1a   : > { %800 = vmatprep.subr.bf16.mxu1 %v852_v3 }
  0x1c   : > { %778 = vmatpush3.bf16.msra.mxu0 %v777_v37 }
  0x1d   : > { %802 = vmatpush3.bf16.msra.mxu1 %v801_v38  ;;  %779 = vmatprep.subr.bf16.mxu0 %v852_v3 }
  0x1e   : > { %803 = vmatprep.subr.bf16.mxu1 %v852_v3 }
  0x20   : > { %781 = vmatpush3.bf16.msra.mxu0 %v780_v44 }
  0x21   : > { %805 = vmatpush3.bf16.msra.mxu1 %v804_v45  ;;  %782 = vmatprep.subr.bf16.mxu0 %v852_v3 }
  0x22   : > { %806 = vmatprep.subr.bf16.mxu1 %v852_v3 }
  0x24   : > { %784 = vmatpush3.bf16.msra.mxu0 %v783_v51 }
  0x25   : > { %808 = vmatpush3.bf16.msra.mxu1 %v807_v53  ;;  %809 = vmatprep.subr.bf16.mxu0 %v852_v3 }
  0x27   : > { %689 = vmatmul.mubr.f32.vlgmr.msra.gmra.mrb[0].mxu0 %v252_v56 }
  0x28   : > { %724 = vmatmul.mubr.msk.f32.vlgmr.msra.gmra.mrb[0].mxu1 %vm216_vm2, %v215_v48  ;;  %811 = vmatpush3.bf16.msra.mxu0 %v810_v57 }
  0x29   : > { %812 = vmatprep.subr.bf16.mxu0 %v852_v3  ;;  %758 = vmatprep.mubr.msk.f32.mxu0 %vm853_vm0, %v854_v11  ;;  %v599_v11 = vld [vmem:[%s1089_s1 + $0x168] sm:$0xff] }
  0x2a   : > { %v828_v12 = vpack.c.bf16 %v599_v11, %v598_v10 }
  0x2c   : > { %814 = vmatpush3.bf16.msra.mxu0 %v813_v60 }
  0x2d   : > { %815 = vmatprep.subr.bf16.mxu0 %v852_v3 }
  0x30   : > { %817 = vmatpush3.bf16.msra.mxu0 %v816_v63 }
  0x31   : > { %818 = vmatprep.subr.bf16.mxu0 %v852_v3 }
  0x34   : > { %820 = vmatpush3.bf16.msra.mxu0 %v819_v2 }
  0x35   : > { %821 = vmatprep.subr.bf16.mxu0 %v852_v3 }
  0x38   : > { %823 = vmatpush3.bf16.msra.mxu0 %v822_v6 }
  0x39   : > { %824 = vmatprep.subr.bf16.mxu0 %v852_v3 }
  0x3c   : > { %826 = vmatpush3.bf16.msra.mxu0 %v825_v9 }
  0x3d   : > { %827 = vmatprep.subr.bf16.mxu0 %v852_v3 }
  0x40   : > { %829 = vmatpush3.bf16.msra.mxu0 %v828_v12 }
  0x41   : > { %830 = vmatprep.subr.bf16.mxu0 %v852_v3 }
  0x44   : > { %832 = vmatpush3.bf16.msra.mxu0 %v831_v15 }
  0x47   : > { %759 = vmatmul.mubr.f32.vlgmr.msra.gmra.mrb[2].mxu0 %v411_v16 }
  0xfa   : > { %v320_v17 = vpop.f32.mrb[0].mxu0 }
  0xfb   : > { %v690_v18 = vpop.f32.mrb[1].mxu0  ;;  %v390_v19 = vpop.f32.mrb[0].mxu1 }
  0xfc   : > { %v391_v20 = vadd.f32 %v390_v19, %v320_v17  ;;  %v725_v21 = vpop.f32.mrb[1].mxu1 }
 0x11a   : > { %v479_v22 = vpop.f32.mrb[2].mxu0 }
 0x11b   : > { %v483_v24 = vadd.f32 %v479_v22, %v391_v20  ;;  %v760_v3 = vpop.f32.mrb[3].mxu0 }
 0x11d   : > { %v491_v26 = vadd.f32 %v602_v23, %v483_v24 }
 0x11f   : > { %v493_v27 = vadd.f32 %v492_v25, %v491_v26 }
 0x121   : > { %v494_v28 = vmax.f32 %v493_v27, 0.0 }
 0x123   : > { %495 = vst [vmem:[%s209_s28] sm:$0xf] %v494_v28 }
 0x124 PF: > { %s14_s15 = sadd.s32 1, %s850_s15  }
 0x125   : > { %p11_p4 = scmp.ge.s32.totalorder %s14_s15, 4  }
 0x127   :  { %13 = sbr.rel (!%p11_p4) target bundleno = 1 (0x1), region = 71 }

// kernel: _lambda_.21
= control target key start
LH: loop header
LB: loop body
LE: loop exit
PB: predicated region body
PF: predicated region fallthrough
CT: control target
= control target key end

     0   :  { %s1010_s18 = smov 0   ;;  %s1216_s0 = inlined_call_operand.vmem [shape: f32[2,4,128], index: 0, kind: input, shape index: {}]   ;;  %s1217_s1 = inlined_call_operand.vmem [shape: f32[2,4,128], index: 1, kind: input, shape index: {}]   ;;  %s1218_s2 = inlined_call_operand.vmem [shape: f32[10,4], index: 2, kind: input, shape index: {}]   ;;  %s1219_s3 = inlined_call_operand.vmem [shape: f32[3,128,128], index: 3, kind: input, shape index: {}]   ;;  %s1220_s4 = inlined_call_operand.vmem [shape: f32[1,128], index: 4, kind: input, shape index: {}]   ;;  %s1221_s5 = inlined_call_operand.vmem [shape: f32[2,8,128], index: 5, kind: output, shape index: {}]  }
   0x1 LB: > { %s676_s19 = sadd.s32 4294967295, %s975_s18   ;;  %p680_p0 = scmp.ge.s32.totalorder %s975_s18, 1  ;;  %s975_s18 = sphi %s1010_s18, %s15_s18  }
   0x2   : > { %p195_p1 = scmp.lt.s32.totalorder %s975_s18, 3 }
   0x4   : > { %p196_p2 = pnand %p680_p0, %p195_p1 }
   0x5   : > { %p225_p3 = scmp.lt.s32.totalorder (!%p196_p2), %s676_s19, 1  ;;  %v240_v0 = vld [vmem:[%s1218_s2] sm:$0xff] (!%p196_p2)  ;;  %vm242_vm0 = vcmask (!%p196_p2), 31744   ;;  %v977_v2 = vmov (!%p196_p2), 0.0|0.0   ;;  %v688_v3 = vld [vmem:[%s1219_s3 + $0x88] sm:$0xff] (!%p196_p2)  ;;  %v689_v5 = vld [vmem:[%s1219_s3 + $0x90] sm:$0xff] (!%p196_p2) }
   0x6   : > { %199 = sbr.rel (%p196_p2) target bundleno = 489 (0x1e9), region = 40  ;;  %778 = vmatprep.mubr.msk.f32.mxu0 (!%p196_p2), %vm242_vm0, %v240_v0  ;;  %v687_v1 = vld [vmem:[%s1219_s3 + $0x80] sm:$0xff] (!%p196_p2)  ;;  %886 = vmatprep.subr.bf16.mxu1 (!%p196_p2), %v977_v2  ;;  %v690_v6 = vld [vmem:[%s1219_s3 + $0x98] sm:$0xff] (!%p196_p2)  ;;  %v329_v8 = vld [vmem:[%s1219_s3 + $0x8] sm:$0xff] (!%p196_p2)  ;;  %vm249_vm1 = vcmask (!%p196_p2), 1043456   ;;  %vm978_vm2 = vmmov (!%p196_p2), 0  }
   0x7   : > { %v887_v4 = vpack.c.bf16 (!%p196_p2), %v688_v3, %v687_v1  ;;  %v328_v7 = vld [vmem:[%s1219_s3] sm:$0xff] (!%p196_p2)  ;;  %v890_v9 = vpack.c.bf16 (!%p196_p2), %v690_v6, %v689_v5  ;;  %v692_v13 = vld [vmem:[%s1219_s3 + $0xa8] sm:$0xff] (!%p196_p2)  ;;  %v330_v17 = vld [vmem:[%s1219_s3 + $0x10] sm:$0xff] (!%p196_p2)  ;;  %v979_v54 = vmov (!%p196_p2), 0.0   ;;  %vm363_vm3 = vcmask (!%p196_p2), 1046528  }
   0x8   : > { %v691_v10 = vld [vmem:[%s1219_s3 + $0xa0] sm:$0xff] (!%p196_p2)  ;;  %v241_v15 = vld [vmem:[%s1218_s2 + $0x8] sm:$0x3] (!%p196_p2)  ;;  %v911_v16 = vpack.c.bf16 (!%p196_p2), %v329_v8, %v328_v7  ;;  %v331_v18 = vld [vmem:[%s1219_s3 + $0x18] sm:$0xff] (!%p196_p2)  ;;  %813 = vmatprep.mubr.msk.f32.mxu1 (!%p196_p2), %vm978_vm2, %v979_v54  ;;  %vm525_vm4 = vcmask (!%p196_p2), 1045504  }
   0x9   : > { %888 = vmatpush3.bf16.msra.mxu1 (!%p196_p2), %v887_v4  ;;  %v893_v19 = vpack.c.bf16 (!%p196_p2), %v692_v13, %v691_v10  ;;  %v693_v20 = vld [vmem:[%s1219_s3 + $0xb0] sm:$0xff] (!%p196_p2)  ;;  %v694_v21 = vld [vmem:[%s1219_s3 + $0xb8] sm:$0xff] (!%p196_p2)  ;;  %v914_v22 = vpack.c.bf16 (!%p196_p2), %v331_v18, %v330_v17  ;;  %v332_v23 = vld [vmem:[%s1219_s3 + $0x20] sm:$0xff] (!%p196_p2) }
   0xa   : > { %889 = vmatprep.subr.bf16.mxu1 (!%p196_p2), %v977_v2  ;;  %v333_v24 = vld [vmem:[%s1219_s3 + $0x28] sm:$0xff] (!%p196_p2)  ;;  %v896_v25 = vpack.c.bf16 (!%p196_p2), %v694_v21, %v693_v20  ;;  %v695_v26 = vld [vmem:[%s1219_s3 + $0xc0] sm:$0xff] (!%p196_p2)  ;;  %v334_v29 = vld [vmem:[%s1219_s3 + $0x30] sm:$0xff] (!%p196_p2) }
   0xb   : > { %v696_v27 = vld [vmem:[%s1219_s3 + $0xc8] sm:$0xff] (!%p196_p2)  ;;  %v917_v28 = vpack.c.bf16 (!%p196_p2), %v333_v24, %v332_v23  ;;  %v335_v30 = vld [vmem:[%s1219_s3 + $0x38] sm:$0xff] (!%p196_p2)  ;;  %v697_v32 = vld [vmem:[%s1219_s3 + $0xd0] sm:$0xff] (!%p196_p2) }
   0xc   : > { %v899_v31 = vpack.c.bf16 (!%p196_p2), %v696_v27, %v695_v26  ;;  %v698_v33 = vld [vmem:[%s1219_s3 + $0xd8] sm:$0xff] (!%p196_p2)  ;;  %v920_v34 = vpack.c.bf16 (!%p196_p2), %v335_v30, %v334_v29  ;;  %v336_v35 = vld [vmem:[%s1219_s3 + $0x40] sm:$0xff] (!%p196_p2)  ;;  %v337_v36 = vld [vmem:[%s1219_s3 + $0x48] sm:$0xff] (!%p196_p2) }
   0xd   : > { %s1223_s19 = smov (!%p225_p3, %s676_s19), 1  ;;  %891 = vmatpush3.bf16.msra.mxu1 %v890_v9  ;;  %v902_v37 = vpack.c.bf16 %v698_v33, %v697_v32  ;;  %v699_v38 = vld [vmem:[%s1219_s3 + $0xe0] sm:$0xff]  ;;  %v700_v39 = vld [vmem:[%s1219_s3 + $0xe8] sm:$0xff]  ;;  %v923_v40 = vpack.c.bf16 %v337_v36, %v336_v35  ;;  %v338_v41 = vld [vmem:[%s1219_s3 + $0x50] sm:$0xff] }
   0xe   : > { %s681_s30 = sshll.u32 %s1223_s19, 2  ;;  %892 = vmatprep.subr.bf16.mxu1 %v977_v2  ;;  %v339_v42 = vld [vmem:[%s1219_s3 + $0x58] sm:$0xff]  ;;  %v905_v43 = vpack.c.bf16 %v700_v39, %v699_v38  ;;  %v340_v45 = vld [vmem:[%s1219_s3 + $0x60] sm:$0xff]  ;;  %v341_v46 = vld [vmem:[%s1219_s3 + $0x68] sm:$0xff]  ;;  %s683_s12 = sshll.u32 %s1223_s19, 3 }
   0xf   : > { %s228_s8 = scalar_lea.vmem %s1216_s0, %s681_s30  ;;  %s232_s11 = scalar_lea.vmem %s1217_s1, %s681_s30  ;;  %v926_v44 = vpack.c.bf16 %v339_v42, %v338_v41  ;;  %v929_v47 = vpack.c.bf16 %v341_v46, %v340_v45  ;;  %v342_v48 = vld [vmem:[%s1219_s3 + $0x70] sm:$0xff]  ;;  %v343_v49 = vld [vmem:[%s1219_s3 + $0x78] sm:$0xff]  ;;  %v703_v55 = vld [vmem:[%s1219_s3 + $0x100] sm:$0xff] }
  0x10   : > { %v237_v11 = vld [vmem:[%s228_s8] sm:$0xf]  ;;  %v932_v50 = vpack.c.bf16 %v343_v49, %v342_v48  ;;  %v701_v51 = vld [vmem:[%s1219_s3 + $0xf0] sm:$0xff]  ;;  %v702_v52 = vld [vmem:[%s1219_s3 + $0xf8] sm:$0xff]  ;;  %s236_s15 = scalar_lea.vmem %s1221_s5, %s683_s12 }
  0x11   : > { %v238_v12 = vld [vmem:[%s232_s11] sm:$0xf]  ;;  %894 = vmatpush3.bf16.msra.mxu1 %v893_v19  ;;  %v908_v53 = vpack.c.bf16 %v702_v52, %v701_v51  ;;  %v704_v56 = vld [vmem:[%s1219_s3 + $0x108] sm:$0xff]  ;;  %v705_v0 = vld [vmem:[%s1219_s3 + $0x110] sm:$0xff] }
  0x12   : > { %v239_v14 = vadd.f32 %v238_v12, %v237_v11  ;;  %895 = vmatprep.subr.bf16.mxu1 %v977_v2  ;;  %v935_v63 = vpack.c.bf16 %v704_v56, %v703_v55  ;;  %v706_v1 = vld [vmem:[%s1219_s3 + $0x118] sm:$0xff]  ;;  %v707_v6 = vld [vmem:[%s1219_s3 + $0x120] sm:$0xff]  ;;  %v708_v7 = vld [vmem:[%s1219_s3 + $0x128] sm:$0xff] }
  0x13   : > { %v938_v5 = vpack.c.bf16 %v706_v1, %v705_v0  ;;  %v941_v8 = vpack.c.bf16 %v708_v7, %v707_v6  ;;  %v709_v9 = vld [vmem:[%s1219_s3 + $0x130] sm:$0xff]  ;;  %v710_v10 = vld [vmem:[%s1219_s3 + $0x138] sm:$0xff]  ;;  %v711_v12 = vld [vmem:[%s1219_s3 + $0x140] sm:$0xff] }
  0x14   : > { %776 = vmatprep.subr.msk.mxu0 %vm249_vm1, %v239_v14  ;;  %v944_v11 = vpack.c.bf16 %v710_v10, %v709_v9  ;;  %v712_v13 = vld [vmem:[%s1219_s3 + $0x148] sm:$0xff]  ;;  %v715_v18 = vld [vmem:[%s1219_s3 + $0x160] sm:$0xff]  ;;  %v717_v21 = vld [vmem:[%s1219_s3 + $0x170] sm:$0xff] }
  0x15   : > { %777 = vmatpush3.msk.msra.mxu0 %vm249_vm1, %v239_v14  ;;  %897 = vmatpush3.bf16.msra.mxu1 %v896_v25  ;;  %v947_v14 = vpack.c.bf16 %v712_v13, %v711_v12  ;;  %v716_v19 = vld [vmem:[%s1219_s3 + $0x168] sm:$0xff]  ;;  %v719_v30 = vld [vmem:[%s1220_s4] ss:$0 sm:$0xff] }
  0x16   : > { %779 = vmatmul.mubr.msk.f32.vlgmr.msra.gmra.mrb[0].mxu0 %vm242_vm0, %v241_v15  ;;  %910 = vmatprep.subr.bf16.mxu0 %v977_v2  ;;  %v713_v15 = vld [vmem:[%s1219_s3 + $0x150] sm:$0xff]  ;;  %v953_v20 = vpack.c.bf16 %v716_v19, %v715_v18 }
  0x17   : > { %912 = vmatpush3.bf16.msra.mxu0 %v911_v16  ;;  %898 = vmatprep.subr.bf16.mxu1 %v977_v2  ;;  %v714_v16 = vld [vmem:[%s1219_s3 + $0x158] sm:$0xff] }
  0x18   : > { %913 = vmatprep.subr.bf16.mxu0 %v977_v2  ;;  %848 = vmatprep.mubr.msk.f32.mxu0 %vm978_vm2, %v979_v54  ;;  %v950_v17 = vpack.c.bf16 %v714_v16, %v713_v15 }
  0x19   : > { %900 = vmatpush3.bf16.msra.mxu1 %v899_v31 }
  0x1a   : > { %901 = vmatprep.subr.bf16.mxu1 %v977_v2 }
  0x1b   : > { %915 = vmatpush3.bf16.msra.mxu0 %v914_v22  ;;  %v718_v22 = vld [vmem:[%s1219_s3 + $0x178] sm:$0xff] }
  0x1c   : > { %916 = vmatprep.subr.bf16.mxu0 %v977_v2  ;;  %v956_v23 = vpack.c.bf16 %v718_v22, %v717_v21 }
  0x1d   : > { %903 = vmatpush3.bf16.msra.mxu1 %v902_v37 }
  0x1e   : > { %904 = vmatprep.subr.bf16.mxu1 %v977_v2 }
  0x1f   : > { %918 = vmatpush3.bf16.msra.mxu0 %v917_v28 }
  0x20   : > { %919 = vmatprep.subr.bf16.mxu0 %v977_v2 }
  0x21   : > { %906 = vmatpush3.bf16.msra.mxu1 %v905_v43 }
  0x22   : > { %907 = vmatprep.subr.bf16.mxu1 %v977_v2 }
  0x23   : > { %921 = vmatpush3.bf16.msra.mxu0 %v920_v34 }
  0x24   : > { %922 = vmatprep.subr.bf16.mxu0 %v977_v2 }
  0x25   : > { %909 = vmatpush3.bf16.msra.mxu1 %v908_v53 }
  0x26   : > { %934 = vmatprep.subr.bf16.mxu1 %v977_v2 }
  0x27   : > { %924 = vmatpush3.bf16.msra.mxu0 %v923_v40 }
  0x28   : > { %925 = vmatprep.subr.bf16.mxu0 %v977_v2 }
  0x2b   : > { %927 = vmatpush3.bf16.msra.mxu0 %v926_v44 }
  0x2c   : > { %928 = vmatprep.subr.bf16.mxu0 %v977_v2 }
  0x2f   : > { %930 = vmatpush3.bf16.msra.mxu0 %v929_v47 }
  0x30   : > { %931 = vmatprep.subr.bf16.mxu0 %v977_v2 }
  0x33   : > { %933 = vmatpush3.bf16.msra.mxu0 %v932_v50 }
  0xe9   : > { %v780_v57 = vpop.f32.mrb[0].mxu0 }
  0xea   : > { %v365_v58 = vrot.slane %v780_v57, 1  ;;  %v527_v59 = vrot.slane %v780_v57, 2  ;;  %v319_v60 = vpop.f32.mrb[1].mxu0 }
  0xeb   : > { %v364_v61 = vrot.slane %v319_v60, 1  ;;  %v526_v62 = vrot.slane %v319_v60, 2  ;;  %849 = vmatmul.mubr.f32.vlgmr.msra.gmra.mrb[2].mxu0 %v319_v60 }
  0xed   : > { %v366_v3 = vsel %vm363_vm3, %v364_v61, %v365_v58  ;;  %v528_v4 = vsel %vm525_vm4, %v526_v62, %v527_v59 }
  0xee   : > { %814 = vmatmul.mubr.f32.vlgmr.msra.gmra.mrb[0].mxu1 %v366_v3 }
  0xef   : > { %936 = vmatpush3.bf16.msra.mxu1 %v935_v63  ;;  %883 = vmatprep.mubr.msk.f32.mxu1 %vm978_vm2, %v979_v54 }
  0xf0   : > { %937 = vmatprep.subr.bf16.mxu1 %v977_v2 }
  0xf3   : > { %939 = vmatpush3.bf16.msra.mxu1 %v938_v5 }
  0xf4   : > { %940 = vmatprep.subr.bf16.mxu1 %v977_v2 }
  0xf7   : > { %942 = vmatpush3.bf16.msra.mxu1 %v941_v8 }
  0xf8   : > { %943 = vmatprep.subr.bf16.mxu1 %v977_v2 }
  0xfb   : > { %945 = vmatpush3.bf16.msra.mxu1 %v944_v11 }
  0xfc   : > { %946 = vmatprep.subr.bf16.mxu1 %v977_v2 }
  0xff   : > { %948 = vmatpush3.bf16.msra.mxu1 %v947_v14 }
 0x100   : > { %949 = vmatprep.subr.bf16.mxu1 %v977_v2 }
 0x103   : > { %951 = vmatpush3.bf16.msra.mxu1 %v950_v17 }
 0x104   : > { %952 = vmatprep.subr.bf16.mxu1 %v977_v2 }
 0x107   : > { %954 = vmatpush3.bf16.msra.mxu1 %v953_v20 }
 0x108   : > { %955 = vmatprep.subr.bf16.mxu1 %v977_v2 }
 0x10b   : > { %957 = vmatpush3.bf16.msra.mxu1 %v956_v23 }
 0x10e   : > { %884 = vmatmul.mubr.f32.vlgmr.msra.gmra.mrb[2].mxu1 %v528_v4 }
 0x1be   : > { %v504_v24 = vpop.f32.mrb[2].mxu0 }
 0x1bf   : > { %v850_v25 = vpop.f32.mrb[3].mxu0 }
 0x1c1   : > { %v434_v26 = vpop.f32.mrb[0].mxu1 }
 0x1c2   : > { %v505_v27 = vadd.f32 %v504_v24, %v434_v26  ;;  %v815_v28 = vpop.f32.mrb[1].mxu1 }
 0x1e1   : > { %v596_v29 = vpop.f32.mrb[2].mxu1 }
 0x1e2   : > { %v600_v31 = vadd.f32 %v596_v29, %v505_v27  ;;  %v885_v32 = vpop.f32.mrb[3].mxu1 }
 0x1e4   : > { %v608_v33 = vadd.f32 %v719_v30, %v600_v31 }
 0x1e6   : > { %v609_v2 = vmax.f32 %v608_v33, 0.0 }
 0x1e8   : > { %610 = vst [vmem:[%s236_s15] sm:$0xff] %v609_v2 }
 0x1e9 PF: > { %s15_s18 = sadd.s32 1, %s975_s18  }
 0x1ea   : > { %p12_p4 = scmp.ge.s32.totalorder %s15_s18, 4  }
 0x1ec   :  { %14 = sbr.rel (!%p12_p4) target bundleno = 1 (0x1), region = 75 }

// kernel: _lambda_.22
= control target key start
LH: loop header
LB: loop body
LE: loop exit
PB: predicated region body
PF: predicated region fallthrough
CT: control target
= control target key end

     0   :  { %s1083_s18 = smov 0   ;;  %s1273_s0 = inlined_call_operand.vmem [shape: f32[2,8,128], index: 0, kind: input, shape index: {}]   ;;  %s1274_s1 = inlined_call_operand.vmem [shape: f32[2,8,128], index: 1, kind: input, shape index: {}]   ;;  %s1275_s2 = inlined_call_operand.vmem [shape: f32[18,8], index: 2, kind: input, shape index: {}]   ;;  %s1276_s3 = inlined_call_operand.vmem [shape: f32[3,128,128], index: 3, kind: input, shape index: {}]   ;;  %s1277_s4 = inlined_call_operand.vmem [shape: f32[1,128], index: 4, kind: input, shape index: {}]   ;;  %s1278_s5 = inlined_call_operand.vmem [shape: f32[2,16,128], index: 5, kind: output, shape index: {}]  }
   0x1 LB: > { %s711_s19 = sadd.s32 4294967295, %s1049_s18   ;;  %p715_p0 = scmp.ge.s32.totalorder %s1049_s18, 1  ;;  %s1049_s18 = sphi %s1083_s18, %s15_s18  }
   0x2   : > { %p195_p1 = scmp.lt.s32.totalorder %s1049_s18, 3 }
   0x4   : > { %p196_p2 = pnand %p715_p0, %p195_p1 }
   0x5   : > { %p226_p3 = scmp.lt.s32.totalorder (!%p196_p2), %s711_s19, 1  ;;  %v1051_v0 = vmov (!%p196_p2), 0.0   ;;  %vm1052_vm0 = vmmov (!%p196_p2), 0   ;;  %v335_v1 = vld [vmem:[%s1276_s3] sm:$0xff] (!%p196_p2)  ;;  %v336_v2 = vld [vmem:[%s1276_s3 + $0x8] sm:$0xff] (!%p196_p2)  ;;  %v337_v4 = vld [vmem:[%s1276_s3 + $0x10] sm:$0xff] (!%p196_p2) }
   0x6   : > { %199 = sbr.rel (%p196_p2) target bundleno = 489 (0x1e9), region = 40  ;;  %817 = vmatprep.subr.mxu0 (!%p196_p2), %v1051_v0  ;;  %819 = vmatprep.mubr.msk.f32.mxu0 (!%p196_p2), %vm1052_vm0, %v1051_v0  ;;  %v965_v3 = vpack.c.bf16 (!%p196_p2), %v336_v2, %v335_v1  ;;  %v338_v5 = vld [vmem:[%s1276_s3 + $0x18] sm:$0xff] (!%p196_p2)  ;;  %v723_v7 = vld [vmem:[%s1276_s3 + $0x80] sm:$0xff] (!%p196_p2)  ;;  %v724_v8 = vld [vmem:[%s1276_s3 + $0x88] sm:$0xff] (!%p196_p2)  ;;  %vm245_vm1 = vcmask (!%p196_p2), 64512   ;;  %vm371_vm2 = vcmask (!%p196_p2), 1046528  }
   0x7   : > { %v969_v6 = vpack.c.bf16 (!%p196_p2), %v338_v5, %v337_v4  ;;  %v339_v9 = vld [vmem:[%s1276_s3 + $0x20] sm:$0xff] (!%p196_p2)  ;;  %v340_v10 = vld [vmem:[%s1276_s3 + $0x28] sm:$0xff] (!%p196_p2)  ;;  %v725_v11 = vld [vmem:[%s1276_s3 + $0x90] sm:$0xff] (!%p196_p2)  ;;  %v933_v14 = vpack.c.bf16 (!%p196_p2), %v724_v8, %v723_v7  ;;  %vm546_vm3 = vcmask (!%p196_p2), 1045504  }
   0x8   : > { %966 = vmatprep.subr.bf16.mxu1 (!%p196_p2), %v965_v3  ;;  %v726_v15 = vld [vmem:[%s1276_s3 + $0x98] sm:$0xff] (!%p196_p2)  ;;  %v242_v17 = vld [vmem:[%s1275_s2] sm:$0xff] (!%p196_p2)  ;;  %v973_v18 = vpack.c.bf16 (!%p196_p2), %v340_v10, %v339_v9  ;;  %v341_v19 = vld [vmem:[%s1276_s3 + $0x30] sm:$0xff] (!%p196_p2) }
   0x9   : > { %968 = vmatpush3.bf16.msra.mxu1 (!%p196_p2), %v965_v3  ;;  %v342_v20 = vld [vmem:[%s1276_s3 + $0x38] sm:$0xff] (!%p196_p2)  ;;  %v937_v21 = vpack.c.bf16 (!%p196_p2), %v726_v15, %v725_v11  ;;  %v727_v23 = vld [vmem:[%s1276_s3 + $0xa0] sm:$0xff] (!%p196_p2)  ;;  %v728_v24 = vld [vmem:[%s1276_s3 + $0xa8] sm:$0xff] (!%p196_p2) }
   0xa   : > { %970 = vmatprep.subr.bf16.mxu1 (!%p196_p2), %v969_v6  ;;  %v977_v22 = vpack.c.bf16 (!%p196_p2), %v342_v20, %v341_v19  ;;  %v243_v25 = vld [vmem:[%s1275_s2 + $0x8] sm:$0xff] (!%p196_p2)  ;;  %v343_v26 = vld [vmem:[%s1276_s3 + $0x40] sm:$0xff] (!%p196_p2)  ;;  %v941_v28 = vpack.c.bf16 (!%p196_p2), %v728_v24, %v727_v23  ;;  %v729_v30 = vld [vmem:[%s1276_s3 + $0xb0] sm:$0xff] (!%p196_p2) }
   0xb   : > { %v344_v27 = vld [vmem:[%s1276_s3 + $0x48] sm:$0xff] (!%p196_p2)  ;;  %v730_v31 = vld [vmem:[%s1276_s3 + $0xb8] sm:$0xff] (!%p196_p2)  ;;  %v244_v32 = vld [vmem:[%s1275_s2 + $0x10] sm:$0x3] (!%p196_p2) }
   0xc   : > { %v981_v29 = vpack.c.bf16 (!%p196_p2), %v344_v27, %v343_v26  ;;  %v345_v33 = vld [vmem:[%s1276_s3 + $0x50] sm:$0xff] (!%p196_p2)  ;;  %v346_v34 = vld [vmem:[%s1276_s3 + $0x58] sm:$0xff] (!%p196_p2)  ;;  %v945_v35 = vpack.c.bf16 (!%p196_p2), %v730_v31, %v729_v30  ;;  %v731_v37 = vld [vmem:[%s1276_s3 + $0xc0] sm:$0xff] (!%p196_p2) }
   0xd   : > { %s1280_s19 = smov (!%p226_p3, %s711_s19), 1  ;;  %972 = vmatpush3.bf16.msra.mxu1 %v969_v6  ;;  %v985_v36 = vpack.c.bf16 %v346_v34, %v345_v33  ;;  %v732_v38 = vld [vmem:[%s1276_s3 + $0xc8] sm:$0xff]  ;;  %v347_v39 = vld [vmem:[%s1276_s3 + $0x60] sm:$0xff]  ;;  %v733_v43 = vld [vmem:[%s1276_s3 + $0xd0] sm:$0xff] }
   0xe   : > { %s716_s7 = sshll.u32 %s1280_s19, 3  ;;  %974 = vmatprep.subr.bf16.mxu1 %v973_v18  ;;  %v348_v40 = vld [vmem:[%s1276_s3 + $0x68] sm:$0xff]  ;;  %v949_v41 = vpack.c.bf16 %v732_v38, %v731_v37  ;;  %v734_v44 = vld [vmem:[%s1276_s3 + $0xd8] sm:$0xff]  ;;  %v349_v45 = vld [vmem:[%s1276_s3 + $0x70] sm:$0xff] }
   0xf   : > { %s229_s14 = scalar_lea.vmem %s1273_s0, %s716_s7  ;;  %s233_s17 = scalar_lea.vmem %s1274_s1, %s716_s7  ;;  %v989_v42 = vpack.c.bf16 %v348_v40, %v347_v39  ;;  %v953_v46 = vpack.c.bf16 %v734_v44, %v733_v43  ;;  %v350_v47 = vld [vmem:[%s1276_s3 + $0x78] sm:$0xff]  ;;  %v735_v49 = vld [vmem:[%s1276_s3 + $0xe0] sm:$0xff]  ;;  %v736_v50 = vld [vmem:[%s1276_s3 + $0xe8] sm:$0xff] }
  0x10   : > { %v239_v12 = vld [vmem:[%s229_s14] sm:$0xff]  ;;  %v993_v48 = vpack.c.bf16 %v350_v47, %v349_v45  ;;  %v957_v52 = vpack.c.bf16 %v736_v50, %v735_v49  ;;  %v740_v53 = vld [vmem:[%s1276_s3 + $0x108] sm:$0xff]  ;;  %v737_v55 = vld [vmem:[%s1276_s3 + $0xf0] sm:$0xff]  ;;  %s758_s14 = sshll.u32 %s1280_s19, 4 }
  0x11   : > { %v240_v13 = vld [vmem:[%s233_s17] sm:$0xff]  ;;  %976 = vmatpush3.bf16.msra.mxu1 %v973_v18  ;;  %v738_v56 = vld [vmem:[%s1276_s3 + $0xf8] sm:$0xff]  ;;  %v741_v59 = vld [vmem:[%s1276_s3 + $0x110] sm:$0xff]  ;;  %s238_s17 = scalar_lea.vmem %s1278_s5, %s758_s14 }
  0x12   : > { %v241_v16 = vadd.f32 %v240_v13, %v239_v12  ;;  %978 = vmatprep.subr.bf16.mxu1 %v977_v22  ;;  %v739_v51 = vld [vmem:[%s1276_s3 + $0x100] sm:$0xff]  ;;  %v961_v57 = vpack.c.bf16 %v738_v56, %v737_v55  ;;  %v742_v60 = vld [vmem:[%s1276_s3 + $0x118] sm:$0xff]  ;;  %v744_v1 = vld [vmem:[%s1276_s3 + $0x128] sm:$0xff] }
  0x13   : > { %v997_v54 = vpack.c.bf16 %v740_v53, %v739_v51  ;;  %v1001_v62 = vpack.c.bf16 %v742_v60, %v741_v59  ;;  %v745_v11 = vld [vmem:[%s1276_s3 + $0x130] sm:$0xff]  ;;  %v746_v12 = vld [vmem:[%s1276_s3 + $0x138] sm:$0xff]  ;;  %v747_v19 = vld [vmem:[%s1276_s3 + $0x140] sm:$0xff] }
  0x14   : > { %818 = vmatpush3.msra.mxu0 %v241_v16  ;;  %v748_v20 = vld [vmem:[%s1276_s3 + $0x148] sm:$0xff]  ;;  %v750_v23 = vld [vmem:[%s1276_s3 + $0x158] sm:$0xff]  ;;  %v755_v34 = vld [vmem:[%s1277_s4] ss:$0 sm:$0xff] }
  0x15   : > { %820 = vmatmul.mubr.msk.f32.vlgmr.msra.gmra.mrb[0].mxu0 %vm245_vm1, %v242_v17  ;;  %934 = vmatprep.subr.bf16.mxu0 %v933_v14  ;;  %v1009_v17 = vpack.c.bf16 %v746_v12, %v745_v11  ;;  %v752_v26 = vld [vmem:[%s1276_s3 + $0x168] sm:$0xff] }
  0x16   : > { %822 = vmatprep.mubr.msk.f32.mxu0 %vm1052_vm0, %v1051_v0  ;;  %936 = vmatpush3.bf16.msra.mxu0 %v933_v14 }
  0x17   : > { %938 = vmatprep.subr.bf16.mxu0 %v937_v21  ;;  %980 = vmatpush3.bf16.msra.mxu1 %v977_v22  ;;  %v749_v22 = vld [vmem:[%s1276_s3 + $0x150] sm:$0xff] }
  0x18   : > { %982 = vmatprep.subr.bf16.mxu1 %v981_v29  ;;  %v1017_v24 = vpack.c.bf16 %v750_v23, %v749_v22 }
  0x19   : > { %823 = vmatmul.mubr.msk.f32.gmra.mrb[2].mxu0 %vm245_vm1, %v243_v25  ;;  %v751_v25 = vld [vmem:[%s1276_s3 + $0x160] sm:$0xff] }
  0x1a   : > { %825 = vmatprep.mubr.msk.f32.mxu0 %vm1052_vm0, %v1051_v0  ;;  %940 = vmatpush3.bf16.msra.mxu0 %v937_v21  ;;  %v743_v0 = vld [vmem:[%s1276_s3 + $0x120] sm:$0xff]  ;;  %v1013_v21 = vpack.c.bf16 %v748_v20, %v747_v19  ;;  %v1021_v27 = vpack.c.bf16 %v752_v26, %v751_v25 }
  0x1b   : > { %942 = vmatprep.subr.bf16.mxu0 %v941_v28  ;;  %984 = vmatpush3.bf16.msra.mxu1 %v981_v29  ;;  %v1005_v9 = vpack.c.bf16 %v744_v1, %v743_v0  ;;  %v754_v29 = vld [vmem:[%s1276_s3 + $0x178] sm:$0xff] }
  0x1c   : > { %986 = vmatprep.subr.bf16.mxu1 %v985_v36 }
  0x1d   : > { %826 = vmatmul.mubr.msk.f32.gmra.mrb[4].mxu0 %vm245_vm1, %v244_v32 }
  0x1e   : > { %944 = vmatpush3.bf16.msra.mxu0 %v941_v28  ;;  %v753_v28 = vld [vmem:[%s1276_s3 + $0x170] sm:$0xff] }
  0x1f   : > { %946 = vmatprep.subr.bf16.mxu0 %v945_v35  ;;  %988 = vmatpush3.bf16.msra.mxu1 %v985_v36  ;;  %v1025_v30 = vpack.c.bf16 %v754_v29, %v753_v28 }
  0x20   : > { %990 = vmatprep.subr.bf16.mxu1 %v989_v42 }
  0x22   : > { %948 = vmatpush3.bf16.msra.mxu0 %v945_v35 }
  0x23   : > { %950 = vmatprep.subr.bf16.mxu0 %v949_v41  ;;  %992 = vmatpush3.bf16.msra.mxu1 %v989_v42 }
  0x24   : > { %994 = vmatprep.subr.bf16.mxu1 %v993_v48 }
  0x26   : > { %952 = vmatpush3.bf16.msra.mxu0 %v949_v41 }
  0x27   : > { %954 = vmatprep.subr.bf16.mxu0 %v953_v46  ;;  %996 = vmatpush3.bf16.msra.mxu1 %v993_v48 }
  0x28   : > { %998 = vmatprep.subr.bf16.mxu1 %v997_v54 }
  0x2a   : > { %956 = vmatpush3.bf16.msra.mxu0 %v953_v46 }
  0x2b   : > { %958 = vmatprep.subr.bf16.mxu0 %v957_v52 }
  0x2e   : > { %960 = vmatpush3.bf16.msra.mxu0 %v957_v52 }
  0x2f   : > { %962 = vmatprep.subr.bf16.mxu0 %v961_v57 }
  0x32   : > { %964 = vmatpush3.bf16.msra.mxu0 %v961_v57 }
  0xe8   : > { %v321_v58 = vpop.f32.mrb[0].mxu0 }
  0xe9   : > { %v821_v61 = vpop.f32.mrb[1].mxu0  ;;  %895 = vmatprep.mubr.f32.mxu1 %v321_v58  ;;  %v372_v2 = vrot.slane %v321_v58, 1  ;;  %v547_v3 = vrot.slane %v321_v58, 2 }
  0xec   : > { %v326_v63 = vpop.f32.mrb[2].mxu0 }
  0xed   : > { %v373_v4 = vrot.slane %v326_v63, 1  ;;  %v548_v5 = vrot.slane %v326_v63, 2  ;;  %v824_v6 = vpop.f32.mrb[3].mxu0  ;;  %896 = vmatmul.mubr.f32.vlgmr.msra.gmra.mrb[0].mxu1 %v326_v63 }
  0xee   : > { %1000 = vmatpush3.bf16.msra.mxu1 %v997_v54 }
  0xef   : > { %v374_v7 = vsel %vm371_vm2, %v372_v2, %v373_v4  ;;  %1002 = vmatprep.subr.bf16.mxu1 %v1001_v62  ;;  %v549_v8 = vsel %vm546_vm3, %v547_v3, %v548_v5 }
  0xf0   : > { %v331_v10 = vpop.f32.mrb[4].mxu0  ;;  %860 = vmatprep.mubr.f32.mxu0 %v374_v7  ;;  %930 = vmatprep.mubr.f32.mxu1 %v549_v8 }
  0xf1   : > { %v375_v13 = vrot.slane %v331_v10, 1  ;;  %v550_v14 = vrot.slane %v331_v10, 2  ;;  %v827_v15 = vpop.f32.mrb[5].mxu0 }
  0xf2   : > { %1004 = vmatpush3.bf16.msra.mxu1 %v1001_v62 }
  0xf3   : > { %v376_v16 = vsel %vm371_vm2, %v373_v4, %v375_v13  ;;  %1006 = vmatprep.subr.bf16.mxu1 %v1005_v9  ;;  %v551_v18 = vsel %vm546_vm3, %v548_v5, %v550_v14 }
  0xf4   : > { %861 = vmatmul.mubr.f32.vlgmr.msra.gmra.mrb[6].mxu0 %v376_v16 }
  0xf6   : > { %1008 = vmatpush3.bf16.msra.mxu1 %v1005_v9 }
  0xf7   : > { %1010 = vmatprep.subr.bf16.mxu1 %v1009_v17 }
  0xfa   : > { %1012 = vmatpush3.bf16.msra.mxu1 %v1009_v17 }
  0xfb   : > { %1014 = vmatprep.subr.bf16.mxu1 %v1013_v21 }
  0xfe   : > { %1016 = vmatpush3.bf16.msra.mxu1 %v1013_v21 }
  0xff   : > { %1018 = vmatprep.subr.bf16.mxu1 %v1017_v24 }
 0x102   : > { %1020 = vmatpush3.bf16.msra.mxu1 %v1017_v24 }
 0x103   : > { %1022 = vmatprep.subr.bf16.mxu1 %v1021_v27 }
 0x106   : > { %1024 = vmatpush3.bf16.msra.mxu1 %v1021_v27 }
 0x107   : > { %1026 = vmatprep.subr.bf16.mxu1 %v1025_v30 }
 0x10a   : > { %1028 = vmatpush3.bf16.msra.mxu1 %v1025_v30 }
 0x10d   : > { %931 = vmatmul.mubr.f32.vlgmr.msra.gmra.mrb[0].mxu1 %v551_v18 }
 0x1c7   : > { %v862_v31 = vpop.f32.mrb[6].mxu0 }
 0x1c8   : > { %v445_v32 = vpop.f32.mrb[7].mxu0 }
 0x1e0   : > { %v932_v33 = vpop.f32.mrb[0].mxu1 }
 0x1e1   : > { %v1029_v35 = vadd.f32 %v932_v33, %v862_v31  ;;  %v620_v36 = vpop.f32.mrb[1].mxu1 }
 0x1e2   : > { %v1030_v37 = vadd.f32 %v620_v36, %v445_v32 }
 0x1e3   : > { %v639_v38 = vadd.f32 %v1029_v35, %v755_v34 }
 0x1e4   : > { %v638_v39 = vadd.f32 %v1030_v37, %v755_v34 }
 0x1e5   : > { %v641_v40 = vmax.f32 %v639_v38, 0.0 }
 0x1e6   : > { %v640_v41 = vmax.f32 %v638_v39, 0.0 }
 0x1e7   : > { %643 = vst [vmem:[%s238_s17 + $0x8] sm:$0xff] %v641_v40 }
 0x1e8   : > { %642 = vst [vmem:[%s238_s17] sm:$0xff] %v640_v41 }
 0x1e9 PF: > { %s15_s18 = sadd.s32 1, %s1049_s18  }
 0x1ea   : > { %p12_p4 = scmp.ge.s32.totalorder %s15_s18, 4  }
 0x1ec   :  { %14 = sbr.rel (!%p12_p4) target bundleno = 1 (0x1), region = 75 }

// kernel: _lambda_.23
= control target key start
LH: loop header
LB: loop body
LE: loop exit
PB: predicated region body
PF: predicated region fallthrough
CT: control target
= control target key end

     0   :  { %9 = vsyncpa [#allocation3], 0  ;;  %s812_s0 = inlined_call_operand.vmem [shape: f32[2,16,128], index: 0, kind: input, shape index: {}]   ;;  %s813_s1 = inlined_call_operand.vmem [shape: f32[2,16,128], index: 1, kind: input, shape index: {}]   ;;  %s814_s2 = inlined_call_operand.vmem [shape: f32[1,128,16], index: 2, kind: input, shape index: {}]   ;;  %s815_s3 = inlined_call_operand.vmem [shape: f32[1,16], index: 3, kind: input, shape index: {}]   ;;  %s816_s4 = inlined_call_operand.hbm [shape: f32[2,16,16], index: 4, kind: output, shape index: {}]  }
   0x1   :  { %11 = vsyncpa [#allocation3 + $0x1], 0  ;;  %s647_s15 = smov 0   ;;  %s649_s16 = smov 0  }
   0x2   :  { %s651_s17 = smov 0   ;;  %s653_s18 = smov 0  }
   0x3 LB: > { %s668_s19 = sadd.s32 4294967295, %s617_s18   ;;  %s411_s20 = sadd.s32 4294967294, %s617_s18   ;;  %s617_s18 = sphi %s653_s18, %s822_s18   ;;  %s613_s17 = sphi %s651_s17, %s821_s17   ;;  %s609_s16 = sphi %s649_s16, %s820_s16   ;;  %s605_s15 = sphi %s647_s15, %s819_s15  }
   0x4   : > { %s672_s21 = sadd.s32 1, %s617_s18   ;;  %s118_s22 = sadd.s32 1, %s613_s17 }
   0x5   : > { %s115_s23 = ssub.s32 %s617_s18, %s672_s21  ;;  %p128_p0 = scmp.ne.s32.totalorder %s613_s17, %s609_s16 }
   0x6   : > { %p116_p1 = scmp.eq.s32.totalorder %s115_s23, 0  ;;  %p129_p2 = scmp.eq.s32.totalorder %s668_s19, 1 }
   0x7   : > { %p134_p3 = scmp.ne.s32.totalorder %s609_s16, %s605_s15  ;;  %p135_p4 = scmp.eq.s32.totalorder %s411_s20, 1 }
   0x8   : > { %s683_s24 = scalar_select %p116_p1, %s613_s17, %s118_s22  }
   0x9   : > { %p685_p5 = por %p129_p2, %p128_p0  ;;  %p689_p6 = por %p135_p4, %p134_p3 }
   0xa   : > { %p414_p7 = scmp.ge.s32.totalorder %s617_s18, 1  ;;  %p175_p8 = scmp.lt.s32.totalorder %s617_s18, 3 }
   0xc   : > { %p176_p9 = pnand %p414_p7, %p175_p8 }
   0xd   : > { %v222_v0 = vld [vmem:[%s814_s2] sm:$0xff] (!%p176_p9)  ;;  %v223_v1 = vld [vmem:[%s814_s2 + $0x8] sm:$0xff] (!%p176_p9)  ;;  %v224_v2 = vld [vmem:[%s814_s2 + $0x10] sm:$0xff] (!%p176_p9)  ;;  %p206_p10 = scmp.lt.s32.totalorder (!%p176_p9), %s668_s19, 1  ;;  %s203_s9 = sand.u32 (!%p176_p9), 1, %s609_s16   ;;  %vm320_vm0 = vcmask (!%p176_p9), 130048  }
   0xe   : > { %179 = sbr.rel (%p176_p9) target bundleno = 278 (0x116), region = 36  ;;  %v482_v3 = vpack.c.bf16 (!%p176_p9), %v223_v1, %v222_v0  ;;  %v225_v4 = vld [vmem:[%s814_s2 + $0x18] sm:$0xff] (!%p176_p9)  ;;  %v226_v6 = vld [vmem:[%s814_s2 + $0x20] sm:$0xff] (!%p176_p9)  ;;  %v227_v7 = vld [vmem:[%s814_s2 + $0x28] sm:$0xff] (!%p176_p9)  ;;  %s415_s10 = sshll.u32 (!%p176_p9), %s203_s9, 4 }
   0xf   : > { %v486_v5 = vpack.c.bf16 (!%p176_p9), %v225_v4, %v224_v2  ;;  %v490_v8 = vpack.c.bf16 (!%p176_p9), %v227_v7, %v226_v6  ;;  %v228_v9 = vld [vmem:[%s814_s2 + $0x30] sm:$0xff] (!%p176_p9)  ;;  %v229_v10 = vld [vmem:[%s814_s2 + $0x38] sm:$0xff] (!%p176_p9)  ;;  %v230_v15 = vld [vmem:[%s814_s2 + $0x40] sm:$0xff] (!%p176_p9)  ;;  %s428_s20 = sshll.u32 (!%p176_p9), %s668_s19, 8  ;;  %s771_s23 = scalar_lea.sflag (!%p176_p9), [#allocation3], %s203_s9 }
  0x10   : > { %483 = vmatprep.subr.bf16.mxu0 (!%p176_p9), %v482_v3  ;;  %v494_v14 = vpack.c.bf16 (!%p176_p9), %v229_v10, %v228_v9  ;;  %v231_v16 = vld [vmem:[%s814_s2 + $0x48] sm:$0xff] (!%p176_p9)  ;;  %v232_v18 = vld [vmem:[%s814_s2 + $0x50] sm:$0xff] (!%p176_p9)  ;;  %v233_v19 = vld [vmem:[%s814_s2 + $0x58] sm:$0xff] (!%p176_p9)  ;;  %s769_s22 = scalar_lea.hbm (!%p176_p9), %s816_s4, %s428_s20  ;;  %s619_s27 = smov (!%p176_p9), [#allocation2]  }
  0x11   : > { %485 = vmatpush3.bf16.msra.mxu0 (!%p176_p9), %v482_v3  ;;  %v498_v17 = vpack.c.bf16 (!%p176_p9), %v231_v16, %v230_v15  ;;  %v502_v20 = vpack.c.bf16 (!%p176_p9), %v233_v19, %v232_v18  ;;  %v234_v21 = vld [vmem:[%s814_s2 + $0x60] sm:$0xff] (!%p176_p9)  ;;  %v235_v22 = vld [vmem:[%s814_s2 + $0x68] sm:$0xff] (!%p176_p9)  ;;  %v236_v24 = vld [vmem:[%s814_s2 + $0x70] sm:$0xff] (!%p176_p9)  ;;  %s559_s29 = sshll.u32 (!%p176_p9), %s619_s27, 4  ;;  %s560_s29 = int_to_ptr.vmem [resolvable:$false] %s559_s29 }
  0x12   : > { %487 = vmatprep.subr.bf16.mxu0 (!%p176_p9), %v486_v5  ;;  %v506_v23 = vpack.c.bf16 (!%p176_p9), %v235_v22, %v234_v21  ;;  %v237_v25 = vld [vmem:[%s814_s2 + $0x78] sm:$0xff] (!%p176_p9)  ;;  %v420_v30 = vld [vmem:[%s815_s3] ss:$0 sm:$0xff] (!%p176_p9)  ;;  %s561_s30 = scalar_lea.vmem (!%p176_p9), %s560_s29, 512 }
  0x13   : > { %v510_v26 = vpack.c.bf16 (!%p176_p9), %v237_v25, %v236_v24 }
  0x15   : > { %s207_s13 = scalar_select %p206_p10, %s668_s19, 1  ;;  %489 = vmatpush3.bf16.msra.mxu0 %v486_v5 }
  0x16   : > { %491 = vmatprep.subr.bf16.mxu0 %v490_v8 }
  0x17   : > { %s426_s14 = sshll.u32 %s207_s13, 4  ;;  %s205_s13 = scalar_lea.vmem [#allocation2], %s415_s10 }
  0x18   : > { %s721_s28 = scalar_lea.vmem %s812_s0, %s426_s14  ;;  %s726_s5 = scalar_lea.vmem %s813_s1, %s426_s14 }
  0x19   : > { %v216_v11 = vld [vmem:[%s721_s28] sm:$0xff]  ;;  %493 = vmatpush3.bf16.msra.mxu0 %v490_v8  ;;  %v217_v27 = vld [vmem:[%s721_s28 + $0x8] sm:$0xff]  ;;  %s337_s14 = sshll.u32 %s205_s13, 4  ;;  %s764_s14 = int_to_ptr.vmem [resolvable:$true] %s337_s14 }
  0x1a   : > { %v218_v12 = vld [vmem:[%s726_s5] sm:$0xff]  ;;  %495 = vmatprep.subr.bf16.mxu0 %v494_v14  ;;  %v219_v28 = vld [vmem:[%s726_s5 + $0x8] sm:$0xff]  ;;  %s555_s19 = scalar_lea.vmem %s764_s14, 256  ;;  %p562_p0 = scmp.lt.s32.totalorder %s764_s14, %s560_s29 }
  0x1b   : > { %v220_v13 = vadd.f32 %v218_v12, %v216_v11  ;;  %v221_v29 = vadd.f32 %v219_v28, %v217_v27  ;;  %p556_p11 = scmp.ne.s32.totalorder %s764_s14, %s555_s19  ;;  %p563_p1 = scmp.lt.s32.totalorder %s561_s30, %s555_s19 }
  0x1d   : > { %479 = vmatprep.mubr.f32.mxu0 %v220_v13  ;;  %497 = vmatpush3.bf16.msra.mxu0 %v494_v14  ;;  %p557_p12 = pnand %p556_p11, %p685_p5  ;;  %p564_p2 = por %p563_p1, %p562_p0 }
  0x1e   : > { %499 = vmatprep.subr.bf16.mxu0 %v498_v17 }
  0x1f   : > { %p558_p13 = pneg %p557_p12 }
  0x21   : > { %501 = vmatpush3.bf16.msra.mxu0 %v498_v17  ;;  %p565_p3 = pnand %p564_p2, %p558_p13 }
  0x22   : > { %503 = vmatprep.subr.bf16.mxu0 %v502_v20 }
  0x25   : > { %505 = vmatpush3.bf16.msra.mxu0 %v502_v20 }
  0x26   : > { %507 = vmatprep.subr.bf16.mxu0 %v506_v23 }
  0x29   : > { %509 = vmatpush3.bf16.msra.mxu0 %v506_v23 }
  0x2a   : > { %511 = vmatprep.subr.bf16.mxu0 %v510_v26 }
  0x2d   : > { %513 = vmatpush3.bf16.msra.mxu0 %v510_v26 }
  0x30   : > { %480 = vmatmul.mubr.f32.vlgmr.msra.gmra.mrb[0].mxu0 %v221_v29 }
 0x103   : > { %v481_v31 = vpop.f32.mrb[0].mxu0 }
 0x104   : > { %v317_v32 = vadd.f32 %v481_v31, %v420_v30  ;;  %v311_v33 = vpop.f32.mrb[1].mxu0 }
 0x105   : > { %v312_v34 = vadd.f32 %v420_v30, %v311_v33 }
 0x106   : > { %322 = vst.msk [vmem:[%s205_s13 + $0x8] sm:$0xff] %vm320_vm0, %v317_v32 }
 0x107   : > { %321 = vst.msk [vmem:[%s205_s13] sm:$0xff] %vm320_vm0, %v312_v34 }
 0x108   : > { %568 = shalt.err (!%p565_p3)
}
 0x109   : > { %s569_s6 = scalar_lea.hbm %s769_s22, 256  ;;  %s573_s9 = scalar_lea.hbm %s816_s4, 512 }
 0x10a   : > { %p570_p4 = scmp.ne.s32.totalorder %s769_s22, %s569_s6  ;;  %p574_p9 = scmp.lt.u32.totalorder %s769_s22, %s816_s4 }
 0x10b   : > { %p575_p10 = scmp.lt.u32.totalorder %s573_s9, %s569_s6  ;;  %p577_p12 = scmp.lt.u32.totalorder %s569_s6, %s769_s22 }
 0x10c   : > { %p571_p7 = pnand %p570_p4, %p685_p5 }
 0x10d   : > { %p576_p11 = por %p575_p10, %p574_p9 }
 0x10e   : > { %p572_p8 = pneg %p571_p7 }
 0x10f   : > { %p578_p13 = por %p577_p12, %p576_p11 }
 0x111   : > { %p579_p0 = pnand %p578_p13, %p572_p8 }
 0x113   : > { %582 = shalt.err (!%p579_p0)
}
 0x114   : > { %s620_s12 = smov 128   ;;  %s621_s13 = smov 8  }
 0x115   : > { %514 = dma.vmem_to_hbm [thread:$0]  (%p685_p5), %s764_s14, 256, %s769_s22, %s771_s23, %s620_s12, %s620_s12, %s621_s13  }
 0x116 PF: > { %p520_p1 = scmp.ge.s32.totalorder %s617_s18, 2  ;;  %s352_s20 = sand.u32 1, %s605_s15  }
 0x117   : > { %s353_s28 = scalar_lea.sflag [#allocation3], %s352_s20 }
 0x118   : > { %p517_p2 = pnand %p520_p1, %p689_p6 }
 0x11a   : > { %600 = dma.done.wait (!%p517_p2), %s353_s28, 256  }
 0x11b   : > { %602 = vsyncadd (!%p517_p2), %s353_s28, 4294967040  ;;  %p14_p3 = scmp.ge.s32.totalorder %s672_s21, 4   ;;  %s819_s15 = smov %s609_s16 }
 0x11c   : > { %s820_s16 = smov %s613_s17  ;;  %s821_s17 = smov %s683_s24 }
 0x11d   : > { %s822_s18 = smov %s672_s21  ;;  %16 = sbr.rel (!%p14_p3) target bundleno = 3 (0x3), region = 74 }
 0x124   :  { %358 = vsyncpa [#allocation3], 1 }
 0x125   :  { %360 = vsyncpa [#allocation3 + $0x1], 1 }

</bundles_post_ra>
